<compile_context>
chip_gen: v7x
topology: tpu7x:2x2x1
jax: 0.10.0
libtpu: 0.0.40
codegen_flags: <defaults>
</compile_context>

<pallas_src>
import math

import jax
import jax.numpy as jnp
from jax.experimental import pallas as pl
from jax.experimental.pallas import tpu as pltpu

# ----------------------------- config (small) -----------------------------
B = 2            # batch
S = 8            # sequence length
VOCAB = 100
BERT_H = 32      # bert hidden_size
N_HEADS = 4
HEAD_D = BERT_H // N_HEADS
INTER = 64       # bert intermediate size
N_LAYERS = 2
HIDDEN_DIM = 16  # hidden_dim of the EfficientTransformer head (Linear/LSTM)
LN_EPS = 1e-12
MASK_BIAS = -1e9

# padded lane widths (multiples of 128 -> unmasked loads, aligned slices)
HP = 128         # padded BERT hidden
IP = 128         # padded intermediate
GP = 128         # padded LSTM hidden / per-gate width


# --------------------------- in-kernel helpers -----------------------------
def _layer_norm_padded(x, g, b, true_dim):
    """LayerNorm over the last axis when the real width is `true_dim` and the
    remaining lanes are zero-padded.  Padded gamma/beta are zero, so padded
    output lanes stay exactly zero."""
    inv_n = 1.0 / true_dim
    mu = jnp.sum(x, axis=-1, keepdims=True) * inv_n
    ex2 = jnp.sum(x * x, axis=-1, keepdims=True) * inv_n
    var = ex2 - mu * mu
    return (x - mu) * jax.lax.rsqrt(var + LN_EPS) * g + b


def _gelu_tanh(x):
    # TODO(synk): HF BertModel default intermediate act is exact (erf) gelu;
    # tanh approximation used here (EUP-friendly, tiny numeric difference).
    c = math.sqrt(2.0 / math.pi)
    return 0.5 * x * (1.0 + jnp.tanh(c * (x + 0.044715 * x * x * x)))


# ---------------------- single fused forward kernel ------------------------
def _fused_forward_kernel(
        mask_ref, emb_ref, emb_g_ref, emb_b_ref,
        wqkv_ref, bqkv_ref, wo_ref, bo_ref, ln1g_ref, ln1b_ref,
        wi_ref, bi_ref, wo2_ref, bo2_ref, ln2g_ref, ln2b_ref,
        rw_ref, rb_ref, wih_ref, whh_ref, lb_ref, fcw_ref, fcb_ref,
        o_ref):
    scale = 1.0 / math.sqrt(HEAD_D)

    # additive attention-mask bias, computed ONCE for all layers / heads
    bias = ((1.0 - mask_ref[...]) * MASK_BIAS)[:, None, :]          # (B, 1, S)

    # ---- BERT embedding LayerNorm ----
    x = _layer_norm_padded(emb_ref[...], emb_g_ref[...], emb_b_ref[...],
                           BERT_H)                                   # (B*S, HP)

    # ---- BERT encoder layers (weights stacked on a leading layer axis) ----
    for l in range(N_LAYERS):
        # fused QKV projection: q/k/v live in disjoint 128-lane blocks, so the
        # slices below are vreg-aligned (no cross-lane moves).
        qkv = jnp.dot(x, wqkv_ref[l],
                      preferred_element_type=jnp.float32) + bqkv_ref[l]
        q = qkv[:, 0 * HP:1 * HP].reshape(B, S, HP)
        k = qkv[:, 1 * HP:2 * HP].reshape(B, S, HP)
        v = qkv[:, 2 * HP:3 * HP].reshape(B, S, HP)

        # attention: batched over B via einsum (contract last dims, no .T);
        # per-head contexts are concatenated -> one output-proj matmul.
        ctx = []
        for h in range(N_HEADS):
            c0 = h * HEAD_D
            qh = q[:, :, c0:c0 + HEAD_D]                             # (B, S, D)
            kh = k[:, :, c0:c0 + HEAD_D]
            vh = v[:, :, c0:c0 + HEAD_D]
            s = jnp.einsum('bqd,bkd->bqk', qh, kh,
                           preferred_element_type=jnp.float32) * scale + bias
            s = s - jnp.max(s, axis=-1, keepdims=True)
            p = jnp.exp(s)
            p = p * pl.reciprocal(jnp.sum(p, axis=-1, keepdims=True),
                                  approx=True)
            ctx.append(jnp.einsum('bqk,bkd->bqd', p, vh,
                                  preferred_element_type=jnp.float32))
        ctx_flat = jnp.concatenate(ctx, axis=-1).reshape(B * S, BERT_H)

        attn = jnp.dot(ctx_flat, wo_ref[l],
                       preferred_element_type=jnp.float32) + bo_ref[l]
        x1 = _layer_norm_padded(attn + x, ln1g_ref[l], ln1b_ref[l], BERT_H)

        inter = _gelu_tanh(
            jnp.dot(x1, wi_ref[l], preferred_element_type=jnp.float32)
            + bi_ref[l])
        ffn = jnp.dot(inter, wo2_ref[l],
                      preferred_element_type=jnp.float32) + bo2_ref[l]
        x = _layer_norm_padded(ffn + x1, ln2g_ref[l], ln2b_ref[l], BERT_H)

    # ---- head: Linear -> LSTM (batched over B) -> Linear -> Sigmoid ----
    # TODO(synk): dropout is identity here (inference / eval mode).
    xr = jnp.dot(x, rw_ref[...],
                 preferred_element_type=jnp.float32) + rb_ref[...]   # (B*S, GP)
    # LSTM input projection hoisted out of the recurrence (all timesteps at once)
    xg = jnp.dot(xr, wih_ref[...],
                 preferred_element_type=jnp.float32) + lb_ref[...]   # (B*S, 4*GP)

    whh = whh_ref[...]
    h = jnp.zeros((B, GP), jnp.float32)
    c = jnp.zeros((B, GP), jnp.float32)
    for t in range(S):
        # gather the (B, 4*GP) slab for timestep t (static slices)
        x_t = jnp.concatenate(
            [xg[b * S + t:b * S + t + 1, :] for b in range(B)], axis=0)
        gates = x_t + jnp.dot(h, whh, preferred_element_type=jnp.float32)
        # gate slices are 128-lane aligned (each gate padded to GP lanes)
        i_g = jax.nn.sigmoid(gates[:, 0 * GP:1 * GP])
        f_g = jax.nn.sigmoid(gates[:, 1 * GP:2 * GP])
        g_g = jnp.tanh(gates[:, 2 * GP:3 * GP])
        o_g = jax.nn.sigmoid(gates[:, 3 * GP:4 * GP])
        c = f_g * c + i_g * g_g
        h = o_g * jnp.tanh(c)

    # fc + sigmoid on the final hidden state (torch.squeeze(h_n) -> (B, HID))
    fc = jnp.sum(h * fcw_ref[...], axis=-1, keepdims=True) + fcb_ref[...]
    o_ref[...] = jax.nn.sigmoid(fc)                                   # (B, 1)


# ------------------------------- wrapper -----------------------------------
def _vspec(shape):
    return pl.BlockSpec(shape, lambda i, _n=len(shape): (0,) * _n)


@jax.jit
def forward(params, input_ids, attention_mask):
    # --- BERT embeddings (gathers stay in XLA; tables are lane-padded) ---
    emb = (params["word_emb"][input_ids]
           + params["pos_emb"][None, :S, :]
           + params["type_emb"][0][None, None, :]).reshape(B * S, HP)
    mask_f = attention_mask.astype(jnp.float32)

    return pl.pallas_call(
        _fused_forward_kernel,
        out_shape=jax.ShapeDtypeStruct((B, 1), jnp.float32),
        grid=(1,),
        in_specs=[
            _vspec((B, S)),                       # attention mask
            _vspec((B * S, HP)),                  # embeddings
            _vspec((1, HP)), _vspec((1, HP)),     # emb LN gamma / beta
            _vspec((N_LAYERS, HP, 3 * HP)),       # wqkv (stacked)
            _vspec((N_LAYERS, 1, 3 * HP)),        # bqkv
            _vspec((N_LAYERS, BERT_H, HP)),       # wo
            _vspec((N_LAYERS, 1, HP)),            # bo
            _vspec((N_LAYERS, 1, HP)),            # ln1 gamma
            _vspec((N_LAYERS, 1, HP)),            # ln1 beta
            _vspec((N_LAYERS, HP, IP)),           # wi
            _vspec((N_LAYERS, 1, IP)),            # bi
            _vspec((N_LAYERS, IP, HP)),           # wo2
            _vspec((N_LAYERS, 1, HP)),            # bo2
            _vspec((N_LAYERS, 1, HP)),            # ln2 gamma
            _vspec((N_LAYERS, 1, HP)),            # ln2 beta
            _vspec((HP, GP)),                     # reshape Linear W
            _vspec((1, GP)),                      # reshape Linear b
            _vspec((GP, 4 * GP)),                 # lstm W_ih (gate-padded)
            _vspec((GP, 4 * GP)),                 # lstm W_hh (gate-padded)
            _vspec((1, 4 * GP)),                  # lstm bias
            _vspec((1, GP)),                      # fc W (row layout)
            _vspec((1, 1)),                       # fc b
        ],
        out_specs=_vspec((B, 1)),
        compiler_params=pltpu.CompilerParams(
            dimension_semantics=("arbitrary",)),
    )(mask_f, emb,
      params["emb_ln_g"], params["emb_ln_b"],
      params["wqkv"], params["bqkv"], params["wo"], params["bo"],
      params["ln1_g"], params["ln1_b"],
      params["wi"], params["bi"], params["wo2"], params["bo2"],
      params["ln2_g"], params["ln2_b"],
      params["reshape_w"], params["reshape_b"],
      params["lstm_wih"], params["lstm_whh"], params["lstm_b"],
      params["fc_w"], params["fc_b"])


# --------------------------- parameter creation ---------------------------
def _pad_to(w, shape):
    out = jnp.zeros(shape, jnp.float32)
    idx = tuple(slice(0, d) for d in w.shape)
    return out.at[idx].set(w)


def _pad_blocks(w, rows_p, block_p, n_blocks, real_block):
    """(rows, n_blocks*real_block) -> (rows_p, n_blocks*block_p); each real
    block is placed at the start of its own 128-lane-aligned block."""
    out = jnp.zeros((rows_p, n_blocks * block_p), jnp.float32)
    for g in range(n_blocks):
        blk = w[:, g * real_block:(g + 1) * real_block]
        out = out.at[:w.shape[0], g * block_p:g * block_p + real_block].set(blk)
    return out


def init_params(key):
    ks = iter(jax.random.split(key, 32))
    dense = lambda k, fi, fo: 0.02 * jax.random.normal(k, (fi, fo), jnp.float32)

    p = {}
    # BERT embeddings (lane-padded to HP)
    p["word_emb"] = _pad_to(dense(next(ks), VOCAB, BERT_H), (VOCAB, HP))
    p["pos_emb"] = _pad_to(dense(next(ks), S, BERT_H), (S, HP))
    p["type_emb"] = _pad_to(dense(next(ks), 2, BERT_H), (2, HP))
    p["emb_ln_g"] = _pad_to(jnp.ones((1, BERT_H), jnp.float32), (1, HP))
    p["emb_ln_b"] = jnp.zeros((1, HP), jnp.float32)

    # BERT encoder layers, stacked on a leading N_LAYERS axis
    wqkv, bqkv, wo, bo, l1g, l1b = [], [], [], [], [], []
    wi, bi, wo2, bo2, l2g, l2b = [], [], [], [], [], []
    for _ in range(N_LAYERS):
        wq = dense(next(ks), BERT_H, BERT_H)
        wk = dense(next(ks), BERT_H, BERT_H)
        wv = dense(next(ks), BERT_H, BERT_H)
        wqkv.append(_pad_blocks(jnp.concatenate([wq, wk, wv], axis=1),
                                HP, HP, 3, BERT_H))
        bqkv.append(jnp.zeros((1, 3 * HP), jnp.float32))
        wo.append(_pad_to(dense(next(ks), BERT_H, BERT_H), (BERT_H, HP)))
        bo.append(jnp.zeros((1, HP), jnp.float32))
        l1g.append(_pad_to(jnp.ones((1, BERT_H), jnp.float32), (1, HP)))
        l1b.append(jnp.zeros((1, HP), jnp.float32))
        wi.append(_pad_to(dense(next(ks), BERT_H, INTER), (HP, IP)))
        bi.append(jnp.zeros((1, IP), jnp.float32))
        wo2.append(_pad_to(dense(next(ks), INTER, BERT_H), (IP, HP)))
        bo2.append(jnp.zeros((1, HP), jnp.float32))
        l2g.append(_pad_to(jnp.ones((1, BERT_H), jnp.float32), (1, HP)))
        l2b.append(jnp.zeros((1, HP), jnp.float32))
    p["wqkv"] = jnp.stack(wqkv); p["bqkv"] = jnp.stack(bqkv)
    p["wo"] = jnp.stack(wo);     p["bo"] = jnp.stack(bo)
    p["ln1_g"] = jnp.stack(l1g); p["ln1_b"] = jnp.stack(l1b)
    p["wi"] = jnp.stack(wi);     p["bi"] = jnp.stack(bi)
    p["wo2"] = jnp.stack(wo2);   p["bo2"] = jnp.stack(bo2)
    p["ln2_g"] = jnp.stack(l2g); p["ln2_b"] = jnp.stack(l2b)

    # head: reshape Linear, LSTM (gate order i,f,g,o; per-gate lane-padded), fc
    p["reshape_w"] = _pad_to(dense(next(ks), BERT_H, HIDDEN_DIM), (HP, GP))
    p["reshape_b"] = jnp.zeros((1, GP), jnp.float32)
    p["lstm_wih"] = _pad_blocks(
        0.1 * jax.random.normal(next(ks), (HIDDEN_DIM, 4 * HIDDEN_DIM),
                                jnp.float32), GP, GP, 4, HIDDEN_DIM)
    p["lstm_whh"] = _pad_blocks(
        0.1 * jax.random.normal(next(ks), (HIDDEN_DIM, 4 * HIDDEN_DIM),
                                jnp.float32), GP, GP, 4, HIDDEN_DIM)
    p["lstm_b"] = jnp.zeros((1, 4 * GP), jnp.float32)
    p["fc_w"] = _pad_to(dense(next(ks), 1, HIDDEN_DIM), (1, GP))
    p["fc_b"] = jnp.zeros((1, 1), jnp.float32)
    return p


if __name__ == "__main__":
    key = jax.random.PRNGKey(0)
    pkey, ikey = jax.random.split(key)
    params = init_params(pkey)
    input_ids = jax.random.randint(ikey, (B, S), 0, VOCAB, dtype=jnp.int32)
    attention_mask = jnp.ones((B, S), jnp.float32).at[:, -2:].set(0.0)

    out = forward(params, input_ids, attention_mask)
    out = jax.block_until_ready(out)
    assert out.shape == (B, 1), out.shape
    assert bool(jnp.all(jnp.isfinite(out)))
    assert bool(jnp.all((out >= 0.0) & (out <= 1.0)))
    print("KERNEL_OK")
</pallas_src>

<mosaic_0001>
module attributes {stable_mosaic.version = 11 : i64} {
  func.func @_fused_forward_kernel(%arg0: i32, %arg1: memref<2x8xf32, #tpu.memory_space<vmem>>, %arg2: memref<16x128xf32, #tpu.memory_space<vmem>>, %arg3: memref<1x128xf32, #tpu.memory_space<vmem>>, %arg4: memref<1x128xf32, #tpu.memory_space<vmem>>, %arg5: memref<2x128x384xf32, #tpu.memory_space<vmem>>, %arg6: memref<2x1x384xf32, #tpu.memory_space<vmem>>, %arg7: memref<2x32x128xf32, #tpu.memory_space<vmem>>, %arg8: memref<2x1x128xf32, #tpu.memory_space<vmem>>, %arg9: memref<2x1x128xf32, #tpu.memory_space<vmem>>, %arg10: memref<2x1x128xf32, #tpu.memory_space<vmem>>, %arg11: memref<2x128x128xf32, #tpu.memory_space<vmem>>, %arg12: memref<2x1x128xf32, #tpu.memory_space<vmem>>, %arg13: memref<2x128x128xf32, #tpu.memory_space<vmem>>, %arg14: memref<2x1x128xf32, #tpu.memory_space<vmem>>, %arg15: memref<2x1x128xf32, #tpu.memory_space<vmem>>, %arg16: memref<2x1x128xf32, #tpu.memory_space<vmem>>, %arg17: memref<128x128xf32, #tpu.memory_space<vmem>>, %arg18: memref<1x128xf32, #tpu.memory_space<vmem>>, %arg19: memref<128x512xf32, #tpu.memory_space<vmem>>, %arg20: memref<128x512xf32, #tpu.memory_space<vmem>>, %arg21: memref<1x512xf32, #tpu.memory_space<vmem>>, %arg22: memref<1x128xf32, #tpu.memory_space<vmem>>, %arg23: memref<1x1xf32, #tpu.memory_space<vmem>>, %arg24: memref<2x1xf32, #tpu.memory_space<vmem>>) attributes {dimension_semantics = [#tpu.dimension_semantics<arbitrary>], iteration_bounds = array<i64: 1>, scalar_prefetch = 0 : i64, scratch_operands = 0 : i64, tpu.core_type = #tpu.core_type<tc>, window_params = [{pipeline_mode = #tpu.pipeline_mode<synchronous>, transform_indices = @transform_0, window_bounds = array<i64: 2, 8>}, {pipeline_mode = #tpu.pipeline_mode<synchronous>, transform_indices = @transform_1, window_bounds = array<i64: 16, 128>}, {pipeline_mode = #tpu.pipeline_mode<synchronous>, transform_indices = @transform_2, window_bounds = array<i64: 1, 128>}, {pipeline_mode = #tpu.pipeline_mode<synchronous>, transform_indices = @transform_3, window_bounds = array<i64: 1, 128>}, {pipeline_mode = #tpu.pipeline_mode<synchronous>, transform_indices = @transform_4, window_bounds = array<i64: 2, 128, 384>}, {pipeline_mode = #tpu.pipeline_mode<synchronous>, transform_indices = @transform_5, window_bounds = array<i64: 2, 1, 384>}, {pipeline_mode = #tpu.pipeline_mode<synchronous>, transform_indices = @transform_6, window_bounds = array<i64: 2, 32, 128>}, {pipeline_mode = #tpu.pipeline_mode<synchronous>, transform_indices = @transform_7, window_bounds = array<i64: 2, 1, 128>}, {pipeline_mode = #tpu.pipeline_mode<synchronous>, transform_indices = @transform_8, window_bounds = array<i64: 2, 1, 128>}, {pipeline_mode = #tpu.pipeline_mode<synchronous>, transform_indices = @transform_9, window_bounds = array<i64: 2, 1, 128>}, {pipeline_mode = #tpu.pipeline_mode<synchronous>, transform_indices = @transform_10, window_bounds = array<i64: 2, 128, 128>}, {pipeline_mode = #tpu.pipeline_mode<synchronous>, transform_indices = @transform_11, window_bounds = array<i64: 2, 1, 128>}, {pipeline_mode = #tpu.pipeline_mode<synchronous>, transform_indices = @transform_12, window_bounds = array<i64: 2, 128, 128>}, {pipeline_mode = #tpu.pipeline_mode<synchronous>, transform_indices = @transform_13, window_bounds = array<i64: 2, 1, 128>}, {pipeline_mode = #tpu.pipeline_mode<synchronous>, transform_indices = @transform_14, window_bounds = array<i64: 2, 1, 128>}, {pipeline_mode = #tpu.pipeline_mode<synchronous>, transform_indices = @transform_15, window_bounds = array<i64: 2, 1, 128>}, {pipeline_mode = #tpu.pipeline_mode<synchronous>, transform_indices = @transform_16, window_bounds = array<i64: 128, 128>}, {pipeline_mode = #tpu.pipeline_mode<synchronous>, transform_indices = @transform_17, window_bounds = array<i64: 1, 128>}, {pipeline_mode = #tpu.pipeline_mode<synchronous>, transform_indices = @transform_18, window_bounds = array<i64: 128, 512>}, {pipeline_mode = #tpu.pipeline_mode<synchronous>, transform_indices = @transform_19, window_bounds = array<i64: 128, 512>}, {pipeline_mode = #tpu.pipeline_mode<synchronous>, transform_indices = @transform_20, window_bounds = array<i64: 1, 512>}, {pipeline_mode = #tpu.pipeline_mode<synchronous>, transform_indices = @transform_21, window_bounds = array<i64: 1, 128>}, {pipeline_mode = #tpu.pipeline_mode<synchronous>, transform_indices = @transform_22, window_bounds = array<i64: 1, 1>}, {pipeline_mode = #tpu.pipeline_mode<synchronous>, transform_indices = @transform_23, window_bounds = array<i64: 2, 1>}]} {
    %c0 = arith.constant 0 : index
    %c0_0 = arith.constant 0 : index
    %0 = vector.load %arg1[%c0, %c0_0] : memref<2x8xf32, #tpu.memory_space<vmem>>, vector<2x8xf32>
    %cst = arith.constant 1.000000e+00 : f32
    %1 = vector.broadcast %cst : f32 to vector<2x8xf32>
    %2 = arith.subf %1, %0 : vector<2x8xf32>
    %cst_1 = arith.constant -1.000000e+09 : f32
    %3 = vector.broadcast %cst_1 : f32 to vector<2x8xf32>
    %4 = arith.mulf %2, %3 : vector<2x8xf32>
    %5 = vector.shape_cast %4 : vector<2x8xf32> to vector<2x1x8xf32>
    %c0_2 = arith.constant 0 : index
    %c0_3 = arith.constant 0 : index
    %6 = vector.load %arg2[%c0_2, %c0_3] : memref<16x128xf32, #tpu.memory_space<vmem>>, vector<16x128xf32>
    %c0_4 = arith.constant 0 : index
    %c0_5 = arith.constant 0 : index
    %7 = vector.load %arg3[%c0_4, %c0_5] : memref<1x128xf32, #tpu.memory_space<vmem>>, vector<1x128xf32>
    %c0_6 = arith.constant 0 : index
    %c0_7 = arith.constant 0 : index
    %8 = vector.load %arg4[%c0_6, %c0_7] : memref<1x128xf32, #tpu.memory_space<vmem>>, vector<1x128xf32>
    %cst_8 = arith.constant dense<0.000000e+00> : vector<16xf32>
    %9 = vector.multi_reduction <add>, %6, %cst_8 [1] : vector<16x128xf32> to vector<16xf32>
    %10 = vector.shape_cast %9 : vector<16xf32> to vector<16x1xf32>
    %cst_9 = arith.constant 3.125000e-02 : f32
    %11 = vector.broadcast %cst_9 : f32 to vector<16x1xf32>
    %12 = arith.mulf %10, %11 : vector<16x1xf32>
    %13 = arith.mulf %6, %6 : vector<16x128xf32>
    %cst_10 = arith.constant dense<0.000000e+00> : vector<16xf32>
    %14 = vector.multi_reduction <add>, %13, %cst_10 [1] : vector<16x128xf32> to vector<16xf32>
    %15 = vector.shape_cast %14 : vector<16xf32> to vector<16x1xf32>
    %cst_11 = arith.constant 3.125000e-02 : f32
    %16 = vector.broadcast %cst_11 : f32 to vector<16x1xf32>
    %17 = arith.mulf %15, %16 : vector<16x1xf32>
    %18 = arith.mulf %12, %12 : vector<16x1xf32>
    %19 = arith.subf %17, %18 : vector<16x1xf32>
    %20 = vector.broadcast %12 : vector<16x1xf32> to vector<16x128xf32>
    %21 = arith.subf %6, %20 : vector<16x128xf32>
    %cst_12 = arith.constant 9.99999996E-13 : f32
    %22 = vector.broadcast %cst_12 : f32 to vector<16x1xf32>
    %23 = arith.addf %19, %22 : vector<16x1xf32>
    %24 = math.rsqrt %23 : vector<16x1xf32>
    %25 = vector.broadcast %24 : vector<16x1xf32> to vector<16x128xf32>
    %26 = arith.mulf %21, %25 : vector<16x128xf32>
    %27 = vector.broadcast %7 : vector<1x128xf32> to vector<16x128xf32>
    %28 = arith.mulf %26, %27 : vector<16x128xf32>
    %29 = vector.broadcast %8 : vector<1x128xf32> to vector<16x128xf32>
    %30 = arith.addf %28, %29 : vector<16x128xf32>
    %c0_13 = arith.constant 0 : index
    %c0_14 = arith.constant 0 : index
    %c0_15 = arith.constant 0 : index
    %31 = vector.load %arg5[%c0_13, %c0_14, %c0_15] : memref<2x128x384xf32, #tpu.memory_space<vmem>>, vector<1x128x384xf32>
    %32 = vector.shape_cast %31 : vector<1x128x384xf32> to vector<128x384xf32>
    %cst_16 = arith.constant dense<0.000000e+00> : vector<16x384xf32>
    %33 = tpu.matmul %30, %32, %cst_16 {dimension_numbers = #tpu.dot_dimension_numbers<[1], [0], [0], [1], [0, 0, 1, 1], [], []>} : vector<16x128xf32>, vector<128x384xf32>, vector<16x384xf32> -> vector<16x384xf32>
    %c0_17 = arith.constant 0 : index
    %c0_18 = arith.constant 0 : index
    %c0_19 = arith.constant 0 : index
    %34 = vector.load %arg6[%c0_17, %c0_18, %c0_19] : memref<2x1x384xf32, #tpu.memory_space<vmem>>, vector<1x1x384xf32>
    %35 = vector.shape_cast %34 : vector<1x1x384xf32> to vector<1x384xf32>
    %36 = vector.broadcast %35 : vector<1x384xf32> to vector<16x384xf32>
    %37 = arith.addf %33, %36 : vector<16x384xf32>
    %38 = vector.extract_strided_slice %37 {offsets = [0, 0], sizes = [16, 128], strides = [1, 1]} : vector<16x384xf32> to vector<16x128xf32>
    %39 = vector.shape_cast %38 : vector<16x128xf32> to vector<2x8x128xf32>
    %40 = vector.extract_strided_slice %37 {offsets = [0, 128], sizes = [16, 128], strides = [1, 1]} : vector<16x384xf32> to vector<16x128xf32>
    %41 = vector.shape_cast %40 : vector<16x128xf32> to vector<2x8x128xf32>
    %42 = vector.extract_strided_slice %37 {offsets = [0, 256], sizes = [16, 128], strides = [1, 1]} : vector<16x384xf32> to vector<16x128xf32>
    %43 = vector.shape_cast %42 : vector<16x128xf32> to vector<2x8x128xf32>
    %44 = vector.extract_strided_slice %39 {offsets = [0, 0, 0], sizes = [2, 8, 8], strides = [1, 1, 1]} : vector<2x8x128xf32> to vector<2x8x8xf32>
    %45 = vector.extract_strided_slice %41 {offsets = [0, 0, 0], sizes = [2, 8, 8], strides = [1, 1, 1]} : vector<2x8x128xf32> to vector<2x8x8xf32>
    %46 = vector.extract_strided_slice %43 {offsets = [0, 0, 0], sizes = [2, 8, 8], strides = [1, 1, 1]} : vector<2x8x128xf32> to vector<2x8x8xf32>
    "tpu.trace_start"() <{level = 10 : i32, message = "bqd,bkd->bqk"}> : () -> ()
    %cst_20 = arith.constant dense<0.000000e+00> : vector<2x8x8xf32>
    %47 = tpu.matmul %44, %45, %cst_20 {dimension_numbers = #tpu.dot_dimension_numbers<[2], [2], [1], [1], [0, 0, 0, 1, 1, 1], [0], [0]>} : vector<2x8x8xf32>, vector<2x8x8xf32>, vector<2x8x8xf32> -> vector<2x8x8xf32>
    "tpu.trace_stop"() : () -> ()
    %cst_21 = arith.constant 0.353553385 : f32
    %48 = vector.broadcast %cst_21 : f32 to vector<2x8x8xf32>
    %49 = arith.mulf %47, %48 : vector<2x8x8xf32>
    %50 = vector.broadcast %5 : vector<2x1x8xf32> to vector<2x8x8xf32>
    %51 = arith.addf %49, %50 : vector<2x8x8xf32>
    %cst_22 = arith.constant dense<0xFF800000> : vector<2x8xf32>
    %52 = vector.multi_reduction <maximumf>, %51, %cst_22 [2] : vector<2x8x8xf32> to vector<2x8xf32>
    %53 = vector.shape_cast %52 : vector<2x8xf32> to vector<2x8x1xf32>
    %54 = vector.broadcast %53 : vector<2x8x1xf32> to vector<2x8x8xf32>
    %55 = arith.subf %51, %54 : vector<2x8x8xf32>
    %56 = math.exp %55 : vector<2x8x8xf32>
    %cst_23 = arith.constant dense<0.000000e+00> : vector<2x8xf32>
    %57 = vector.multi_reduction <add>, %56, %cst_23 [2] : vector<2x8x8xf32> to vector<2x8xf32>
    %58 = vector.shape_cast %57 : vector<2x8xf32> to vector<2x8x1xf32>
    %59 = tpu.reciprocal %58 {approx = true} : vector<2x8x1xf32> -> vector<2x8x1xf32>
    %60 = vector.broadcast %59 : vector<2x8x1xf32> to vector<2x8x8xf32>
    %61 = arith.mulf %56, %60 : vector<2x8x8xf32>
    "tpu.trace_start"() <{level = 10 : i32, message = "bqk,bkd->bqd"}> : () -> ()
    %cst_24 = arith.constant dense<0.000000e+00> : vector<2x8x8xf32>
    %62 = tpu.matmul %61, %46, %cst_24 {dimension_numbers = #tpu.dot_dimension_numbers<[2], [1], [1], [2], [0, 0, 0, 1, 1, 2], [0], [0]>} : vector<2x8x8xf32>, vector<2x8x8xf32>, vector<2x8x8xf32> -> vector<2x8x8xf32>
    "tpu.trace_stop"() : () -> ()
    %63 = vector.extract_strided_slice %39 {offsets = [0, 0, 8], sizes = [2, 8, 8], strides = [1, 1, 1]} : vector<2x8x128xf32> to vector<2x8x8xf32>
    %64 = vector.extract_strided_slice %41 {offsets = [0, 0, 8], sizes = [2, 8, 8], strides = [1, 1, 1]} : vector<2x8x128xf32> to vector<2x8x8xf32>
    %65 = vector.extract_strided_slice %43 {offsets = [0, 0, 8], sizes = [2, 8, 8], strides = [1, 1, 1]} : vector<2x8x128xf32> to vector<2x8x8xf32>
    "tpu.trace_start"() <{level = 10 : i32, message = "bqd,bkd->bqk"}> : () -> ()
    %cst_25 = arith.constant dense<0.000000e+00> : vector<2x8x8xf32>
    %66 = tpu.matmul %63, %64, %cst_25 {dimension_numbers = #tpu.dot_dimension_numbers<[2], [2], [1], [1], [0, 0, 0, 1, 1, 1], [0], [0]>} : vector<2x8x8xf32>, vector<2x8x8xf32>, vector<2x8x8xf32> -> vector<2x8x8xf32>
    "tpu.trace_stop"() : () -> ()
    %cst_26 = arith.constant 0.353553385 : f32
    %67 = vector.broadcast %cst_26 : f32 to vector<2x8x8xf32>
    %68 = arith.mulf %66, %67 : vector<2x8x8xf32>
    %69 = vector.broadcast %5 : vector<2x1x8xf32> to vector<2x8x8xf32>
    %70 = arith.addf %68, %69 : vector<2x8x8xf32>
    %cst_27 = arith.constant dense<0xFF800000> : vector<2x8xf32>
    %71 = vector.multi_reduction <maximumf>, %70, %cst_27 [2] : vector<2x8x8xf32> to vector<2x8xf32>
    %72 = vector.shape_cast %71 : vector<2x8xf32> to vector<2x8x1xf32>
    %73 = vector.broadcast %72 : vector<2x8x1xf32> to vector<2x8x8xf32>
    %74 = arith.subf %70, %73 : vector<2x8x8xf32>
    %75 = math.exp %74 : vector<2x8x8xf32>
    %cst_28 = arith.constant dense<0.000000e+00> : vector<2x8xf32>
    %76 = vector.multi_reduction <add>, %75, %cst_28 [2] : vector<2x8x8xf32> to vector<2x8xf32>
    %77 = vector.shape_cast %76 : vector<2x8xf32> to vector<2x8x1xf32>
    %78 = tpu.reciprocal %77 {approx = true} : vector<2x8x1xf32> -> vector<2x8x1xf32>
    %79 = vector.broadcast %78 : vector<2x8x1xf32> to vector<2x8x8xf32>
    %80 = arith.mulf %75, %79 : vector<2x8x8xf32>
    "tpu.trace_start"() <{level = 10 : i32, message = "bqk,bkd->bqd"}> : () -> ()
    %cst_29 = arith.constant dense<0.000000e+00> : vector<2x8x8xf32>
    %81 = tpu.matmul %80, %65, %cst_29 {dimension_numbers = #tpu.dot_dimension_numbers<[2], [1], [1], [2], [0, 0, 0, 1, 1, 2], [0], [0]>} : vector<2x8x8xf32>, vector<2x8x8xf32>, vector<2x8x8xf32> -> vector<2x8x8xf32>
    "tpu.trace_stop"() : () -> ()
    %82 = vector.extract_strided_slice %39 {offsets = [0, 0, 16], sizes = [2, 8, 8], strides = [1, 1, 1]} : vector<2x8x128xf32> to vector<2x8x8xf32>
    %83 = vector.extract_strided_slice %41 {offsets = [0, 0, 16], sizes = [2, 8, 8], strides = [1, 1, 1]} : vector<2x8x128xf32> to vector<2x8x8xf32>
    %84 = vector.extract_strided_slice %43 {offsets = [0, 0, 16], sizes = [2, 8, 8], strides = [1, 1, 1]} : vector<2x8x128xf32> to vector<2x8x8xf32>
    "tpu.trace_start"() <{level = 10 : i32, message = "bqd,bkd->bqk"}> : () -> ()
    %cst_30 = arith.constant dense<0.000000e+00> : vector<2x8x8xf32>
    %85 = tpu.matmul %82, %83, %cst_30 {dimension_numbers = #tpu.dot_dimension_numbers<[2], [2], [1], [1], [0, 0, 0, 1, 1, 1], [0], [0]>} : vector<2x8x8xf32>, vector<2x8x8xf32>, vector<2x8x8xf32> -> vector<2x8x8xf32>
    "tpu.trace_stop"() : () -> ()
    %cst_31 = arith.constant 0.353553385 : f32
    %86 = vector.broadcast %cst_31 : f32 to vector<2x8x8xf32>
    %87 = arith.mulf %85, %86 : vector<2x8x8xf32>
    %88 = vector.broadcast %5 : vector<2x1x8xf32> to vector<2x8x8xf32>
    %89 = arith.addf %87, %88 : vector<2x8x8xf32>
    %cst_32 = arith.constant dense<0xFF800000> : vector<2x8xf32>
    %90 = vector.multi_reduction <maximumf>, %89, %cst_32 [2] : vector<2x8x8xf32> to vector<2x8xf32>
    %91 = vector.shape_cast %90 : vector<2x8xf32> to vector<2x8x1xf32>
    %92 = vector.broadcast %91 : vector<2x8x1xf32> to vector<2x8x8xf32>
    %93 = arith.subf %89, %92 : vector<2x8x8xf32>
    %94 = math.exp %93 : vector<2x8x8xf32>
    %cst_33 = arith.constant dense<0.000000e+00> : vector<2x8xf32>
    %95 = vector.multi_reduction <add>, %94, %cst_33 [2] : vector<2x8x8xf32> to vector<2x8xf32>
    %96 = vector.shape_cast %95 : vector<2x8xf32> to vector<2x8x1xf32>
    %97 = tpu.reciprocal %96 {approx = true} : vector<2x8x1xf32> -> vector<2x8x1xf32>
    %98 = vector.broadcast %97 : vector<2x8x1xf32> to vector<2x8x8xf32>
    %99 = arith.mulf %94, %98 : vector<2x8x8xf32>
    "tpu.trace_start"() <{level = 10 : i32, message = "bqk,bkd->bqd"}> : () -> ()
    %cst_34 = arith.constant dense<0.000000e+00> : vector<2x8x8xf32>
    %100 = tpu.matmul %99, %84, %cst_34 {dimension_numbers = #tpu.dot_dimension_numbers<[2], [1], [1], [2], [0, 0, 0, 1, 1, 2], [0], [0]>} : vector<2x8x8xf32>, vector<2x8x8xf32>, vector<2x8x8xf32> -> vector<2x8x8xf32>
    "tpu.trace_stop"() : () -> ()
    %101 = vector.extract_strided_slice %39 {offsets = [0, 0, 24], sizes = [2, 8, 8], strides = [1, 1, 1]} : vector<2x8x128xf32> to vector<2x8x8xf32>
    %102 = vector.extract_strided_slice %41 {offsets = [0, 0, 24], sizes = [2, 8, 8], strides = [1, 1, 1]} : vector<2x8x128xf32> to vector<2x8x8xf32>
    %103 = vector.extract_strided_slice %43 {offsets = [0, 0, 24], sizes = [2, 8, 8], strides = [1, 1, 1]} : vector<2x8x128xf32> to vector<2x8x8xf32>
    "tpu.trace_start"() <{level = 10 : i32, message = "bqd,bkd->bqk"}> : () -> ()
    %cst_35 = arith.constant dense<0.000000e+00> : vector<2x8x8xf32>
    %104 = tpu.matmul %101, %102, %cst_35 {dimension_numbers = #tpu.dot_dimension_numbers<[2], [2], [1], [1], [0, 0, 0, 1, 1, 1], [0], [0]>} : vector<2x8x8xf32>, vector<2x8x8xf32>, vector<2x8x8xf32> -> vector<2x8x8xf32>
    "tpu.trace_stop"() : () -> ()
    %cst_36 = arith.constant 0.353553385 : f32
    %105 = vector.broadcast %cst_36 : f32 to vector<2x8x8xf32>
    %106 = arith.mulf %104, %105 : vector<2x8x8xf32>
    %107 = vector.broadcast %5 : vector<2x1x8xf32> to vector<2x8x8xf32>
    %108 = arith.addf %106, %107 : vector<2x8x8xf32>
    %cst_37 = arith.constant dense<0xFF800000> : vector<2x8xf32>
    %109 = vector.multi_reduction <maximumf>, %108, %cst_37 [2] : vector<2x8x8xf32> to vector<2x8xf32>
    %110 = vector.shape_cast %109 : vector<2x8xf32> to vector<2x8x1xf32>
    %111 = vector.broadcast %110 : vector<2x8x1xf32> to vector<2x8x8xf32>
    %112 = arith.subf %108, %111 : vector<2x8x8xf32>
    %113 = math.exp %112 : vector<2x8x8xf32>
    %cst_38 = arith.constant dense<0.000000e+00> : vector<2x8xf32>
    %114 = vector.multi_reduction <add>, %113, %cst_38 [2] : vector<2x8x8xf32> to vector<2x8xf32>
    %115 = vector.shape_cast %114 : vector<2x8xf32> to vector<2x8x1xf32>
    %116 = tpu.reciprocal %115 {approx = true} : vector<2x8x1xf32> -> vector<2x8x1xf32>
    %117 = vector.broadcast %116 : vector<2x8x1xf32> to vector<2x8x8xf32>
    %118 = arith.mulf %113, %117 : vector<2x8x8xf32>
    "tpu.trace_start"() <{level = 10 : i32, message = "bqk,bkd->bqd"}> : () -> ()
    %cst_39 = arith.constant dense<0.000000e+00> : vector<2x8x8xf32>
    %119 = tpu.matmul %118, %103, %cst_39 {dimension_numbers = #tpu.dot_dimension_numbers<[2], [1], [1], [2], [0, 0, 0, 1, 1, 2], [0], [0]>} : vector<2x8x8xf32>, vector<2x8x8xf32>, vector<2x8x8xf32> -> vector<2x8x8xf32>
    "tpu.trace_stop"() : () -> ()
    %120 = tpu.concatenate %62, %81, %100, %119 in 2 : vector<2x8x8xf32>, vector<2x8x8xf32>, vector<2x8x8xf32>, vector<2x8x8xf32> -> vector<2x8x32xf32>
    %121 = vector.shape_cast %120 : vector<2x8x32xf32> to vector<16x32xf32>
    %c0_40 = arith.constant 0 : index
    %c0_41 = arith.constant 0 : index
    %c0_42 = arith.constant 0 : index
    %122 = vector.load %arg7[%c0_40, %c0_41, %c0_42] : memref<2x32x128xf32, #tpu.memory_space<vmem>>, vector<1x32x128xf32>
    %123 = vector.shape_cast %122 : vector<1x32x128xf32> to vector<32x128xf32>
    %cst_43 = arith.constant dense<0.000000e+00> : vector<16x128xf32>
    %124 = tpu.matmul %121, %123, %cst_43 {dimension_numbers = #tpu.dot_dimension_numbers<[1], [0], [0], [1], [0, 0, 1, 1], [], []>} : vector<16x32xf32>, vector<32x128xf32>, vector<16x128xf32> -> vector<16x128xf32>
    %c0_44 = arith.constant 0 : index
    %c0_45 = arith.constant 0 : index
    %c0_46 = arith.constant 0 : index
    %125 = vector.load %arg8[%c0_44, %c0_45, %c0_46] : memref<2x1x128xf32, #tpu.memory_space<vmem>>, vector<1x1x128xf32>
    %126 = vector.shape_cast %125 : vector<1x1x128xf32> to vector<1x128xf32>
    %127 = vector.broadcast %126 : vector<1x128xf32> to vector<16x128xf32>
    %128 = arith.addf %124, %127 : vector<16x128xf32>
    %129 = arith.addf %128, %30 : vector<16x128xf32>
    %c0_47 = arith.constant 0 : index
    %c0_48 = arith.constant 0 : index
    %c0_49 = arith.constant 0 : index
    %130 = vector.load %arg9[%c0_47, %c0_48, %c0_49] : memref<2x1x128xf32, #tpu.memory_space<vmem>>, vector<1x1x128xf32>
    %131 = vector.shape_cast %130 : vector<1x1x128xf32> to vector<1x128xf32>
    %c0_50 = arith.constant 0 : index
    %c0_51 = arith.constant 0 : index
    %c0_52 = arith.constant 0 : index
    %132 = vector.load %arg10[%c0_50, %c0_51, %c0_52] : memref<2x1x128xf32, #tpu.memory_space<vmem>>, vector<1x1x128xf32>
    %133 = vector.shape_cast %132 : vector<1x1x128xf32> to vector<1x128xf32>
    %cst_53 = arith.constant dense<0.000000e+00> : vector<16xf32>
    %134 = vector.multi_reduction <add>, %129, %cst_53 [1] : vector<16x128xf32> to vector<16xf32>
    %135 = vector.shape_cast %134 : vector<16xf32> to vector<16x1xf32>
    %cst_54 = arith.constant 3.125000e-02 : f32
    %136 = vector.broadcast %cst_54 : f32 to vector<16x1xf32>
    %137 = arith.mulf %135, %136 : vector<16x1xf32>
    %138 = arith.mulf %129, %129 : vector<16x128xf32>
    %cst_55 = arith.constant dense<0.000000e+00> : vector<16xf32>
    %139 = vector.multi_reduction <add>, %138, %cst_55 [1] : vector<16x128xf32> to vector<16xf32>
    %140 = vector.shape_cast %139 : vector<16xf32> to vector<16x1xf32>
    %cst_56 = arith.constant 3.125000e-02 : f32
    %141 = vector.broadcast %cst_56 : f32 to vector<16x1xf32>
    %142 = arith.mulf %140, %141 : vector<16x1xf32>
    %143 = arith.mulf %137, %137 : vector<16x1xf32>
    %144 = arith.subf %142, %143 : vector<16x1xf32>
    %145 = vector.broadcast %137 : vector<16x1xf32> to vector<16x128xf32>
    %146 = arith.subf %129, %145 : vector<16x128xf32>
    %cst_57 = arith.constant 9.99999996E-13 : f32
    %147 = vector.broadcast %cst_57 : f32 to vector<16x1xf32>
    %148 = arith.addf %144, %147 : vector<16x1xf32>
    %149 = math.rsqrt %148 : vector<16x1xf32>
    %150 = vector.broadcast %149 : vector<16x1xf32> to vector<16x128xf32>
    %151 = arith.mulf %146, %150 : vector<16x128xf32>
    %152 = vector.broadcast %131 : vector<1x128xf32> to vector<16x128xf32>
    %153 = arith.mulf %151, %152 : vector<16x128xf32>
    %154 = vector.broadcast %133 : vector<1x128xf32> to vector<16x128xf32>
    %155 = arith.addf %153, %154 : vector<16x128xf32>
    %c0_58 = arith.constant 0 : index
    %c0_59 = arith.constant 0 : index
    %c0_60 = arith.constant 0 : index
    %156 = vector.load %arg11[%c0_58, %c0_59, %c0_60] : memref<2x128x128xf32, #tpu.memory_space<vmem>>, vector<1x128x128xf32>
    %157 = vector.shape_cast %156 : vector<1x128x128xf32> to vector<128x128xf32>
    %cst_61 = arith.constant dense<0.000000e+00> : vector<16x128xf32>
    %158 = tpu.matmul %155, %157, %cst_61 {dimension_numbers = #tpu.dot_dimension_numbers<[1], [0], [0], [1], [0, 0, 1, 1], [], []>} : vector<16x128xf32>, vector<128x128xf32>, vector<16x128xf32> -> vector<16x128xf32>
    %c0_62 = arith.constant 0 : index
    %c0_63 = arith.constant 0 : index
    %c0_64 = arith.constant 0 : index
    %159 = vector.load %arg12[%c0_62, %c0_63, %c0_64] : memref<2x1x128xf32, #tpu.memory_space<vmem>>, vector<1x1x128xf32>
    %160 = vector.shape_cast %159 : vector<1x1x128xf32> to vector<1x128xf32>
    %161 = vector.broadcast %160 : vector<1x128xf32> to vector<16x128xf32>
    %162 = arith.addf %158, %161 : vector<16x128xf32>
    %cst_65 = arith.constant 5.000000e-01 : f32
    %163 = vector.broadcast %cst_65 : f32 to vector<16x128xf32>
    %164 = arith.mulf %163, %162 : vector<16x128xf32>
    %cst_66 = arith.constant 4.471500e-02 : f32
    %165 = vector.broadcast %cst_66 : f32 to vector<16x128xf32>
    %166 = arith.mulf %165, %162 : vector<16x128xf32>
    %167 = arith.mulf %166, %162 : vector<16x128xf32>
    %168 = arith.mulf %167, %162 : vector<16x128xf32>
    %169 = arith.addf %162, %168 : vector<16x128xf32>
    %cst_67 = arith.constant 0.797884583 : f32
    %170 = vector.broadcast %cst_67 : f32 to vector<16x128xf32>
    %171 = arith.mulf %170, %169 : vector<16x128xf32>
    %172 = math.tanh %171 : vector<16x128xf32>
    %cst_68 = arith.constant 1.000000e+00 : f32
    %173 = vector.broadcast %cst_68 : f32 to vector<16x128xf32>
    %174 = arith.addf %173, %172 : vector<16x128xf32>
    %175 = arith.mulf %164, %174 : vector<16x128xf32>
    %c0_69 = arith.constant 0 : index
    %c0_70 = arith.constant 0 : index
    %c0_71 = arith.constant 0 : index
    %176 = vector.load %arg13[%c0_69, %c0_70, %c0_71] : memref<2x128x128xf32, #tpu.memory_space<vmem>>, vector<1x128x128xf32>
    %177 = vector.shape_cast %176 : vector<1x128x128xf32> to vector<128x128xf32>
    %cst_72 = arith.constant dense<0.000000e+00> : vector<16x128xf32>
    %178 = tpu.matmul %175, %177, %cst_72 {dimension_numbers = #tpu.dot_dimension_numbers<[1], [0], [0], [1], [0, 0, 1, 1], [], []>} : vector<16x128xf32>, vector<128x128xf32>, vector<16x128xf32> -> vector<16x128xf32>
    %c0_73 = arith.constant 0 : index
    %c0_74 = arith.constant 0 : index
    %c0_75 = arith.constant 0 : index
    %179 = vector.load %arg14[%c0_73, %c0_74, %c0_75] : memref<2x1x128xf32, #tpu.memory_space<vmem>>, vector<1x1x128xf32>
    %180 = vector.shape_cast %179 : vector<1x1x128xf32> to vector<1x128xf32>
    %181 = vector.broadcast %180 : vector<1x128xf32> to vector<16x128xf32>
    %182 = arith.addf %178, %181 : vector<16x128xf32>
    %183 = arith.addf %182, %155 : vector<16x128xf32>
    %c0_76 = arith.constant 0 : index
    %c0_77 = arith.constant 0 : index
    %c0_78 = arith.constant 0 : index
    %184 = vector.load %arg15[%c0_76, %c0_77, %c0_78] : memref<2x1x128xf32, #tpu.memory_space<vmem>>, vector<1x1x128xf32>
    %185 = vector.shape_cast %184 : vector<1x1x128xf32> to vector<1x128xf32>
    %c0_79 = arith.constant 0 : index
    %c0_80 = arith.constant 0 : index
    %c0_81 = arith.constant 0 : index
    %186 = vector.load %arg16[%c0_79, %c0_80, %c0_81] : memref<2x1x128xf32, #tpu.memory_space<vmem>>, vector<1x1x128xf32>
    %187 = vector.shape_cast %186 : vector<1x1x128xf32> to vector<1x128xf32>
    %cst_82 = arith.constant dense<0.000000e+00> : vector<16xf32>
    %188 = vector.multi_reduction <add>, %183, %cst_82 [1] : vector<16x128xf32> to vector<16xf32>
    %189 = vector.shape_cast %188 : vector<16xf32> to vector<16x1xf32>
    %cst_83 = arith.constant 3.125000e-02 : f32
    %190 = vector.broadcast %cst_83 : f32 to vector<16x1xf32>
    %191 = arith.mulf %189, %190 : vector<16x1xf32>
    %192 = arith.mulf %183, %183 : vector<16x128xf32>
    %cst_84 = arith.constant dense<0.000000e+00> : vector<16xf32>
    %193 = vector.multi_reduction <add>, %192, %cst_84 [1] : vector<16x128xf32> to vector<16xf32>
    %194 = vector.shape_cast %193 : vector<16xf32> to vector<16x1xf32>
    %cst_85 = arith.constant 3.125000e-02 : f32
    %195 = vector.broadcast %cst_85 : f32 to vector<16x1xf32>
    %196 = arith.mulf %194, %195 : vector<16x1xf32>
    %197 = arith.mulf %191, %191 : vector<16x1xf32>
    %198 = arith.subf %196, %197 : vector<16x1xf32>
    %199 = vector.broadcast %191 : vector<16x1xf32> to vector<16x128xf32>
    %200 = arith.subf %183, %199 : vector<16x128xf32>
    %cst_86 = arith.constant 9.99999996E-13 : f32
    %201 = vector.broadcast %cst_86 : f32 to vector<16x1xf32>
    %202 = arith.addf %198, %201 : vector<16x1xf32>
    %203 = math.rsqrt %202 : vector<16x1xf32>
    %204 = vector.broadcast %203 : vector<16x1xf32> to vector<16x128xf32>
    %205 = arith.mulf %200, %204 : vector<16x128xf32>
    %206 = vector.broadcast %185 : vector<1x128xf32> to vector<16x128xf32>
    %207 = arith.mulf %205, %206 : vector<16x128xf32>
    %208 = vector.broadcast %187 : vector<1x128xf32> to vector<16x128xf32>
    %209 = arith.addf %207, %208 : vector<16x128xf32>
    %c1 = arith.constant 1 : index
    %c0_87 = arith.constant 0 : index
    %c0_88 = arith.constant 0 : index
    %210 = vector.load %arg5[%c1, %c0_87, %c0_88] : memref<2x128x384xf32, #tpu.memory_space<vmem>>, vector<1x128x384xf32>
    %211 = vector.shape_cast %210 : vector<1x128x384xf32> to vector<128x384xf32>
    %cst_89 = arith.constant dense<0.000000e+00> : vector<16x384xf32>
    %212 = tpu.matmul %209, %211, %cst_89 {dimension_numbers = #tpu.dot_dimension_numbers<[1], [0], [0], [1], [0, 0, 1, 1], [], []>} : vector<16x128xf32>, vector<128x384xf32>, vector<16x384xf32> -> vector<16x384xf32>
    %c1_90 = arith.constant 1 : index
    %c0_91 = arith.constant 0 : index
    %c0_92 = arith.constant 0 : index
    %213 = vector.load %arg6[%c1_90, %c0_91, %c0_92] : memref<2x1x384xf32, #tpu.memory_space<vmem>>, vector<1x1x384xf32>
    %214 = vector.shape_cast %213 : vector<1x1x384xf32> to vector<1x384xf32>
    %215 = vector.broadcast %214 : vector<1x384xf32> to vector<16x384xf32>
    %216 = arith.addf %212, %215 : vector<16x384xf32>
    %217 = vector.extract_strided_slice %216 {offsets = [0, 0], sizes = [16, 128], strides = [1, 1]} : vector<16x384xf32> to vector<16x128xf32>
    %218 = vector.shape_cast %217 : vector<16x128xf32> to vector<2x8x128xf32>
    %219 = vector.extract_strided_slice %216 {offsets = [0, 128], sizes = [16, 128], strides = [1, 1]} : vector<16x384xf32> to vector<16x128xf32>
    %220 = vector.shape_cast %219 : vector<16x128xf32> to vector<2x8x128xf32>
    %221 = vector.extract_strided_slice %216 {offsets = [0, 256], sizes = [16, 128], strides = [1, 1]} : vector<16x384xf32> to vector<16x128xf32>
    %222 = vector.shape_cast %221 : vector<16x128xf32> to vector<2x8x128xf32>
    %223 = vector.extract_strided_slice %218 {offsets = [0, 0, 0], sizes = [2, 8, 8], strides = [1, 1, 1]} : vector<2x8x128xf32> to vector<2x8x8xf32>
    %224 = vector.extract_strided_slice %220 {offsets = [0, 0, 0], sizes = [2, 8, 8], strides = [1, 1, 1]} : vector<2x8x128xf32> to vector<2x8x8xf32>
    %225 = vector.extract_strided_slice %222 {offsets = [0, 0, 0], sizes = [2, 8, 8], strides = [1, 1, 1]} : vector<2x8x128xf32> to vector<2x8x8xf32>
    "tpu.trace_start"() <{level = 10 : i32, message = "bqd,bkd->bqk"}> : () -> ()
    %cst_93 = arith.constant dense<0.000000e+00> : vector<2x8x8xf32>
    %226 = tpu.matmul %223, %224, %cst_93 {dimension_numbers = #tpu.dot_dimension_numbers<[2], [2], [1], [1], [0, 0, 0, 1, 1, 1], [0], [0]>} : vector<2x8x8xf32>, vector<2x8x8xf32>, vector<2x8x8xf32> -> vector<2x8x8xf32>
    "tpu.trace_stop"() : () -> ()
    %cst_94 = arith.constant 0.353553385 : f32
    %227 = vector.broadcast %cst_94 : f32 to vector<2x8x8xf32>
    %228 = arith.mulf %226, %227 : vector<2x8x8xf32>
    %229 = vector.broadcast %5 : vector<2x1x8xf32> to vector<2x8x8xf32>
    %230 = arith.addf %228, %229 : vector<2x8x8xf32>
    %cst_95 = arith.constant dense<0xFF800000> : vector<2x8xf32>
    %231 = vector.multi_reduction <maximumf>, %230, %cst_95 [2] : vector<2x8x8xf32> to vector<2x8xf32>
    %232 = vector.shape_cast %231 : vector<2x8xf32> to vector<2x8x1xf32>
    %233 = vector.broadcast %232 : vector<2x8x1xf32> to vector<2x8x8xf32>
    %234 = arith.subf %230, %233 : vector<2x8x8xf32>
    %235 = math.exp %234 : vector<2x8x8xf32>
    %cst_96 = arith.constant dense<0.000000e+00> : vector<2x8xf32>
    %236 = vector.multi_reduction <add>, %235, %cst_96 [2] : vector<2x8x8xf32> to vector<2x8xf32>
    %237 = vector.shape_cast %236 : vector<2x8xf32> to vector<2x8x1xf32>
    %238 = tpu.reciprocal %237 {approx = true} : vector<2x8x1xf32> -> vector<2x8x1xf32>
    %239 = vector.broadcast %238 : vector<2x8x1xf32> to vector<2x8x8xf32>
    %240 = arith.mulf %235, %239 : vector<2x8x8xf32>
    "tpu.trace_start"() <{level = 10 : i32, message = "bqk,bkd->bqd"}> : () -> ()
    %cst_97 = arith.constant dense<0.000000e+00> : vector<2x8x8xf32>
    %241 = tpu.matmul %240, %225, %cst_97 {dimension_numbers = #tpu.dot_dimension_numbers<[2], [1], [1], [2], [0, 0, 0, 1, 1, 2], [0], [0]>} : vector<2x8x8xf32>, vector<2x8x8xf32>, vector<2x8x8xf32> -> vector<2x8x8xf32>
    "tpu.trace_stop"() : () -> ()
    %242 = vector.extract_strided_slice %218 {offsets = [0, 0, 8], sizes = [2, 8, 8], strides = [1, 1, 1]} : vector<2x8x128xf32> to vector<2x8x8xf32>
    %243 = vector.extract_strided_slice %220 {offsets = [0, 0, 8], sizes = [2, 8, 8], strides = [1, 1, 1]} : vector<2x8x128xf32> to vector<2x8x8xf32>
    %244 = vector.extract_strided_slice %222 {offsets = [0, 0, 8], sizes = [2, 8, 8], strides = [1, 1, 1]} : vector<2x8x128xf32> to vector<2x8x8xf32>
    "tpu.trace_start"() <{level = 10 : i32, message = "bqd,bkd->bqk"}> : () -> ()
    %cst_98 = arith.constant dense<0.000000e+00> : vector<2x8x8xf32>
    %245 = tpu.matmul %242, %243, %cst_98 {dimension_numbers = #tpu.dot_dimension_numbers<[2], [2], [1], [1], [0, 0, 0, 1, 1, 1], [0], [0]>} : vector<2x8x8xf32>, vector<2x8x8xf32>, vector<2x8x8xf32> -> vector<2x8x8xf32>
    "tpu.trace_stop"() : () -> ()
    %cst_99 = arith.constant 0.353553385 : f32
    %246 = vector.broadcast %cst_99 : f32 to vector<2x8x8xf32>
    %247 = arith.mulf %245, %246 : vector<2x8x8xf32>
    %248 = vector.broadcast %5 : vector<2x1x8xf32> to vector<2x8x8xf32>
    %249 = arith.addf %247, %248 : vector<2x8x8xf32>
    %cst_100 = arith.constant dense<0xFF800000> : vector<2x8xf32>
    %250 = vector.multi_reduction <maximumf>, %249, %cst_100 [2] : vector<2x8x8xf32> to vector<2x8xf32>
    %251 = vector.shape_cast %250 : vector<2x8xf32> to vector<2x8x1xf32>
    %252 = vector.broadcast %251 : vector<2x8x1xf32> to vector<2x8x8xf32>
    %253 = arith.subf %249, %252 : vector<2x8x8xf32>
    %254 = math.exp %253 : vector<2x8x8xf32>
    %cst_101 = arith.constant dense<0.000000e+00> : vector<2x8xf32>
    %255 = vector.multi_reduction <add>, %254, %cst_101 [2] : vector<2x8x8xf32> to vector<2x8xf32>
    %256 = vector.shape_cast %255 : vector<2x8xf32> to vector<2x8x1xf32>
    %257 = tpu.reciprocal %256 {approx = true} : vector<2x8x1xf32> -> vector<2x8x1xf32>
    %258 = vector.broadcast %257 : vector<2x8x1xf32> to vector<2x8x8xf32>
    %259 = arith.mulf %254, %258 : vector<2x8x8xf32>
    "tpu.trace_start"() <{level = 10 : i32, message = "bqk,bkd->bqd"}> : () -> ()
    %cst_102 = arith.constant dense<0.000000e+00> : vector<2x8x8xf32>
    %260 = tpu.matmul %259, %244, %cst_102 {dimension_numbers = #tpu.dot_dimension_numbers<[2], [1], [1], [2], [0, 0, 0, 1, 1, 2], [0], [0]>} : vector<2x8x8xf32>, vector<2x8x8xf32>, vector<2x8x8xf32> -> vector<2x8x8xf32>
    "tpu.trace_stop"() : () -> ()
    %261 = vector.extract_strided_slice %218 {offsets = [0, 0, 16], sizes = [2, 8, 8], strides = [1, 1, 1]} : vector<2x8x128xf32> to vector<2x8x8xf32>
    %262 = vector.extract_strided_slice %220 {offsets = [0, 0, 16], sizes = [2, 8, 8], strides = [1, 1, 1]} : vector<2x8x128xf32> to vector<2x8x8xf32>
    %263 = vector.extract_strided_slice %222 {offsets = [0, 0, 16], sizes = [2, 8, 8], strides = [1, 1, 1]} : vector<2x8x128xf32> to vector<2x8x8xf32>
    "tpu.trace_start"() <{level = 10 : i32, message = "bqd,bkd->bqk"}> : () -> ()
    %cst_103 = arith.constant dense<0.000000e+00> : vector<2x8x8xf32>
    %264 = tpu.matmul %261, %262, %cst_103 {dimension_numbers = #tpu.dot_dimension_numbers<[2], [2], [1], [1], [0, 0, 0, 1, 1, 1], [0], [0]>} : vector<2x8x8xf32>, vector<2x8x8xf32>, vector<2x8x8xf32> -> vector<2x8x8xf32>
    "tpu.trace_stop"() : () -> ()
    %cst_104 = arith.constant 0.353553385 : f32
    %265 = vector.broadcast %cst_104 : f32 to vector<2x8x8xf32>
    %266 = arith.mulf %264, %265 : vector<2x8x8xf32>
    %267 = vector.broadcast %5 : vector<2x1x8xf32> to vector<2x8x8xf32>
    %268 = arith.addf %266, %267 : vector<2x8x8xf32>
    %cst_105 = arith.constant dense<0xFF800000> : vector<2x8xf32>
    %269 = vector.multi_reduction <maximumf>, %268, %cst_105 [2] : vector<2x8x8xf32> to vector<2x8xf32>
    %270 = vector.shape_cast %269 : vector<2x8xf32> to vector<2x8x1xf32>
    %271 = vector.broadcast %270 : vector<2x8x1xf32> to vector<2x8x8xf32>
    %272 = arith.subf %268, %271 : vector<2x8x8xf32>
    %273 = math.exp %272 : vector<2x8x8xf32>
    %cst_106 = arith.constant dense<0.000000e+00> : vector<2x8xf32>
    %274 = vector.multi_reduction <add>, %273, %cst_106 [2] : vector<2x8x8xf32> to vector<2x8xf32>
    %275 = vector.shape_cast %274 : vector<2x8xf32> to vector<2x8x1xf32>
    %276 = tpu.reciprocal %275 {approx = true} : vector<2x8x1xf32> -> vector<2x8x1xf32>
    %277 = vector.broadcast %276 : vector<2x8x1xf32> to vector<2x8x8xf32>
    %278 = arith.mulf %273, %277 : vector<2x8x8xf32>
    "tpu.trace_start"() <{level = 10 : i32, message = "bqk,bkd->bqd"}> : () -> ()
    %cst_107 = arith.constant dense<0.000000e+00> : vector<2x8x8xf32>
    %279 = tpu.matmul %278, %263, %cst_107 {dimension_numbers = #tpu.dot_dimension_numbers<[2], [1], [1], [2], [0, 0, 0, 1, 1, 2], [0], [0]>} : vector<2x8x8xf32>, vector<2x8x8xf32>, vector<2x8x8xf32> -> vector<2x8x8xf32>
    "tpu.trace_stop"() : () -> ()
    %280 = vector.extract_strided_slice %218 {offsets = [0, 0, 24], sizes = [2, 8, 8], strides = [1, 1, 1]} : vector<2x8x128xf32> to vector<2x8x8xf32>
    %281 = vector.extract_strided_slice %220 {offsets = [0, 0, 24], sizes = [2, 8, 8], strides = [1, 1, 1]} : vector<2x8x128xf32> to vector<2x8x8xf32>
    %282 = vector.extract_strided_slice %222 {offsets = [0, 0, 24], sizes = [2, 8, 8], strides = [1, 1, 1]} : vector<2x8x128xf32> to vector<2x8x8xf32>
    "tpu.trace_start"() <{level = 10 : i32, message = "bqd,bkd->bqk"}> : () -> ()
    %cst_108 = arith.constant dense<0.000000e+00> : vector<2x8x8xf32>
    %283 = tpu.matmul %280, %281, %cst_108 {dimension_numbers = #tpu.dot_dimension_numbers<[2], [2], [1], [1], [0, 0, 0, 1, 1, 1], [0], [0]>} : vector<2x8x8xf32>, vector<2x8x8xf32>, vector<2x8x8xf32> -> vector<2x8x8xf32>
    "tpu.trace_stop"() : () -> ()
    %cst_109 = arith.constant 0.353553385 : f32
    %284 = vector.broadcast %cst_109 : f32 to vector<2x8x8xf32>
    %285 = arith.mulf %283, %284 : vector<2x8x8xf32>
    %286 = vector.broadcast %5 : vector<2x1x8xf32> to vector<2x8x8xf32>
    %287 = arith.addf %285, %286 : vector<2x8x8xf32>
    %cst_110 = arith.constant dense<0xFF800000> : vector<2x8xf32>
    %288 = vector.multi_reduction <maximumf>, %287, %cst_110 [2] : vector<2x8x8xf32> to vector<2x8xf32>
    %289 = vector.shape_cast %288 : vector<2x8xf32> to vector<2x8x1xf32>
    %290 = vector.broadcast %289 : vector<2x8x1xf32> to vector<2x8x8xf32>
    %291 = arith.subf %287, %290 : vector<2x8x8xf32>
    %292 = math.exp %291 : vector<2x8x8xf32>
    %cst_111 = arith.constant dense<0.000000e+00> : vector<2x8xf32>
    %293 = vector.multi_reduction <add>, %292, %cst_111 [2] : vector<2x8x8xf32> to vector<2x8xf32>
    %294 = vector.shape_cast %293 : vector<2x8xf32> to vector<2x8x1xf32>
    %295 = tpu.reciprocal %294 {approx = true} : vector<2x8x1xf32> -> vector<2x8x1xf32>
    %296 = vector.broadcast %295 : vector<2x8x1xf32> to vector<2x8x8xf32>
    %297 = arith.mulf %292, %296 : vector<2x8x8xf32>
    "tpu.trace_start"() <{level = 10 : i32, message = "bqk,bkd->bqd"}> : () -> ()
    %cst_112 = arith.constant dense<0.000000e+00> : vector<2x8x8xf32>
    %298 = tpu.matmul %297, %282, %cst_112 {dimension_numbers = #tpu.dot_dimension_numbers<[2], [1], [1], [2], [0, 0, 0, 1, 1, 2], [0], [0]>} : vector<2x8x8xf32>, vector<2x8x8xf32>, vector<2x8x8xf32> -> vector<2x8x8xf32>
    "tpu.trace_stop"() : () -> ()
    %299 = tpu.concatenate %241, %260, %279, %298 in 2 : vector<2x8x8xf32>, vector<2x8x8xf32>, vector<2x8x8xf32>, vector<2x8x8xf32> -> vector<2x8x32xf32>
    %300 = vector.shape_cast %299 : vector<2x8x32xf32> to vector<16x32xf32>
    %c1_113 = arith.constant 1 : index
    %c0_114 = arith.constant 0 : index
    %c0_115 = arith.constant 0 : index
    %301 = vector.load %arg7[%c1_113, %c0_114, %c0_115] : memref<2x32x128xf32, #tpu.memory_space<vmem>>, vector<1x32x128xf32>
    %302 = vector.shape_cast %301 : vector<1x32x128xf32> to vector<32x128xf32>
    %cst_116 = arith.constant dense<0.000000e+00> : vector<16x128xf32>
    %303 = tpu.matmul %300, %302, %cst_116 {dimension_numbers = #tpu.dot_dimension_numbers<[1], [0], [0], [1], [0, 0, 1, 1], [], []>} : vector<16x32xf32>, vector<32x128xf32>, vector<16x128xf32> -> vector<16x128xf32>
    %c1_117 = arith.constant 1 : index
    %c0_118 = arith.constant 0 : index
    %c0_119 = arith.constant 0 : index
    %304 = vector.load %arg8[%c1_117, %c0_118, %c0_119] : memref<2x1x128xf32, #tpu.memory_space<vmem>>, vector<1x1x128xf32>
    %305 = vector.shape_cast %304 : vector<1x1x128xf32> to vector<1x128xf32>
    %306 = vector.broadcast %305 : vector<1x128xf32> to vector<16x128xf32>
    %307 = arith.addf %303, %306 : vector<16x128xf32>
    %308 = arith.addf %307, %209 : vector<16x128xf32>
    %c1_120 = arith.constant 1 : index
    %c0_121 = arith.constant 0 : index
    %c0_122 = arith.constant 0 : index
    %309 = vector.load %arg9[%c1_120, %c0_121, %c0_122] : memref<2x1x128xf32, #tpu.memory_space<vmem>>, vector<1x1x128xf32>
    %310 = vector.shape_cast %309 : vector<1x1x128xf32> to vector<1x128xf32>
    %c1_123 = arith.constant 1 : index
    %c0_124 = arith.constant 0 : index
    %c0_125 = arith.constant 0 : index
    %311 = vector.load %arg10[%c1_123, %c0_124, %c0_125] : memref<2x1x128xf32, #tpu.memory_space<vmem>>, vector<1x1x128xf32>
    %312 = vector.shape_cast %311 : vector<1x1x128xf32> to vector<1x128xf32>
    %cst_126 = arith.constant dense<0.000000e+00> : vector<16xf32>
    %313 = vector.multi_reduction <add>, %308, %cst_126 [1] : vector<16x128xf32> to vector<16xf32>
    %314 = vector.shape_cast %313 : vector<16xf32> to vector<16x1xf32>
    %cst_127 = arith.constant 3.125000e-02 : f32
    %315 = vector.broadcast %cst_127 : f32 to vector<16x1xf32>
    %316 = arith.mulf %314, %315 : vector<16x1xf32>
    %317 = arith.mulf %308, %308 : vector<16x128xf32>
    %cst_128 = arith.constant dense<0.000000e+00> : vector<16xf32>
    %318 = vector.multi_reduction <add>, %317, %cst_128 [1] : vector<16x128xf32> to vector<16xf32>
    %319 = vector.shape_cast %318 : vector<16xf32> to vector<16x1xf32>
    %cst_129 = arith.constant 3.125000e-02 : f32
    %320 = vector.broadcast %cst_129 : f32 to vector<16x1xf32>
    %321 = arith.mulf %319, %320 : vector<16x1xf32>
    %322 = arith.mulf %316, %316 : vector<16x1xf32>
    %323 = arith.subf %321, %322 : vector<16x1xf32>
    %324 = vector.broadcast %316 : vector<16x1xf32> to vector<16x128xf32>
    %325 = arith.subf %308, %324 : vector<16x128xf32>
    %cst_130 = arith.constant 9.99999996E-13 : f32
    %326 = vector.broadcast %cst_130 : f32 to vector<16x1xf32>
    %327 = arith.addf %323, %326 : vector<16x1xf32>
    %328 = math.rsqrt %327 : vector<16x1xf32>
    %329 = vector.broadcast %328 : vector<16x1xf32> to vector<16x128xf32>
    %330 = arith.mulf %325, %329 : vector<16x128xf32>
    %331 = vector.broadcast %310 : vector<1x128xf32> to vector<16x128xf32>
    %332 = arith.mulf %330, %331 : vector<16x128xf32>
    %333 = vector.broadcast %312 : vector<1x128xf32> to vector<16x128xf32>
    %334 = arith.addf %332, %333 : vector<16x128xf32>
    %c1_131 = arith.constant 1 : index
    %c0_132 = arith.constant 0 : index
    %c0_133 = arith.constant 0 : index
    %335 = vector.load %arg11[%c1_131, %c0_132, %c0_133] : memref<2x128x128xf32, #tpu.memory_space<vmem>>, vector<1x128x128xf32>
    %336 = vector.shape_cast %335 : vector<1x128x128xf32> to vector<128x128xf32>
    %cst_134 = arith.constant dense<0.000000e+00> : vector<16x128xf32>
    %337 = tpu.matmul %334, %336, %cst_134 {dimension_numbers = #tpu.dot_dimension_numbers<[1], [0], [0], [1], [0, 0, 1, 1], [], []>} : vector<16x128xf32>, vector<128x128xf32>, vector<16x128xf32> -> vector<16x128xf32>
    %c1_135 = arith.constant 1 : index
    %c0_136 = arith.constant 0 : index
    %c0_137 = arith.constant 0 : index
    %338 = vector.load %arg12[%c1_135, %c0_136, %c0_137] : memref<2x1x128xf32, #tpu.memory_space<vmem>>, vector<1x1x128xf32>
    %339 = vector.shape_cast %338 : vector<1x1x128xf32> to vector<1x128xf32>
    %340 = vector.broadcast %339 : vector<1x128xf32> to vector<16x128xf32>
    %341 = arith.addf %337, %340 : vector<16x128xf32>
    %cst_138 = arith.constant 5.000000e-01 : f32
    %342 = vector.broadcast %cst_138 : f32 to vector<16x128xf32>
    %343 = arith.mulf %342, %341 : vector<16x128xf32>
    %cst_139 = arith.constant 4.471500e-02 : f32
    %344 = vector.broadcast %cst_139 : f32 to vector<16x128xf32>
    %345 = arith.mulf %344, %341 : vector<16x128xf32>
    %346 = arith.mulf %345, %341 : vector<16x128xf32>
    %347 = arith.mulf %346, %341 : vector<16x128xf32>
    %348 = arith.addf %341, %347 : vector<16x128xf32>
    %cst_140 = arith.constant 0.797884583 : f32
    %349 = vector.broadcast %cst_140 : f32 to vector<16x128xf32>
    %350 = arith.mulf %349, %348 : vector<16x128xf32>
    %351 = math.tanh %350 : vector<16x128xf32>
    %cst_141 = arith.constant 1.000000e+00 : f32
    %352 = vector.broadcast %cst_141 : f32 to vector<16x128xf32>
    %353 = arith.addf %352, %351 : vector<16x128xf32>
    %354 = arith.mulf %343, %353 : vector<16x128xf32>
    %c1_142 = arith.constant 1 : index
    %c0_143 = arith.constant 0 : index
    %c0_144 = arith.constant 0 : index
    %355 = vector.load %arg13[%c1_142, %c0_143, %c0_144] : memref<2x128x128xf32, #tpu.memory_space<vmem>>, vector<1x128x128xf32>
    %356 = vector.shape_cast %355 : vector<1x128x128xf32> to vector<128x128xf32>
    %cst_145 = arith.constant dense<0.000000e+00> : vector<16x128xf32>
    %357 = tpu.matmul %354, %356, %cst_145 {dimension_numbers = #tpu.dot_dimension_numbers<[1], [0], [0], [1], [0, 0, 1, 1], [], []>} : vector<16x128xf32>, vector<128x128xf32>, vector<16x128xf32> -> vector<16x128xf32>
    %c1_146 = arith.constant 1 : index
    %c0_147 = arith.constant 0 : index
    %c0_148 = arith.constant 0 : index
    %358 = vector.load %arg14[%c1_146, %c0_147, %c0_148] : memref<2x1x128xf32, #tpu.memory_space<vmem>>, vector<1x1x128xf32>
    %359 = vector.shape_cast %358 : vector<1x1x128xf32> to vector<1x128xf32>
    %360 = vector.broadcast %359 : vector<1x128xf32> to vector<16x128xf32>
    %361 = arith.addf %357, %360 : vector<16x128xf32>
    %362 = arith.addf %361, %334 : vector<16x128xf32>
    %c1_149 = arith.constant 1 : index
    %c0_150 = arith.constant 0 : index
    %c0_151 = arith.constant 0 : index
    %363 = vector.load %arg15[%c1_149, %c0_150, %c0_151] : memref<2x1x128xf32, #tpu.memory_space<vmem>>, vector<1x1x128xf32>
    %364 = vector.shape_cast %363 : vector<1x1x128xf32> to vector<1x128xf32>
    %c1_152 = arith.constant 1 : index
    %c0_153 = arith.constant 0 : index
    %c0_154 = arith.constant 0 : index
    %365 = vector.load %arg16[%c1_152, %c0_153, %c0_154] : memref<2x1x128xf32, #tpu.memory_space<vmem>>, vector<1x1x128xf32>
    %366 = vector.shape_cast %365 : vector<1x1x128xf32> to vector<1x128xf32>
    %cst_155 = arith.constant dense<0.000000e+00> : vector<16xf32>
    %367 = vector.multi_reduction <add>, %362, %cst_155 [1] : vector<16x128xf32> to vector<16xf32>
    %368 = vector.shape_cast %367 : vector<16xf32> to vector<16x1xf32>
    %cst_156 = arith.constant 3.125000e-02 : f32
    %369 = vector.broadcast %cst_156 : f32 to vector<16x1xf32>
    %370 = arith.mulf %368, %369 : vector<16x1xf32>
    %371 = arith.mulf %362, %362 : vector<16x128xf32>
    %cst_157 = arith.constant dense<0.000000e+00> : vector<16xf32>
    %372 = vector.multi_reduction <add>, %371, %cst_157 [1] : vector<16x128xf32> to vector<16xf32>
    %373 = vector.shape_cast %372 : vector<16xf32> to vector<16x1xf32>
    %cst_158 = arith.constant 3.125000e-02 : f32
    %374 = vector.broadcast %cst_158 : f32 to vector<16x1xf32>
    %375 = arith.mulf %373, %374 : vector<16x1xf32>
    %376 = arith.mulf %370, %370 : vector<16x1xf32>
    %377 = arith.subf %375, %376 : vector<16x1xf32>
    %378 = vector.broadcast %370 : vector<16x1xf32> to vector<16x128xf32>
    %379 = arith.subf %362, %378 : vector<16x128xf32>
    %cst_159 = arith.constant 9.99999996E-13 : f32
    %380 = vector.broadcast %cst_159 : f32 to vector<16x1xf32>
    %381 = arith.addf %377, %380 : vector<16x1xf32>
    %382 = math.rsqrt %381 : vector<16x1xf32>
    %383 = vector.broadcast %382 : vector<16x1xf32> to vector<16x128xf32>
    %384 = arith.mulf %379, %383 : vector<16x128xf32>
    %385 = vector.broadcast %364 : vector<1x128xf32> to vector<16x128xf32>
    %386 = arith.mulf %384, %385 : vector<16x128xf32>
    %387 = vector.broadcast %366 : vector<1x128xf32> to vector<16x128xf32>
    %388 = arith.addf %386, %387 : vector<16x128xf32>
    %c0_160 = arith.constant 0 : index
    %c0_161 = arith.constant 0 : index
    %389 = vector.load %arg17[%c0_160, %c0_161] : memref<128x128xf32, #tpu.memory_space<vmem>>, vector<128x128xf32>
    %cst_162 = arith.constant dense<0.000000e+00> : vector<16x128xf32>
    %390 = tpu.matmul %388, %389, %cst_162 {dimension_numbers = #tpu.dot_dimension_numbers<[1], [0], [0], [1], [0, 0, 1, 1], [], []>} : vector<16x128xf32>, vector<128x128xf32>, vector<16x128xf32> -> vector<16x128xf32>
    %c0_163 = arith.constant 0 : index
    %c0_164 = arith.constant 0 : index
    %391 = vector.load %arg18[%c0_163, %c0_164] : memref<1x128xf32, #tpu.memory_space<vmem>>, vector<1x128xf32>
    %392 = vector.broadcast %391 : vector<1x128xf32> to vector<16x128xf32>
    %393 = arith.addf %390, %392 : vector<16x128xf32>
    %c0_165 = arith.constant 0 : index
    %c0_166 = arith.constant 0 : index
    %394 = vector.load %arg19[%c0_165, %c0_166] : memref<128x512xf32, #tpu.memory_space<vmem>>, vector<128x512xf32>
    %cst_167 = arith.constant dense<0.000000e+00> : vector<16x512xf32>
    %395 = tpu.matmul %393, %394, %cst_167 {dimension_numbers = #tpu.dot_dimension_numbers<[1], [0], [0], [1], [0, 0, 1, 1], [], []>} : vector<16x128xf32>, vector<128x512xf32>, vector<16x512xf32> -> vector<16x512xf32>
    %c0_168 = arith.constant 0 : index
    %c0_169 = arith.constant 0 : index
    %396 = vector.load %arg21[%c0_168, %c0_169] : memref<1x512xf32, #tpu.memory_space<vmem>>, vector<1x512xf32>
    %397 = vector.broadcast %396 : vector<1x512xf32> to vector<16x512xf32>
    %398 = arith.addf %395, %397 : vector<16x512xf32>
    %c0_170 = arith.constant 0 : index
    %c0_171 = arith.constant 0 : index
    %399 = vector.load %arg20[%c0_170, %c0_171] : memref<128x512xf32, #tpu.memory_space<vmem>>, vector<128x512xf32>
    %cst_172 = arith.constant 0.000000e+00 : f32
    %400 = vector.broadcast %cst_172 : f32 to vector<2x128xf32>
    %cst_173 = arith.constant 0.000000e+00 : f32
    %401 = vector.broadcast %cst_173 : f32 to vector<2x128xf32>
    %402 = vector.extract_strided_slice %398 {offsets = [0, 0], sizes = [1, 512], strides = [1, 1]} : vector<16x512xf32> to vector<1x512xf32>
    %403 = vector.extract_strided_slice %398 {offsets = [8, 0], sizes = [1, 512], strides = [1, 1]} : vector<16x512xf32> to vector<1x512xf32>
    %404 = tpu.concatenate %402, %403 in 0 : vector<1x512xf32>, vector<1x512xf32> -> vector<2x512xf32>
    %cst_174 = arith.constant dense<0.000000e+00> : vector<2x512xf32>
    %405 = tpu.matmul %400, %399, %cst_174 {dimension_numbers = #tpu.dot_dimension_numbers<[1], [0], [0], [1], [0, 0, 1, 1], [], []>} : vector<2x128xf32>, vector<128x512xf32>, vector<2x512xf32> -> vector<2x512xf32>
    %406 = arith.addf %404, %405 : vector<2x512xf32>
    %407 = vector.extract_strided_slice %406 {offsets = [0, 0], sizes = [2, 128], strides = [1, 1]} : vector<2x512xf32> to vector<2x128xf32>
    %408 = arith.negf %407 : vector<2x128xf32>
    %409 = math.exp %408 : vector<2x128xf32>
    %cst_175 = arith.constant 1.000000e+00 : f32
    %410 = vector.broadcast %cst_175 : f32 to vector<2x128xf32>
    %411 = arith.addf %410, %409 : vector<2x128xf32>
    %412 = arith.divf %410, %411 : vector<2x128xf32>
    %413 = vector.extract_strided_slice %406 {offsets = [0, 128], sizes = [2, 128], strides = [1, 1]} : vector<2x512xf32> to vector<2x128xf32>
    %414 = arith.negf %413 : vector<2x128xf32>
    %415 = math.exp %414 : vector<2x128xf32>
    %cst_176 = arith.constant 1.000000e+00 : f32
    %416 = vector.broadcast %cst_176 : f32 to vector<2x128xf32>
    %417 = arith.addf %416, %415 : vector<2x128xf32>
    %418 = arith.divf %416, %417 : vector<2x128xf32>
    %419 = vector.extract_strided_slice %406 {offsets = [0, 256], sizes = [2, 128], strides = [1, 1]} : vector<2x512xf32> to vector<2x128xf32>
    %420 = math.tanh %419 : vector<2x128xf32>
    %421 = vector.extract_strided_slice %406 {offsets = [0, 384], sizes = [2, 128], strides = [1, 1]} : vector<2x512xf32> to vector<2x128xf32>
    %422 = arith.negf %421 : vector<2x128xf32>
    %423 = math.exp %422 : vector<2x128xf32>
    %cst_177 = arith.constant 1.000000e+00 : f32
    %424 = vector.broadcast %cst_177 : f32 to vector<2x128xf32>
    %425 = arith.addf %424, %423 : vector<2x128xf32>
    %426 = arith.divf %424, %425 : vector<2x128xf32>
    %427 = arith.mulf %418, %401 : vector<2x128xf32>
    %428 = arith.mulf %412, %420 : vector<2x128xf32>
    %429 = arith.addf %427, %428 : vector<2x128xf32>
    %430 = math.tanh %429 : vector<2x128xf32>
    %431 = arith.mulf %426, %430 : vector<2x128xf32>
    %432 = vector.extract_strided_slice %398 {offsets = [1, 0], sizes = [1, 512], strides = [1, 1]} : vector<16x512xf32> to vector<1x512xf32>
    %433 = vector.extract_strided_slice %398 {offsets = [9, 0], sizes = [1, 512], strides = [1, 1]} : vector<16x512xf32> to vector<1x512xf32>
    %434 = tpu.concatenate %432, %433 in 0 : vector<1x512xf32>, vector<1x512xf32> -> vector<2x512xf32>
    %cst_178 = arith.constant dense<0.000000e+00> : vector<2x512xf32>
    %435 = tpu.matmul %431, %399, %cst_178 {dimension_numbers = #tpu.dot_dimension_numbers<[1], [0], [0], [1], [0, 0, 1, 1], [], []>} : vector<2x128xf32>, vector<128x512xf32>, vector<2x512xf32> -> vector<2x512xf32>
    %436 = arith.addf %434, %435 : vector<2x512xf32>
    %437 = vector.extract_strided_slice %436 {offsets = [0, 0], sizes = [2, 128], strides = [1, 1]} : vector<2x512xf32> to vector<2x128xf32>
    %438 = arith.negf %437 : vector<2x128xf32>
    %439 = math.exp %438 : vector<2x128xf32>
    %cst_179 = arith.constant 1.000000e+00 : f32
    %440 = vector.broadcast %cst_179 : f32 to vector<2x128xf32>
    %441 = arith.addf %440, %439 : vector<2x128xf32>
    %442 = arith.divf %440, %441 : vector<2x128xf32>
    %443 = vector.extract_strided_slice %436 {offsets = [0, 128], sizes = [2, 128], strides = [1, 1]} : vector<2x512xf32> to vector<2x128xf32>
    %444 = arith.negf %443 : vector<2x128xf32>
    %445 = math.exp %444 : vector<2x128xf32>
    %cst_180 = arith.constant 1.000000e+00 : f32
    %446 = vector.broadcast %cst_180 : f32 to vector<2x128xf32>
    %447 = arith.addf %446, %445 : vector<2x128xf32>
    %448 = arith.divf %446, %447 : vector<2x128xf32>
    %449 = vector.extract_strided_slice %436 {offsets = [0, 256], sizes = [2, 128], strides = [1, 1]} : vector<2x512xf32> to vector<2x128xf32>
    %450 = math.tanh %449 : vector<2x128xf32>
    %451 = vector.extract_strided_slice %436 {offsets = [0, 384], sizes = [2, 128], strides = [1, 1]} : vector<2x512xf32> to vector<2x128xf32>
    %452 = arith.negf %451 : vector<2x128xf32>
    %453 = math.exp %452 : vector<2x128xf32>
    %cst_181 = arith.constant 1.000000e+00 : f32
    %454 = vector.broadcast %cst_181 : f32 to vector<2x128xf32>
    %455 = arith.addf %454, %453 : vector<2x128xf32>
    %456 = arith.divf %454, %455 : vector<2x128xf32>
    %457 = arith.mulf %448, %429 : vector<2x128xf32>
    %458 = arith.mulf %442, %450 : vector<2x128xf32>
    %459 = arith.addf %457, %458 : vector<2x128xf32>
    %460 = math.tanh %459 : vector<2x128xf32>
    %461 = arith.mulf %456, %460 : vector<2x128xf32>
    %462 = vector.extract_strided_slice %398 {offsets = [2, 0], sizes = [1, 512], strides = [1, 1]} : vector<16x512xf32> to vector<1x512xf32>
    %463 = vector.extract_strided_slice %398 {offsets = [10, 0], sizes = [1, 512], strides = [1, 1]} : vector<16x512xf32> to vector<1x512xf32>
    %464 = tpu.concatenate %462, %463 in 0 : vector<1x512xf32>, vector<1x512xf32> -> vector<2x512xf32>
    %cst_182 = arith.constant dense<0.000000e+00> : vector<2x512xf32>
    %465 = tpu.matmul %461, %399, %cst_182 {dimension_numbers = #tpu.dot_dimension_numbers<[1], [0], [0], [1], [0, 0, 1, 1], [], []>} : vector<2x128xf32>, vector<128x512xf32>, vector<2x512xf32> -> vector<2x512xf32>
    %466 = arith.addf %464, %465 : vector<2x512xf32>
    %467 = vector.extract_strided_slice %466 {offsets = [0, 0], sizes = [2, 128], strides = [1, 1]} : vector<2x512xf32> to vector<2x128xf32>
    %468 = arith.negf %467 : vector<2x128xf32>
    %469 = math.exp %468 : vector<2x128xf32>
    %cst_183 = arith.constant 1.000000e+00 : f32
    %470 = vector.broadcast %cst_183 : f32 to vector<2x128xf32>
    %471 = arith.addf %470, %469 : vector<2x128xf32>
    %472 = arith.divf %470, %471 : vector<2x128xf32>
    %473 = vector.extract_strided_slice %466 {offsets = [0, 128], sizes = [2, 128], strides = [1, 1]} : vector<2x512xf32> to vector<2x128xf32>
    %474 = arith.negf %473 : vector<2x128xf32>
    %475 = math.exp %474 : vector<2x128xf32>
    %cst_184 = arith.constant 1.000000e+00 : f32
    %476 = vector.broadcast %cst_184 : f32 to vector<2x128xf32>
    %477 = arith.addf %476, %475 : vector<2x128xf32>
    %478 = arith.divf %476, %477 : vector<2x128xf32>
    %479 = vector.extract_strided_slice %466 {offsets = [0, 256], sizes = [2, 128], strides = [1, 1]} : vector<2x512xf32> to vector<2x128xf32>
    %480 = math.tanh %479 : vector<2x128xf32>
    %481 = vector.extract_strided_slice %466 {offsets = [0, 384], sizes = [2, 128], strides = [1, 1]} : vector<2x512xf32> to vector<2x128xf32>
    %482 = arith.negf %481 : vector<2x128xf32>
    %483 = math.exp %482 : vector<2x128xf32>
    %cst_185 = arith.constant 1.000000e+00 : f32
    %484 = vector.broadcast %cst_185 : f32 to vector<2x128xf32>
    %485 = arith.addf %484, %483 : vector<2x128xf32>
    %486 = arith.divf %484, %485 : vector<2x128xf32>
    %487 = arith.mulf %478, %459 : vector<2x128xf32>
    %488 = arith.mulf %472, %480 : vector<2x128xf32>
    %489 = arith.addf %487, %488 : vector<2x128xf32>
    %490 = math.tanh %489 : vector<2x128xf32>
    %491 = arith.mulf %486, %490 : vector<2x128xf32>
    %492 = vector.extract_strided_slice %398 {offsets = [3, 0], sizes = [1, 512], strides = [1, 1]} : vector<16x512xf32> to vector<1x512xf32>
    %493 = vector.extract_strided_slice %398 {offsets = [11, 0], sizes = [1, 512], strides = [1, 1]} : vector<16x512xf32> to vector<1x512xf32>
    %494 = tpu.concatenate %492, %493 in 0 : vector<1x512xf32>, vector<1x512xf32> -> vector<2x512xf32>
    %cst_186 = arith.constant dense<0.000000e+00> : vector<2x512xf32>
    %495 = tpu.matmul %491, %399, %cst_186 {dimension_numbers = #tpu.dot_dimension_numbers<[1], [0], [0], [1], [0, 0, 1, 1], [], []>} : vector<2x128xf32>, vector<128x512xf32>, vector<2x512xf32> -> vector<2x512xf32>
    %496 = arith.addf %494, %495 : vector<2x512xf32>
    %497 = vector.extract_strided_slice %496 {offsets = [0, 0], sizes = [2, 128], strides = [1, 1]} : vector<2x512xf32> to vector<2x128xf32>
    %498 = arith.negf %497 : vector<2x128xf32>
    %499 = math.exp %498 : vector<2x128xf32>
    %cst_187 = arith.constant 1.000000e+00 : f32
    %500 = vector.broadcast %cst_187 : f32 to vector<2x128xf32>
    %501 = arith.addf %500, %499 : vector<2x128xf32>
    %502 = arith.divf %500, %501 : vector<2x128xf32>
    %503 = vector.extract_strided_slice %496 {offsets = [0, 128], sizes = [2, 128], strides = [1, 1]} : vector<2x512xf32> to vector<2x128xf32>
    %504 = arith.negf %503 : vector<2x128xf32>
    %505 = math.exp %504 : vector<2x128xf32>
    %cst_188 = arith.constant 1.000000e+00 : f32
    %506 = vector.broadcast %cst_188 : f32 to vector<2x128xf32>
    %507 = arith.addf %506, %505 : vector<2x128xf32>
    %508 = arith.divf %506, %507 : vector<2x128xf32>
    %509 = vector.extract_strided_slice %496 {offsets = [0, 256], sizes = [2, 128], strides = [1, 1]} : vector<2x512xf32> to vector<2x128xf32>
    %510 = math.tanh %509 : vector<2x128xf32>
    %511 = vector.extract_strided_slice %496 {offsets = [0, 384], sizes = [2, 128], strides = [1, 1]} : vector<2x512xf32> to vector<2x128xf32>
    %512 = arith.negf %511 : vector<2x128xf32>
    %513 = math.exp %512 : vector<2x128xf32>
    %cst_189 = arith.constant 1.000000e+00 : f32
    %514 = vector.broadcast %cst_189 : f32 to vector<2x128xf32>
    %515 = arith.addf %514, %513 : vector<2x128xf32>
    %516 = arith.divf %514, %515 : vector<2x128xf32>
    %517 = arith.mulf %508, %489 : vector<2x128xf32>
    %518 = arith.mulf %502, %510 : vector<2x128xf32>
    %519 = arith.addf %517, %518 : vector<2x128xf32>
    %520 = math.tanh %519 : vector<2x128xf32>
    %521 = arith.mulf %516, %520 : vector<2x128xf32>
    %522 = vector.extract_strided_slice %398 {offsets = [4, 0], sizes = [1, 512], strides = [1, 1]} : vector<16x512xf32> to vector<1x512xf32>
    %523 = vector.extract_strided_slice %398 {offsets = [12, 0], sizes = [1, 512], strides = [1, 1]} : vector<16x512xf32> to vector<1x512xf32>
    %524 = tpu.concatenate %522, %523 in 0 : vector<1x512xf32>, vector<1x512xf32> -> vector<2x512xf32>
    %cst_190 = arith.constant dense<0.000000e+00> : vector<2x512xf32>
    %525 = tpu.matmul %521, %399, %cst_190 {dimension_numbers = #tpu.dot_dimension_numbers<[1], [0], [0], [1], [0, 0, 1, 1], [], []>} : vector<2x128xf32>, vector<128x512xf32>, vector<2x512xf32> -> vector<2x512xf32>
    %526 = arith.addf %524, %525 : vector<2x512xf32>
    %527 = vector.extract_strided_slice %526 {offsets = [0, 0], sizes = [2, 128], strides = [1, 1]} : vector<2x512xf32> to vector<2x128xf32>
    %528 = arith.negf %527 : vector<2x128xf32>
    %529 = math.exp %528 : vector<2x128xf32>
    %cst_191 = arith.constant 1.000000e+00 : f32
    %530 = vector.broadcast %cst_191 : f32 to vector<2x128xf32>
    %531 = arith.addf %530, %529 : vector<2x128xf32>
    %532 = arith.divf %530, %531 : vector<2x128xf32>
    %533 = vector.extract_strided_slice %526 {offsets = [0, 128], sizes = [2, 128], strides = [1, 1]} : vector<2x512xf32> to vector<2x128xf32>
    %534 = arith.negf %533 : vector<2x128xf32>
    %535 = math.exp %534 : vector<2x128xf32>
    %cst_192 = arith.constant 1.000000e+00 : f32
    %536 = vector.broadcast %cst_192 : f32 to vector<2x128xf32>
    %537 = arith.addf %536, %535 : vector<2x128xf32>
    %538 = arith.divf %536, %537 : vector<2x128xf32>
    %539 = vector.extract_strided_slice %526 {offsets = [0, 256], sizes = [2, 128], strides = [1, 1]} : vector<2x512xf32> to vector<2x128xf32>
    %540 = math.tanh %539 : vector<2x128xf32>
    %541 = vector.extract_strided_slice %526 {offsets = [0, 384], sizes = [2, 128], strides = [1, 1]} : vector<2x512xf32> to vector<2x128xf32>
    %542 = arith.negf %541 : vector<2x128xf32>
    %543 = math.exp %542 : vector<2x128xf32>
    %cst_193 = arith.constant 1.000000e+00 : f32
    %544 = vector.broadcast %cst_193 : f32 to vector<2x128xf32>
    %545 = arith.addf %544, %543 : vector<2x128xf32>
    %546 = arith.divf %544, %545 : vector<2x128xf32>
    %547 = arith.mulf %538, %519 : vector<2x128xf32>
    %548 = arith.mulf %532, %540 : vector<2x128xf32>
    %549 = arith.addf %547, %548 : vector<2x128xf32>
    %550 = math.tanh %549 : vector<2x128xf32>
    %551 = arith.mulf %546, %550 : vector<2x128xf32>
    %552 = vector.extract_strided_slice %398 {offsets = [5, 0], sizes = [1, 512], strides = [1, 1]} : vector<16x512xf32> to vector<1x512xf32>
    %553 = vector.extract_strided_slice %398 {offsets = [13, 0], sizes = [1, 512], strides = [1, 1]} : vector<16x512xf32> to vector<1x512xf32>
    %554 = tpu.concatenate %552, %553 in 0 : vector<1x512xf32>, vector<1x512xf32> -> vector<2x512xf32>
    %cst_194 = arith.constant dense<0.000000e+00> : vector<2x512xf32>
    %555 = tpu.matmul %551, %399, %cst_194 {dimension_numbers = #tpu.dot_dimension_numbers<[1], [0], [0], [1], [0, 0, 1, 1], [], []>} : vector<2x128xf32>, vector<128x512xf32>, vector<2x512xf32> -> vector<2x512xf32>
    %556 = arith.addf %554, %555 : vector<2x512xf32>
    %557 = vector.extract_strided_slice %556 {offsets = [0, 0], sizes = [2, 128], strides = [1, 1]} : vector<2x512xf32> to vector<2x128xf32>
    %558 = arith.negf %557 : vector<2x128xf32>
    %559 = math.exp %558 : vector<2x128xf32>
    %cst_195 = arith.constant 1.000000e+00 : f32
    %560 = vector.broadcast %cst_195 : f32 to vector<2x128xf32>
    %561 = arith.addf %560, %559 : vector<2x128xf32>
    %562 = arith.divf %560, %561 : vector<2x128xf32>
    %563 = vector.extract_strided_slice %556 {offsets = [0, 128], sizes = [2, 128], strides = [1, 1]} : vector<2x512xf32> to vector<2x128xf32>
    %564 = arith.negf %563 : vector<2x128xf32>
    %565 = math.exp %564 : vector<2x128xf32>
    %cst_196 = arith.constant 1.000000e+00 : f32
    %566 = vector.broadcast %cst_196 : f32 to vector<2x128xf32>
    %567 = arith.addf %566, %565 : vector<2x128xf32>
    %568 = arith.divf %566, %567 : vector<2x128xf32>
    %569 = vector.extract_strided_slice %556 {offsets = [0, 256], sizes = [2, 128], strides = [1, 1]} : vector<2x512xf32> to vector<2x128xf32>
    %570 = math.tanh %569 : vector<2x128xf32>
    %571 = vector.extract_strided_slice %556 {offsets = [0, 384], sizes = [2, 128], strides = [1, 1]} : vector<2x512xf32> to vector<2x128xf32>
    %572 = arith.negf %571 : vector<2x128xf32>
    %573 = math.exp %572 : vector<2x128xf32>
    %cst_197 = arith.constant 1.000000e+00 : f32
    %574 = vector.broadcast %cst_197 : f32 to vector<2x128xf32>
    %575 = arith.addf %574, %573 : vector<2x128xf32>
    %576 = arith.divf %574, %575 : vector<2x128xf32>
    %577 = arith.mulf %568, %549 : vector<2x128xf32>
    %578 = arith.mulf %562, %570 : vector<2x128xf32>
    %579 = arith.addf %577, %578 : vector<2x128xf32>
    %580 = math.tanh %579 : vector<2x128xf32>
    %581 = arith.mulf %576, %580 : vector<2x128xf32>
    %582 = vector.extract_strided_slice %398 {offsets = [6, 0], sizes = [1, 512], strides = [1, 1]} : vector<16x512xf32> to vector<1x512xf32>
    %583 = vector.extract_strided_slice %398 {offsets = [14, 0], sizes = [1, 512], strides = [1, 1]} : vector<16x512xf32> to vector<1x512xf32>
    %584 = tpu.concatenate %582, %583 in 0 : vector<1x512xf32>, vector<1x512xf32> -> vector<2x512xf32>
    %cst_198 = arith.constant dense<0.000000e+00> : vector<2x512xf32>
    %585 = tpu.matmul %581, %399, %cst_198 {dimension_numbers = #tpu.dot_dimension_numbers<[1], [0], [0], [1], [0, 0, 1, 1], [], []>} : vector<2x128xf32>, vector<128x512xf32>, vector<2x512xf32> -> vector<2x512xf32>
    %586 = arith.addf %584, %585 : vector<2x512xf32>
    %587 = vector.extract_strided_slice %586 {offsets = [0, 0], sizes = [2, 128], strides = [1, 1]} : vector<2x512xf32> to vector<2x128xf32>
    %588 = arith.negf %587 : vector<2x128xf32>
    %589 = math.exp %588 : vector<2x128xf32>
    %cst_199 = arith.constant 1.000000e+00 : f32
    %590 = vector.broadcast %cst_199 : f32 to vector<2x128xf32>
    %591 = arith.addf %590, %589 : vector<2x128xf32>
    %592 = arith.divf %590, %591 : vector<2x128xf32>
    %593 = vector.extract_strided_slice %586 {offsets = [0, 128], sizes = [2, 128], strides = [1, 1]} : vector<2x512xf32> to vector<2x128xf32>
    %594 = arith.negf %593 : vector<2x128xf32>
    %595 = math.exp %594 : vector<2x128xf32>
    %cst_200 = arith.constant 1.000000e+00 : f32
    %596 = vector.broadcast %cst_200 : f32 to vector<2x128xf32>
    %597 = arith.addf %596, %595 : vector<2x128xf32>
    %598 = arith.divf %596, %597 : vector<2x128xf32>
    %599 = vector.extract_strided_slice %586 {offsets = [0, 256], sizes = [2, 128], strides = [1, 1]} : vector<2x512xf32> to vector<2x128xf32>
    %600 = math.tanh %599 : vector<2x128xf32>
    %601 = vector.extract_strided_slice %586 {offsets = [0, 384], sizes = [2, 128], strides = [1, 1]} : vector<2x512xf32> to vector<2x128xf32>
    %602 = arith.negf %601 : vector<2x128xf32>
    %603 = math.exp %602 : vector<2x128xf32>
    %cst_201 = arith.constant 1.000000e+00 : f32
    %604 = vector.broadcast %cst_201 : f32 to vector<2x128xf32>
    %605 = arith.addf %604, %603 : vector<2x128xf32>
    %606 = arith.divf %604, %605 : vector<2x128xf32>
    %607 = arith.mulf %598, %579 : vector<2x128xf32>
    %608 = arith.mulf %592, %600 : vector<2x128xf32>
    %609 = arith.addf %607, %608 : vector<2x128xf32>
    %610 = math.tanh %609 : vector<2x128xf32>
    %611 = arith.mulf %606, %610 : vector<2x128xf32>
    %612 = vector.extract_strided_slice %398 {offsets = [7, 0], sizes = [1, 512], strides = [1, 1]} : vector<16x512xf32> to vector<1x512xf32>
    %613 = vector.extract_strided_slice %398 {offsets = [15, 0], sizes = [1, 512], strides = [1, 1]} : vector<16x512xf32> to vector<1x512xf32>
    %614 = tpu.concatenate %612, %613 in 0 : vector<1x512xf32>, vector<1x512xf32> -> vector<2x512xf32>
    %cst_202 = arith.constant dense<0.000000e+00> : vector<2x512xf32>
    %615 = tpu.matmul %611, %399, %cst_202 {dimension_numbers = #tpu.dot_dimension_numbers<[1], [0], [0], [1], [0, 0, 1, 1], [], []>} : vector<2x128xf32>, vector<128x512xf32>, vector<2x512xf32> -> vector<2x512xf32>
    %616 = arith.addf %614, %615 : vector<2x512xf32>
    %617 = vector.extract_strided_slice %616 {offsets = [0, 0], sizes = [2, 128], strides = [1, 1]} : vector<2x512xf32> to vector<2x128xf32>
    %618 = arith.negf %617 : vector<2x128xf32>
    %619 = math.exp %618 : vector<2x128xf32>
    %cst_203 = arith.constant 1.000000e+00 : f32
    %620 = vector.broadcast %cst_203 : f32 to vector<2x128xf32>
    %621 = arith.addf %620, %619 : vector<2x128xf32>
    %622 = arith.divf %620, %621 : vector<2x128xf32>
    %623 = vector.extract_strided_slice %616 {offsets = [0, 128], sizes = [2, 128], strides = [1, 1]} : vector<2x512xf32> to vector<2x128xf32>
    %624 = arith.negf %623 : vector<2x128xf32>
    %625 = math.exp %624 : vector<2x128xf32>
    %cst_204 = arith.constant 1.000000e+00 : f32
    %626 = vector.broadcast %cst_204 : f32 to vector<2x128xf32>
    %627 = arith.addf %626, %625 : vector<2x128xf32>
    %628 = arith.divf %626, %627 : vector<2x128xf32>
    %629 = vector.extract_strided_slice %616 {offsets = [0, 256], sizes = [2, 128], strides = [1, 1]} : vector<2x512xf32> to vector<2x128xf32>
    %630 = math.tanh %629 : vector<2x128xf32>
    %631 = vector.extract_strided_slice %616 {offsets = [0, 384], sizes = [2, 128], strides = [1, 1]} : vector<2x512xf32> to vector<2x128xf32>
    %632 = arith.negf %631 : vector<2x128xf32>
    %633 = math.exp %632 : vector<2x128xf32>
    %cst_205 = arith.constant 1.000000e+00 : f32
    %634 = vector.broadcast %cst_205 : f32 to vector<2x128xf32>
    %635 = arith.addf %634, %633 : vector<2x128xf32>
    %636 = arith.divf %634, %635 : vector<2x128xf32>
    %637 = arith.mulf %628, %609 : vector<2x128xf32>
    %638 = arith.mulf %622, %630 : vector<2x128xf32>
    %639 = arith.addf %637, %638 : vector<2x128xf32>
    %640 = math.tanh %639 : vector<2x128xf32>
    %641 = arith.mulf %636, %640 : vector<2x128xf32>
    %c0_206 = arith.constant 0 : index
    %c0_207 = arith.constant 0 : index
    %642 = vector.load %arg22[%c0_206, %c0_207] : memref<1x128xf32, #tpu.memory_space<vmem>>, vector<1x128xf32>
    %643 = vector.broadcast %642 : vector<1x128xf32> to vector<2x128xf32>
    %644 = arith.mulf %641, %643 : vector<2x128xf32>
    %cst_208 = arith.constant dense<0.000000e+00> : vector<2xf32>
    %645 = vector.multi_reduction <add>, %644, %cst_208 [1] : vector<2x128xf32> to vector<2xf32>
    %646 = vector.shape_cast %645 : vector<2xf32> to vector<2x1xf32>
    %c0_209 = arith.constant 0 : index
    %c0_210 = arith.constant 0 : index
    %647 = vector.load %arg23[%c0_209, %c0_210] : memref<1x1xf32, #tpu.memory_space<vmem>>, vector<1x1xf32>
    %648 = vector.broadcast %647 : vector<1x1xf32> to vector<2x1xf32>
    %649 = arith.addf %646, %648 : vector<2x1xf32>
    %650 = arith.negf %649 : vector<2x1xf32>
    %651 = math.exp %650 : vector<2x1xf32>
    %cst_211 = arith.constant 1.000000e+00 : f32
    %652 = vector.broadcast %cst_211 : f32 to vector<2x1xf32>
    %653 = arith.addf %652, %651 : vector<2x1xf32>
    %654 = arith.divf %652, %653 : vector<2x1xf32>
    %c0_212 = arith.constant 0 : index
    %c0_213 = arith.constant 0 : index
    %655 = vector.load %arg24[%c0_212, %c0_213] : memref<2x1xf32, #tpu.memory_space<vmem>>, vector<2x1xf32>
    tpu.vector_store %arg24[%c0_212, %c0_213], %654 {strides = array<i32>} : memref<2x1xf32, #tpu.memory_space<vmem>>, vector<2x1xf32>,
    return
  }
  func.func @transform_0(%arg0: i32) -> (i32, i32) {
    %c0_i32 = arith.constant 0 : i32
    %c0_i32_0 = arith.constant 0 : i32
    %c0_i32_1 = arith.constant 0 : i32
    return %c0_i32, %c0_i32_0 : i32, i32
  }
  func.func @transform_1(%arg0: i32) -> (i32, i32) {
    %c0_i32 = arith.constant 0 : i32
    %c0_i32_0 = arith.constant 0 : i32
    %c0_i32_1 = arith.constant 0 : i32
    return %c0_i32, %c0_i32_0 : i32, i32
  }
  func.func @transform_2(%arg0: i32) -> (i32, i32) {
    %c0_i32 = arith.constant 0 : i32
    %c0_i32_0 = arith.constant 0 : i32
    %c0_i32_1 = arith.constant 0 : i32
    return %c0_i32, %c0_i32_0 : i32, i32
  }
  func.func @transform_3(%arg0: i32) -> (i32, i32) {
    %c0_i32 = arith.constant 0 : i32
    %c0_i32_0 = arith.constant 0 : i32
    %c0_i32_1 = arith.constant 0 : i32
    return %c0_i32, %c0_i32_0 : i32, i32
  }
  func.func @transform_4(%arg0: i32) -> (i32, i32, i32) {
    %c0_i32 = arith.constant 0 : i32
    %c0_i32_0 = arith.constant 0 : i32
    %c0_i32_1 = arith.constant 0 : i32
    %c0_i32_2 = arith.constant 0 : i32
    return %c0_i32, %c0_i32_0, %c0_i32_1 : i32, i32, i32
  }
  func.func @transform_5(%arg0: i32) -> (i32, i32, i32) {
    %c0_i32 = arith.constant 0 : i32
    %c0_i32_0 = arith.constant 0 : i32
    %c0_i32_1 = arith.constant 0 : i32
    %c0_i32_2 = arith.constant 0 : i32
    return %c0_i32, %c0_i32_0, %c0_i32_1 : i32, i32, i32
  }
  func.func @transform_6(%arg0: i32) -> (i32, i32, i32) {
    %c0_i32 = arith.constant 0 : i32
    %c0_i32_0 = arith.constant 0 : i32
    %c0_i32_1 = arith.constant 0 : i32
    %c0_i32_2 = arith.constant 0 : i32
    return %c0_i32, %c0_i32_0, %c0_i32_1 : i32, i32, i32
  }
  func.func @transform_7(%arg0: i32) -> (i32, i32, i32) {
    %c0_i32 = arith.constant 0 : i32
    %c0_i32_0 = arith.constant 0 : i32
    %c0_i32_1 = arith.constant 0 : i32
    %c0_i32_2 = arith.constant 0 : i32
    return %c0_i32, %c0_i32_0, %c0_i32_1 : i32, i32, i32
  }
  func.func @transform_8(%arg0: i32) -> (i32, i32, i32) {
    %c0_i32 = arith.constant 0 : i32
    %c0_i32_0 = arith.constant 0 : i32
    %c0_i32_1 = arith.constant 0 : i32
    %c0_i32_2 = arith.constant 0 : i32
    return %c0_i32, %c0_i32_0, %c0_i32_1 : i32, i32, i32
  }
  func.func @transform_9(%arg0: i32) -> (i32, i32, i32) {
    %c0_i32 = arith.constant 0 : i32
    %c0_i32_0 = arith.constant 0 : i32
    %c0_i32_1 = arith.constant 0 : i32
    %c0_i32_2 = arith.constant 0 : i32
    return %c0_i32, %c0_i32_0, %c0_i32_1 : i32, i32, i32
  }
  func.func @transform_10(%arg0: i32) -> (i32, i32, i32) {
    %c0_i32 = arith.constant 0 : i32
    %c0_i32_0 = arith.constant 0 : i32
    %c0_i32_1 = arith.constant 0 : i32
    %c0_i32_2 = arith.constant 0 : i32
    return %c0_i32, %c0_i32_0, %c0_i32_1 : i32, i32, i32
  }
  func.func @transform_11(%arg0: i32) -> (i32, i32, i32) {
    %c0_i32 = arith.constant 0 : i32
    %c0_i32_0 = arith.constant 0 : i32
    %c0_i32_1 = arith.constant 0 : i32
    %c0_i32_2 = arith.constant 0 : i32
    return %c0_i32, %c0_i32_0, %c0_i32_1 : i32, i32, i32
  }
  func.func @transform_12(%arg0: i32) -> (i32, i32, i32) {
    %c0_i32 = arith.constant 0 : i32
    %c0_i32_0 = arith.constant 0 : i32
    %c0_i32_1 = arith.constant 0 : i32
    %c0_i32_2 = arith.constant 0 : i32
    return %c0_i32, %c0_i32_0, %c0_i32_1 : i32, i32, i32
  }
  func.func @transform_13(%arg0: i32) -> (i32, i32, i32) {
    %c0_i32 = arith.constant 0 : i32
    %c0_i32_0 = arith.constant 0 : i32
    %c0_i32_1 = arith.constant 0 : i32
    %c0_i32_2 = arith.constant 0 : i32
    return %c0_i32, %c0_i32_0, %c0_i32_1 : i32, i32, i32
  }
  func.func @transform_14(%arg0: i32) -> (i32, i32, i32) {
    %c0_i32 = arith.constant 0 : i32
    %c0_i32_0 = arith.constant 0 : i32
    %c0_i32_1 = arith.constant 0 : i32
    %c0_i32_2 = arith.constant 0 : i32
    return %c0_i32, %c0_i32_0, %c0_i32_1 : i32, i32, i32
  }
  func.func @transform_15(%arg0: i32) -> (i32, i32, i32) {
    %c0_i32 = arith.constant 0 : i32
    %c0_i32_0 = arith.constant 0 : i32
    %c0_i32_1 = arith.constant 0 : i32
    %c0_i32_2 = arith.constant 0 : i32
    return %c0_i32, %c0_i32_0, %c0_i32_1 : i32, i32, i32
  }
  func.func @transform_16(%arg0: i32) -> (i32, i32) {
    %c0_i32 = arith.constant 0 : i32
    %c0_i32_0 = arith.constant 0 : i32
    %c0_i32_1 = arith.constant 0 : i32
    return %c0_i32, %c0_i32_0 : i32, i32
  }
  func.func @transform_17(%arg0: i32) -> (i32, i32) {
    %c0_i32 = arith.constant 0 : i32
    %c0_i32_0 = arith.constant 0 : i32
    %c0_i32_1 = arith.constant 0 : i32
    return %c0_i32, %c0_i32_0 : i32, i32
  }
  func.func @transform_18(%arg0: i32) -> (i32, i32) {
    %c0_i32 = arith.constant 0 : i32
    %c0_i32_0 = arith.constant 0 : i32
    %c0_i32_1 = arith.constant 0 : i32
    return %c0_i32, %c0_i32_0 : i32, i32
  }
  func.func @transform_19(%arg0: i32) -> (i32, i32) {
    %c0_i32 = arith.constant 0 : i32
    %c0_i32_0 = arith.constant 0 : i32
    %c0_i32_1 = arith.constant 0 : i32
    return %c0_i32, %c0_i32_0 : i32, i32
  }
  func.func @transform_20(%arg0: i32) -> (i32, i32) {
    %c0_i32 = arith.constant 0 : i32
    %c0_i32_0 = arith.constant 0 : i32
    %c0_i32_1 = arith.constant 0 : i32
    return %c0_i32, %c0_i32_0 : i32, i32
  }
  func.func @transform_21(%arg0: i32) -> (i32, i32) {
    %c0_i32 = arith.constant 0 : i32
    %c0_i32_0 = arith.constant 0 : i32
    %c0_i32_1 = arith.constant 0 : i32
    return %c0_i32, %c0_i32_0 : i32, i32
  }
  func.func @transform_22(%arg0: i32) -> (i32, i32) {
    %c0_i32 = arith.constant 0 : i32
    %c0_i32_0 = arith.constant 0 : i32
    %c0_i32_1 = arith.constant 0 : i32
    return %c0_i32, %c0_i32_0 : i32, i32
  }
  func.func @transform_23(%arg0: i32) -> (i32, i32) {
    %c0_i32 = arith.constant 0 : i32
    %c0_i32_0 = arith.constant 0 : i32
    %c0_i32_1 = arith.constant 0 : i32
    return %c0_i32, %c0_i32_0 : i32, i32
  }
}

</mosaic_0001>

<bundles_post_ra>
// kernel: forward.1
= control target key start
LH: loop header
LB: loop body
LE: loop exit
PB: predicated region body
PF: predicated region fallthrough
CT: control target
= control target key end

     0   :  { %s9570_s0 = inlined_call_operand.vmem [shape: f32[2,8], index: 0, kind: input, shape index: {}]   ;;  %s9571_s1 = inlined_call_operand.vmem [shape: f32[16,128], index: 1, kind: input, shape index: {}]   ;;  %s9572_s2 = inlined_call_operand.vmem [shape: f32[1,128], index: 2, kind: input, shape index: {}]   ;;  %s9573_s3 = inlined_call_operand.vmem [shape: f32[1,128], index: 3, kind: input, shape index: {}]   ;;  %s9574_s4 = inlined_call_operand.hbm [shape: f32[2,128,384], index: 4, kind: input, shape index: {}]   ;;  %s9575_s5 = inlined_call_operand.vmem [shape: f32[2,1,384], index: 5, kind: input, shape index: {}]   ;;  %s9576_s6 = inlined_call_operand.vmem [shape: f32[2,32,128], index: 6, kind: input, shape index: {}]   ;;  %s9577_s7 = inlined_call_operand.vmem [shape: f32[2,1,128], index: 7, kind: input, shape index: {}]   ;;  %s9578_s8 = inlined_call_operand.vmem [shape: f32[2,1,128], index: 8, kind: input, shape index: {}]   ;;  %s9579_s9 = inlined_call_operand.vmem [shape: f32[2,1,128], index: 9, kind: input, shape index: {}]   ;;  %s9580_s10 = inlined_call_operand.hbm [shape: f32[2,128,128], index: 10, kind: input, shape index: {}]   ;;  %s9581_s11 = inlined_call_operand.vmem [shape: f32[2,1,128], index: 11, kind: input, shape index: {}]   ;;  %s9582_s12 = inlined_call_operand.hbm [shape: f32[2,128,128], index: 12, kind: input, shape index: {}]   ;;  %s9583_s13 = inlined_call_operand.vmem [shape: f32[2,1,128], index: 13, kind: input, shape index: {}]   ;;  %s9584_s14 = inlined_call_operand.vmem [shape: f32[2,1,128], index: 14, kind: input, shape index: {}]   ;;  %s9585_s15 = inlined_call_operand.vmem [shape: f32[2,1,128], index: 15, kind: input, shape index: {}]   ;;  %s9586_s16 = inlined_call_operand.vmem [shape: f32[128,128], index: 16, kind: input, shape index: {}]   ;;  %s9587_s17 = inlined_call_operand.hbm [shape: f32[1,128], index: 17, kind: input, shape index: {}]   ;;  %s9588_s18 = inlined_call_operand.hbm [shape: f32[128,512], index: 18, kind: input, shape index: {}]   ;;  %s9589_s19 = inlined_call_operand.hbm [shape: f32[128,512], index: 19, kind: input, shape index: {}]   ;;  %s9590_s20 = inlined_call_operand.vmem [shape: f32[1,512], index: 20, kind: input, shape index: {}]   ;;  %s9591_s21 = inlined_call_operand.vmem [shape: f32[1,128], index: 21, kind: input, shape index: {}]   ;;  %s9592_s22 = inlined_call_operand.<no memory space> [shape: f32[1,1], index: 22, kind: input, shape index: {}]   ;;  %s9593_s23 = inlined_call_operand.vmem [shape: f32[2,1], index: 23, kind: output, shape index: {}]  }
   0x1   :  { %9602 = sst [smem:[#allocation34_spill]] %s9570_s0  ;;  %v28_v0 = vstv %s9592_s22 }
   0x2   :  { %9603 = sst [smem:[#allocation35_spill]] %s9571_s1  ;;  %29 = vst [vmem:[#allocation2] sm:$0x1] %v28_v0 }
   0x3   :  { %9604 = sst [smem:[#allocation36_spill]] %s9572_s2 }
   0x4   :  { %9605 = sst [smem:[#allocation37_spill]] %s9573_s3 }
   0x5   :  { %9606 = sst [smem:[#allocation38_spill]] %s9574_s4 }
   0x6   :  { %9607 = sst [smem:[#allocation39_spill]] %s9575_s5 }
   0x7   :  { %9608 = sst [smem:[#allocation40_spill]] %s9576_s6 }
   0x8   :  { %9609 = sst [smem:[#allocation41_spill]] %s9577_s7 }
   0x9   :  { %30 = vsyncpa [#allocation4], 0 }
   0xa   :  { %31 = vsyncpa [#allocation6], 0 }
   0xb   :  { %32 = vsyncpa [#allocation9], 0 }
   0xc   :  { %33 = vsyncpa [#allocation12], 0  ;;  %s8151_s24 = smov [#allocation5]   ;;  %s8011_s26 = scalar_lea.hbm %s9580_s10, 4096 }
   0xd   :  { %s69_s25 = sshll.u32 %s8151_s24, 4  ;;  %p8012_p0 = scmp.ne.s32.totalorder %s9580_s10, %s8011_s26  ;;  %s70_s25 = int_to_ptr.vmem [resolvable:$true] %s69_s25 }
   0xe   :  { %p8015_p1 = scmp.lt.u32.totalorder %s8011_s26, %s9580_s10 }
  0x10   :  { %p8017_p2 = pnand %p8015_p1, %p8012_p0 }
  0x12   :  { %8020 = shalt.err (!%p8017_p2)
}
  0x13   :  { %s8021_s22 = scalar_lea.vmem %s70_s25, 4096  ;;  %p8026_p4 = scmp.lt.s32.totalorder %s70_s25, %s70_s25 }
  0x14   :  { %p8022_p3 = scmp.ne.s32.totalorder %s70_s25, %s8021_s22  ;;  %p8027_p5 = scmp.lt.s32.totalorder %s8021_s22, %s8021_s22 }
  0x16   :  { %p8028_p6 = por %p8027_p5, %p8026_p4 }
  0x18   :  { %p8029_p7 = pnand %p8028_p6, %p8022_p3 }
  0x1a   :  { %8032 = shalt.err (!%p8029_p7)
}
  0x1b   :  { %s9599_s28 = smov 128   ;;  %s8153_s29 = smov 8  }
  0x1c   :  { %75 = dma.hbm_to_vmem [thread:$0]  %s9580_s10, 4096, %s70_s25, [#allocation6], %s9599_s28, %s9599_s28, %s8153_s29  }
  0x1d   :  { %s8154_s4 = smov [#allocation8]   ;;  %s8155_s24 = smov [#allocation3]  }
  0x1e   :  { %s104_s30 = sshll.u32 %s8154_s4, 4  ;;  %s47_s5 = sshll.u32 %s8155_s24, 4  ;;  %s105_s30 = int_to_ptr.vmem [resolvable:$true] %s104_s30  ;;  %s48_s5 = int_to_ptr.vmem [resolvable:$true] %s47_s5 }
  0x1f   :  { %s8033_s2 = scalar_lea.hbm %s9587_s17, 16 }
  0x20   :  { %p8034_p8 = scmp.ne.s32.totalorder %s9587_s17, %s8033_s2  ;;  %p8037_p9 = scmp.lt.u32.totalorder %s8033_s2, %s9587_s17 }
  0x22   :  { %p8039_p10 = pnand %p8037_p9, %p8034_p8 }
  0x24   :  { %8042 = shalt.err (!%p8039_p10)
}
  0x25   :  { %s8043_s10 = scalar_lea.vmem %s105_s30, 16  ;;  %s8047_s25 = scalar_lea.vmem %s105_s30, 32 }
  0x26   :  { %p8044_p11 = scmp.ne.s32.totalorder %s105_s30, %s8043_s10  ;;  %p8048_p12 = scmp.lt.s32.totalorder %s105_s30, %s105_s30 }
  0x27   :  { %p8049_p13 = scmp.lt.s32.totalorder %s8047_s25, %s8043_s10 }
  0x29   :  { %p8050_p0 = por %p8049_p13, %p8048_p12 }
  0x2b   :  { %p8051_p1 = pnand %p8050_p0, %p8044_p11 }
  0x2d   :  { %8054 = shalt.err (!%p8051_p1)
}
  0x2e   :  { %107 = dma.hbm_to_vmem [thread:$0]  %s9587_s17, 16, %s105_s30, [#allocation9]  }
  0x2f   :  { %s9610_s1 = sld [smem:[#allocation38_spill]] }
  0x35   :  { %s8055_s26 = scalar_lea.hbm %s9610_s1, 12288 }
  0x36   :  { %p8056_p2 = scmp.ne.s32.totalorder %s9610_s1, %s8055_s26  ;;  %p8059_p3 = scmp.lt.u32.totalorder %s8055_s26, %s9610_s1 }
  0x38   :  { %p8061_p4 = pnand %p8059_p3, %p8056_p2 }
  0x3a   :  { %8064 = shalt.err (!%p8061_p4)
}
  0x3b   :  { %s8065_s22 = scalar_lea.vmem %s48_s5, 12288  ;;  %p8070_p6 = scmp.lt.s32.totalorder %s48_s5, %s48_s5 }
  0x3c   :  { %p8066_p5 = scmp.ne.s32.totalorder %s48_s5, %s8065_s22  ;;  %p8071_p7 = scmp.lt.s32.totalorder %s8065_s22, %s8065_s22 }
  0x3e   :  { %p8072_p8 = por %p8071_p7, %p8070_p6 }
  0x40   :  { %p8073_p9 = pnand %p8072_p8, %p8066_p5 }
  0x42   :  { %8076 = shalt.err (!%p8073_p9)
}
  0x43   :  { %s8156_s17 = smov 384   ;;  %s8157_s30 = smov 24  }
  0x44   :  { %53 = dma.hbm_to_vmem [thread:$0]  %s9610_s1, 12288, %s48_s5, [#allocation4], %s8156_s17, %s8156_s17, %s8157_s30  }
  0x45   :  { %s8158_s3 = smov [#allocation7]   ;;  %s8159_s4 = smov [#allocation10]  }
  0x46   :  { %s83_s0 = sshll.u32 %s8158_s3, 4  ;;  %s113_s24 = sshll.u32 %s8159_s4, 4  ;;  %s84_s0 = int_to_ptr.vmem [resolvable:$true] %s83_s0  ;;  %s114_s24 = int_to_ptr.vmem [resolvable:$true] %s113_s24 }
  0x47   :  { %s8077_s6 = scalar_lea.hbm %s9582_s12, 4096 }
  0x48   :  { %p8078_p10 = scmp.ne.s32.totalorder %s9582_s12, %s8077_s6  ;;  %p8081_p11 = scmp.lt.u32.totalorder %s8077_s6, %s9582_s12 }
  0x4a   :  { %p8083_p12 = pnand %p8081_p11, %p8078_p10 }
  0x4c   :  { %8086 = shalt.err (!%p8083_p12)
}
  0x4d   :  { %s8087_s5 = scalar_lea.vmem %s84_s0, 4096  ;;  %p8092_p0 = scmp.lt.s32.totalorder %s84_s0, %s84_s0 }
  0x4e   :  { %p8088_p13 = scmp.ne.s32.totalorder %s84_s0, %s8087_s5  ;;  %p8093_p1 = scmp.lt.s32.totalorder %s8087_s5, %s8087_s5 }
  0x50   :  { %p8094_p2 = por %p8093_p1, %p8092_p0 }
  0x52   :  { %p8095_p3 = pnand %p8094_p2, %p8088_p13 }
  0x54   :  { %8098 = shalt.err (!%p8095_p3)
}
  0x55   :  { %s9611_s1 = smov 128   ;;  %s8099_s3 = scalar_lea.hbm %s9588_s18, 8192 }
  0x56   :  { %89 = dma.hbm_to_vmem [thread:$0]  %s9582_s12, 4096, %s84_s0, [#allocation6], %s9611_s1, %s9611_s1, %s8153_s29  }
  0x57   :  { %p8100_p4 = scmp.ne.s32.totalorder %s9588_s18, %s8099_s3  ;;  %p8103_p5 = scmp.lt.u32.totalorder %s8099_s3, %s9588_s18 }
  0x59   :  { %p8105_p6 = pnand %p8103_p5, %p8100_p4 }
  0x5b   :  { %8108 = shalt.err (!%p8105_p6)
}
  0x5c   :  { %s8109_s27 = scalar_lea.vmem %s114_s24, 8192  ;;  %p8114_p8 = scmp.lt.s32.totalorder %s114_s24, %s114_s24 }
  0x5d   :  { %p8110_p7 = scmp.ne.s32.totalorder %s114_s24, %s8109_s27  ;;  %p8115_p9 = scmp.lt.s32.totalorder %s8109_s27, %s8109_s27 }
  0x5f   :  { %p8116_p10 = por %p8115_p9, %p8114_p8 }
  0x61   :  { %p8117_p11 = pnand %p8116_p10, %p8110_p7 }
  0x63   :  { %8120 = shalt.err (!%p8117_p11)
}
  0x64   :  { %s8160_s12 = smov 512   ;;  %s8161_s0 = smov 32  }
  0x65   :  { %119 = dma.hbm_to_vmem [thread:$0]  %s9588_s18, 8192, %s114_s24, [#allocation9], %s8160_s12, %s8160_s12, %s8161_s0  }
  0x66   :  { %s8162_s5 = smov [#allocation11]   ;;  %s8121_s25 = scalar_lea.hbm %s9589_s19, 8192 }
  0x67   :  { %s125_s1 = sshll.u32 %s8162_s5, 4  ;;  %p8122_p12 = scmp.ne.s32.totalorder %s9589_s19, %s8121_s25  ;;  %s126_s1 = int_to_ptr.vmem [resolvable:$true] %s125_s1 }
  0x68   :  { %p8125_p13 = scmp.lt.u32.totalorder %s8121_s25, %s9589_s19 }
  0x6a   :  { %p8127_p0 = pnand %p8125_p13, %p8122_p12 }
  0x6c   :  { %8130 = shalt.err (!%p8127_p0)
}
  0x6d   :  { %s8131_s2 = scalar_lea.vmem %s126_s1, 8192  ;;  %p8136_p2 = scmp.lt.s32.totalorder %s126_s1, %s126_s1 }
  0x6e   :  { %p8132_p1 = scmp.ne.s32.totalorder %s126_s1, %s8131_s2  ;;  %p8137_p3 = scmp.lt.s32.totalorder %s8131_s2, %s8131_s2 }
  0x70   :  { %p8138_p4 = por %p8137_p3, %p8136_p2 }
  0x72   :  { %p8139_p5 = pnand %p8138_p4, %p8132_p1 }
  0x74   :  { %8142 = shalt.err (!%p8139_p5)
}
  0x75   :  { %131 = dma.hbm_to_vmem [thread:$0]  %s9589_s19, 8192, %s126_s1, [#allocation12], %s8160_s12, %s8160_s12, %s8161_s0  }
  0x76   :  { %8143 = dma.done.wait [#allocation4], 12288  }
  0x77   :  { %8144 = vsyncadd [#allocation4], 4294955008 }
  0x78   :  { %8145 = dma.done.wait [#allocation6], 8192  }
  0x79   :  { %8146 = vsyncadd [#allocation6], 4294959104 }
  0x7a   :  { %8147 = dma.done.wait [#allocation9], 8208  }
  0x7b   :  { %8148 = vsyncadd [#allocation9], 4294959088 }
  0x7c   :  { %8149 = dma.done.wait [#allocation12], 8192  }
  0x7d   :  { %8150 = vsyncadd [#allocation12], 4294959104  ;;  %s9612_s7 = sld [smem:[#allocation35_spill]]  ;;  %v229_v3 = vld [vmem:[#allocation3 + $0x8] sm:$0xff]  ;;  %v232_v6 = vld [vmem:[#allocation3 + $0x20] sm:$0xff]  ;;  %v9600_v56 = vmov 0.0  }
  0x7e   :  { %v228_v7 = vld [vmem:[#allocation3] sm:$0xff]  ;;  %v231_v8 = vld [vmem:[#allocation3 + $0x18] sm:$0xff]  ;;  %v6888_v9 = vpack.c.bf16 %v232_v6, %v229_v3  ;;  %v230_v11 = vld [vmem:[#allocation3 + $0x10] sm:$0xff]  ;;  %357 = vmatprep.mubr.f32.mxu0 %v9600_v56  ;;  %s9613_s0 = sld [smem:[#allocation36_spill]]  ;;  %s9614_s10 = sld [smem:[#allocation37_spill]]  ;;  %vm8164_vm0 = vmmov 0  }
  0x7f   :  { %v6890_v10 = vpack.c.bf16 %v231_v8, %v228_v7  ;;  %v233_v12 = vld [vmem:[#allocation3 + $0x28] sm:$0xff]  ;;  %v235_v13 = vld [vmem:[#allocation3 + $0x38] sm:$0xff]  ;;  %v238_v15 = vld [vmem:[#allocation3 + $0x50] sm:$0xff]  ;;  %s9615_s3 = sld [smem:[#allocation39_spill]]  ;;  %vm445_vm1 = vcmask 64512   ;;  %s9616_s2 = sld [smem:[#allocation34_spill]] }
  0x80   :  { %v6920_v14 = vpack.c.bf16 %v233_v12, %v230_v11  ;;  %6889 = vmatprep.subr.bf16.mxu0 %v6888_v9  ;;  %v6892_v16 = vpack.c.bf16 %v238_v15, %v235_v13  ;;  %v234_v17 = vld [vmem:[#allocation3 + $0x30] sm:$0xff]  ;;  %v237_v18 = vld [vmem:[#allocation3 + $0x48] sm:$0xff]  ;;  %v236_v19 = vld [vmem:[#allocation3 + $0x40] sm:$0xff]  ;;  %s8166_s18 = smov 120   ;;  %s8167_s24 = smov 112   ;;  %vm1813_vm2 = vcmask 195584  }
  0x81   :  { %6891 = vmatpush1.bf16.msra.mxu0 %v6890_v10  ;;  %v6894_v20 = vpack.c.bf16 %v237_v18, %v234_v17  ;;  %v239_v21 = vld [vmem:[#allocation3 + $0x58] sm:$0xff]  ;;  %v241_v23 = vld [vmem:[#allocation3 + $0x68] sm:$0xff]  ;;  %v244_v24 = vld [vmem:[#allocation3 + $0x80] sm:$0xff]  ;;  %s8168_s6 = smov 104   ;;  %s8169_s27 = smov 16   ;;  %vm1810_vm3 = vcmask 130048  }
  0x82   :  { %6921 = vmatprep.subr.bf16.mxu1 %v6920_v14  ;;  %6893 = vmatprep.subr.bf16.mxu0 %v6892_v16  ;;  %v6924_v22 = vpack.c.bf16 %v239_v21, %v236_v19  ;;  %v6896_v25 = vpack.c.bf16 %v244_v24, %v241_v23  ;;  %v240_v26 = vld [vmem:[#allocation3 + $0x60] sm:$0xff]  ;;  %v243_v27 = vld [vmem:[#allocation3 + $0x78] sm:$0xff]  ;;  %v242_v28 = vld [vmem:[#allocation3 + $0x70] sm:$0xff]  ;;  %s9617_s5 = sld [smem:[#allocation40_spill]]  ;;  %vm1827_vm4 = vcmask 261120   ;;  %s9618_s4 = sld [smem:[#allocation41_spill]] }
  0x83   :  { %v8375_v1 = vld [vmem:[%s9612_s7 + $0x8] sm:$0xff]  ;;  %v8380_v2 = vld [vmem:[%s9612_s7] sm:$0xff]  ;;  %6923 = vmatpush3.bf16.msra.mxu1 %v6920_v14  ;;  %v6898_v29 = vpack.c.bf16 %v243_v27, %v240_v26  ;;  %v250_v33 = vld [vmem:[#allocation3 + $0xb0] sm:$0xff]  ;;  %vm4614_vm5 = vcmask 1040384   ;;  %vm6123_vm6 = vcmask 1041408   ;;  %vm6141_vm7 = vcmask 1024  }
  0x84   :  { %188 = vadd.xlane.f32.xlu1 %v8375_v1  ;;  %186 = vadd.xlane.f32.xlu0 %v8380_v2  ;;  %v193_v4 = vmul.f32 %v8375_v1, %v8375_v1  ;;  %v192_v5 = vmul.f32 %v8380_v2, %v8380_v2  ;;  %v245_v30 = vld [vmem:[#allocation3 + $0x88] sm:$0xff]  ;;  %v247_v32 = vld [vmem:[#allocation3 + $0x98] sm:$0xff]  ;;  %v246_v35 = vld [vmem:[#allocation3 + $0x90] sm:$0xff] }
  0x85   :  { %6895 = vmatpush1.bf16.msra.mxu0 %v6894_v20  ;;  %6925 = vmatprep.subr.bf16.mxu1 %v6924_v22  ;;  %v6928_v31 = vpack.c.bf16 %v245_v30, %v242_v28  ;;  %v6900_v34 = vpack.c.bf16 %v250_v33, %v247_v32  ;;  %v249_v36 = vld [vmem:[#allocation3 + $0xa8] sm:$0xff]  ;;  %v248_v37 = vld [vmem:[#allocation3 + $0xa0] sm:$0xff]  ;;  %v251_v39 = vld [vmem:[#allocation3 + $0xb8] sm:$0xff] }
  0x86   :  { %6897 = vmatprep.subr.bf16.mxu0 %v6896_v25  ;;  %v6902_v38 = vpack.c.bf16 %v249_v36, %v246_v35  ;;  %v6932_v40 = vpack.c.bf16 %v251_v39, %v248_v37  ;;  %v253_v41 = vld [vmem:[#allocation3 + $0xc8] sm:$0xff]  ;;  %v256_v42 = vld [vmem:[#allocation3 + $0xe0] sm:$0xff]  ;;  %v255_v45 = vld [vmem:[#allocation3 + $0xd8] sm:$0xff] }
  0x87   :  { %6927 = vmatpush3.bf16.msra.mxu1 %v6924_v22  ;;  %v6904_v43 = vpack.c.bf16 %v256_v42, %v253_v41  ;;  %v252_v44 = vld [vmem:[#allocation3 + $0xc0] sm:$0xff]  ;;  %v254_v46 = vld [vmem:[#allocation3 + $0xd0] sm:$0xff]  ;;  %v257_v48 = vld [vmem:[#allocation3 + $0xe8] sm:$0xff] }
  0x88   :  { %196 = vadd.xlane.f32.xlu1 %v193_v4  ;;  %194 = vadd.xlane.f32.xlu0 %v192_v5  ;;  %v6906_v47 = vpack.c.bf16 %v255_v45, %v252_v44  ;;  %v259_v49 = vld [vmem:[#allocation3 + $0xf8] sm:$0xff]  ;;  %v262_v50 = vld [vmem:[#allocation3 + $0x110] sm:$0xff]  ;;  %v6936_v51 = vpack.c.bf16 %v257_v48, %v254_v46  ;;  %v261_v54 = vld [vmem:[#allocation3 + $0x108] sm:$0xff] }
  0x89   :  { %6899 = vmatpush1.bf16.msra.mxu0 %v6898_v29  ;;  %6929 = vmatprep.subr.bf16.mxu1 %v6928_v31  ;;  %v6908_v52 = vpack.c.bf16 %v262_v50, %v259_v49  ;;  %v258_v53 = vld [vmem:[#allocation3 + $0xf0] sm:$0xff]  ;;  %v260_v55 = vld [vmem:[#allocation3 + $0x100] sm:$0xff]  ;;  %v263_v58 = vld [vmem:[#allocation3 + $0x118] sm:$0xff] }
  0x8a   :  { %6901 = vmatprep.subr.bf16.mxu0 %v6900_v34  ;;  %v6910_v57 = vpack.c.bf16 %v261_v54, %v258_v53  ;;  %v265_v59 = vld [vmem:[#allocation3 + $0x128] sm:$0xff]  ;;  %v268_v60 = vld [vmem:[#allocation3 + $0x140] sm:$0xff]  ;;  %v6940_v61 = vpack.c.bf16 %v263_v58, %v260_v55  ;;  %v267_v0 = vld [vmem:[#allocation3 + $0x138] sm:$0xff] }
  0x8b   :  { %6931 = vmatpush3.bf16.msra.mxu1 %v6928_v31  ;;  %v6912_v62 = vpack.c.bf16 %v268_v60, %v265_v59  ;;  %v264_v63 = vld [vmem:[#allocation3 + $0x120] sm:$0xff]  ;;  %v266_v3 = vld [vmem:[#allocation3 + $0x130] sm:$0xff]  ;;  %v269_v4 = vld [vmem:[#allocation3 + $0x148] sm:$0xff] }
  0x8c   :  { %6933 = vmatprep.subr.bf16.mxu1 %v6932_v40  ;;  %v271_v5 = vld [vmem:[#allocation3 + $0x158] sm:$0xff]  ;;  %v274_v6 = vld [vmem:[#allocation3 + $0x170] sm:$0xff]  ;;  %v6944_v7 = vpack.c.bf16 %v269_v4, %v266_v3  ;;  %v6914_v8 = vpack.c.bf16 %v267_v0, %v264_v63  ;;  %v272_v9 = vld [vmem:[#allocation3 + $0x160] sm:$0xff] }
  0x8d   :  { %6903 = vmatpush1.bf16.msra.mxu0 %v6902_v38  ;;  %v275_v10 = vld [vmem:[#allocation3 + $0x178] sm:$0xff]  ;;  %v6916_v11 = vpack.c.bf16 %v274_v6, %v271_v5  ;;  %v270_v12 = vld [vmem:[#allocation3 + $0x150] sm:$0xff]  ;;  %v273_v13 = vld [vmem:[#allocation3 + $0x168] sm:$0xff] }
  0x8e   :  { %6905 = vmatprep.subr.bf16.mxu0 %v6904_v43  ;;  %v6948_v14 = vpack.c.bf16 %v275_v10, %v272_v9  ;;  %v6918_v15 = vpack.c.bf16 %v273_v13, %v270_v12  ;;  %v6151_v33 = vld [vmem:[%s9613_s0] ss:$0 sm:$0xff] }
  0x8f   :  { %6935 = vmatpush3.bf16.msra.mxu1 %v6932_v40  ;;  %v6152_v36 = vld [vmem:[%s9614_s10] ss:$0 sm:$0xff] }
  0x90   :  { %6937 = vmatprep.subr.bf16.mxu1 %v6936_v51  ;;  %v276_v43 = vld [vmem:[%s9615_s3] sm:$0x7] }
  0x91   :  { %6907 = vmatpush1.bf16.msra.mxu0 %v6906_v47  ;;  %v156_v0 = vld [vmem:[%s9616_s2] sm:$0x3] }
  0x92   :  { %6909 = vmatprep.subr.bf16.mxu0 %v6908_v52  ;;  %v157_v3 = vsub.f32 1.0, %v156_v0 }
  0x93   :  { %6939 = vmatpush3.bf16.msra.mxu1 %v6936_v51 }
  0x94   :  { %6941 = vmatprep.subr.bf16.mxu1 %v6940_v61  ;;  %v158_v5 = vmul.f32 -1e+09, %v157_v3 }
  0x95   :  { %6911 = vmatpush1.bf16.msra.mxu0 %v6910_v57 }
  0x96   :  { %6913 = vmatprep.subr.bf16.mxu0 %v6912_v62  ;;  %v8165_v62 = vmov 1966171168  }
  0x97   :  { %6943 = vmatpush3.bf16.msra.mxu1 %v6940_v61  ;;  %v161_v63 = vunpack.c.l.s4 %v8165_v62 }
  0x98   :  { %6945 = vmatprep.subr.bf16.mxu1 %v6944_v7 }
  0x99   :  { %6915 = vmatpush1.bf16.msra.mxu0 %v6914_v8  ;;  %v162_v4 = vunpack.c.0.s8 %v161_v63 }
  0x9a   :  { %6917 = vmatprep.subr.bf16.mxu0 %v6916_v11 }
  0x9b   :  { %6947 = vmatpush3.bf16.msra.mxu1 %v6944_v7 }
  0x9c   :  { %6949 = vmatprep.subr.bf16.mxu1 %v6948_v14 }
  0x9d   :  { %6919 = vmatpush1.bf16.msra.mxu0 %v6918_v15 }
  0x9e   :  { %6496 = vmatprep.subr.mxu0 %v9600_v56 }
  0x9f   :  { %6951 = vmatpush3.bf16.msra.mxu1 %v6948_v14 }
  0xa0   :  { %6506 = vmatprep.subr.mxu1 %v9600_v56 }
 0x111   :  { %v189_v16 = vpop.xlane.xlu1 %188  ;;  %v187_v17 = vpop.xlane.xlu0 %186 }
 0x112   :  { %v191_v18 = vmul.f32 0.03125, %v189_v16  ;;  %v190_v19 = vmul.f32 0.03125, %v187_v17 }
 0x114   :  { %v201_v20 = vmul.f32 %v191_v18, %v191_v18  ;;  %v200_v23 = vmul.f32 %v190_v19, %v190_v19  ;;  %v205_v30 = vsub.f32 %v8375_v1, %v191_v18  ;;  %v204_v32 = vsub.f32 %v8380_v2, %v190_v19 }
 0x115   :  { %v197_v21 = vpop.xlane.xlu1 %196  ;;  %v195_v22 = vpop.xlane.xlu0 %194  ;;  %v163_v1 = vlaneseq }
 0x116   :  { %v199_v24 = vmul.f32 0.03125, %v197_v21  ;;  %v198_v25 = vmul.f32 0.03125, %v195_v22 }
 0x117   :  { %v8412_v2 = vshrl.u32 %v163_v1, 7 }
 0x118   :  { %v203_v26 = vsub.f32 %v199_v24, %v201_v20  ;;  %v202_v27 = vsub.f32 %v198_v25, %v200_v23 }
 0x119   :  { %v8415_v42 = vsub.s32 1, %v8412_v2  ;;  %v8421_v44 = vsub.s32 2, %v8412_v2  ;;  %v8424_v45 = vsub.s32 0, %v8412_v2  ;;  %v165_v6 = vsub.s32 %v162_v4, %v8412_v2 }
 0x11a   :  { %v207_v28 = vadd.f32 1e-12, %v203_v26  ;;  %v206_v29 = vadd.f32 1e-12, %v202_v27 }
 0x11b   :  { %v285_v46 = vrot.slane %v276_v43, %v8415_v42  ;;  %v289_v47 = vrot.slane %v276_v43, %v8421_v44  ;;  %v281_v49 = vrot.slane %v276_v43, %v8424_v45  ;;  %v166_v7 = vrot.slane %v158_v5, %v165_v6 }
 0x11c   :  { %7787 = vrsqrt.f32 %v207_v28 }
 0x11d   :  { %7789 = vrsqrt.f32 %v206_v29  ;;  %v167_v8 = vcombine.high %v166_v7, %v166_v7  ;;  %v174_v9 = vrot.slane %v166_v7, %v165_v6 }
 0x11f   :  { %v181_v10 = vrot.slane %v167_v8, %v165_v6  ;;  %v8464_v11 = vrot.slane %v174_v9, %v8424_v45 }
 0x121   :  { %v8467_v15 = vrot.slane %v181_v10, %v8424_v45 }
 0x126   :  { %v7788_v31 = vpop.eup %7787 }
 0x127   :  { %v7790_v34 = vpop.eup %7789  ;;  %v211_v35 = vmul.f32 %v7788_v31, %v205_v30 }
 0x128   :  { %v210_v37 = vmul.f32 %v7790_v34, %v204_v32 }
 0x129   :  { %v219_v38 = vmul.f32 %v6151_v33, %v211_v35 }
 0x12a   :  { %v218_v39 = vmul.f32 %v6151_v33, %v210_v37 }
 0x12b   :  { %v8399_v40 = vadd.f32 %v6152_v36, %v219_v38 }
 0x12c   :  { %v8401_v41 = vadd.f32 %v6152_v36, %v218_v39 }
 0x12e   :  { %358 = vmatmul.mubr.f32.vlgmr.msra.gmra.mrb[0].mxu0 %v8401_v41  ;;  %6493 = vmatprep.mubr.f32.mxu1 %v8401_v41 }
 0x12f   :  { %6494 = vmatmul.mubr.f32.vlgmr.msra.gmra.mrb[0].mxu1 %v8399_v40  ;;  %363 = vmatprep.mubr.f32.mxu0 %v9600_v56 }
 0x130   :  { %6508 = vmatprep.mubr.msk.f32.mxu1 %vm8164_vm0, %v9600_v56 }
 0x132   :  { %364 = vmatmul.mubr.f32.gmra.mrb[2].mxu0 %v8399_v40 }
 0x133   :  { %6498 = vmatprep.mubr.msk.f32.mxu0 %vm8164_vm0, %v9600_v56 }
 0x201   :  { %v359_v48 = vpop.f32.mrb[0].mxu0 }
 0x202   :  { %v361_v50 = vpop.f32.mrb[1].mxu0  ;;  %v6495_v51 = vpop.f32.mrb[0].mxu1  ;;  %v8435_v57 = vadd.f32 %v359_v48, %v281_v49 }
 0x203   :  { %v8429_v52 = vadd.f32 %v361_v50, %v285_v46  ;;  %v436_v53 = vpop.f32.mrb[1].mxu1  ;;  %v8451_v61 = vadd.f32 %v6495_v51, %v289_v47 }
 0x204   :  { %v8431_v54 = vadd.f32 %v436_v53, %v289_v47 }
 0x205   :  { %v365_v55 = vpop.f32.mrb[2].mxu0  ;;  %6497 = vmatpush3.xpose.msk.msra.mxu0 %vm445_vm1, %v8429_v52 }
 0x206   :  { %v367_v58 = vpop.f32.mrb[3].mxu0  ;;  %6507 = vmatpush3.msra.mxu1 %v8431_v54  ;;  %6501 = vmatprep.subr.mxu0 %v9600_v56  ;;  %v8448_v60 = vadd.f32 %v365_v55, %v281_v49 }
 0x207   :  { %v8439_v59 = vadd.f32 %v367_v58, %v285_v46  ;;  %6516 = vmatprep.subr.mxu1 %v9600_v56 }
 0x208   :  { %6499 = vmatmul.mubr.msk.f32.vlgmr.msra.gmra.mrb[4].mxu0 %vm445_vm1, %v8435_v57 }
 0x209   :  { %6502 = vmatpush3.xpose.msk.msra.mxu0 %vm445_vm1, %v8439_v59  ;;  %6503 = vmatprep.mubr.msk.f32.mxu0 %vm8164_vm0, %v9600_v56 }
 0x20a   :  { %6511 = vmatprep.subr.mxu0 %v9600_v56 }
 0x20c   :  { %6504 = vmatmul.mubr.msk.f32.vlgmr.msra.gmra.mrb[6].mxu0 %vm445_vm1, %v8448_v60 }
 0x20d   :  { %6512 = vmatpush3.msra.mxu0 %v8451_v61  ;;  %6513 = vmatprep.mubr.msk.f32.mxu0 %vm8164_vm0, %v9600_v56 }
 0x20e   :  { %6521 = vmatprep.subr.mxu0 %v9600_v56 }
 0x2db   :  { %v518_v12 = vpop.f32.mrb[4].mxu0 }
 0x2dc   :  { %v598_v13 = vmul.f32 0.35355338, %v518_v12  ;;  %v6500_v14 = vpop.f32.mrb[5].mxu0 }
 0x2de   :  { %v610_v16 = vadd.f32 %v8464_v11, %v598_v13 }
 0x2df   :  { %v594_v17 = vpop.f32.mrb[6].mxu0 }
 0x2e0   :  { %v599_v18 = vmul.f32 0.35355338, %v594_v17  ;;  %v6505_v19 = vpop.f32.mrb[7].mxu0  ;;  %v612_v20 = vsel %vm445_vm1, %v610_v16, -inf }
 0x2e1   :  { %613 = vmax.xlane.f32.xlu0 %v612_v20 }
 0x2e2   :  { %v611_v21 = vadd.f32 %v8467_v15, %v599_v18 }
 0x2e4   :  { %v615_v22 = vsel %vm445_vm1, %v611_v21, -inf }
 0x2e5   :  { %616 = vmax.xlane.f32.xlu1 %v615_v22 }
 0x2f6   :  { %860 = vrot.lane.b32.xlu1 %v8439_v59, %s8166_s18 }
 0x2fa   :  { %780 = vrot.lane.b32.xlu1 %v8435_v57, %s8166_s18 }
 0x36e   :  { %v614_v23 = vpop.xlane.xlu0 %613 }
 0x36f   :  { %v618_v24 = vsub.f32 %v610_v16, %v614_v23 }
 0x371   :  { %v620_v25 = vmul.f32 1.442695, %v618_v24 }
 0x372   :  { %v617_v26 = vpop.xlane.xlu1 %616 }
 0x373   :  { %7791 = vpow2.f32 %v620_v25  ;;  %v619_v27 = vsub.f32 %v611_v21, %v617_v26 }
 0x375   :  { %v622_v28 = vmul.f32 1.442695, %v619_v27 }
 0x376   :  { %v861_v33 = vpop.permute.xlu1 %860 }
 0x377   :  { %7793 = vpow2.f32 %v622_v28 }
 0x37a   :  { %v781_v34 = vpop.permute.xlu1 %780 }
 0x37d   :  { %v7792_v29 = vpop.eup %7791 }
 0x37e   :  { %v624_v30 = vsel %vm445_vm1, %v7792_v29, 0.0 }
 0x37f   :  { %625 = vadd.xlane.f32.xlu0 %v624_v30 }
 0x381   :  { %v7794_v31 = vpop.eup %7793 }
 0x382   :  { %v627_v32 = vsel %vm445_vm1, %v7794_v31, 0.0 }
 0x383   :  { %628 = vadd.xlane.f32.xlu1 %v627_v32 }
 0x394   :  { %858 = vrot.lane.b32.xlu1 %v8448_v60, %s8166_s18 }
 0x395   :  { %782 = vrot.lane.b32.xlu0 %v8429_v52, %s8166_s18 }
 0x40c   :  { %v626_v35 = vpop.xlane.xlu0 %625 }
 0x40d   :  { %7795 = vrcp.f32 %v626_v35 }
 0x410   :  { %v629_v36 = vpop.xlane.xlu1 %628  ;;  %v783_v39 = vpop.permute.xlu0 %782 }
 0x411   :  { %7797 = vrcp.f32 %v629_v36 }
 0x414   :  { %v859_v46 = vpop.permute.xlu1 %858 }
 0x417   :  { %v7796_v37 = vpop.eup %7795 }
 0x418   :  { %v632_v38 = vmul.f32 %v7796_v37, %v7792_v29 }
 0x41a   :  { %6509 = vmatmul.mubr.msk.f32.vlgmr.msra.gmra.mrb[2].mxu1 %vm445_vm1, %v632_v38 }
 0x41b   :  { %v7798_v1 = vpop.eup %7797  ;;  %6517 = vmatpush3.xpose.msk.msra.mxu1 %vm445_vm1, %v783_v39  ;;  %6518 = vmatprep.mubr.msk.f32.mxu1 %vm8164_vm0, %v9600_v56 }
 0x41c   :  { %v633_v43 = vmul.f32 %v7798_v1, %v7794_v31  ;;  %6526 = vmatprep.subr.mxu1 %v9600_v56 }
 0x41e   :  { %6514 = vmatmul.mubr.msk.f32.vlgmr.msra.gmra.mrb[8].mxu0 %vm445_vm1, %v633_v43  ;;  %6519 = vmatmul.mubr.msk.f32.vlgmr.msra.gmra.mrb[4].mxu1 %vm445_vm1, %v781_v34 }
 0x41f   :  { %6522 = vmatpush3.xpose.msk.msra.mxu0 %vm445_vm1, %v861_v33  ;;  %6523 = vmatprep.mubr.msk.f32.mxu0 %vm8164_vm0, %v9600_v56 }
 0x420   :  { %6531 = vmatprep.subr.mxu0 %v9600_v56  ;;  %6528 = vmatprep.mubr.msk.f32.mxu1 %vm8164_vm0, %v9600_v56 }
 0x422   :  { %6524 = vmatmul.mubr.msk.f32.vlgmr.msra.gmra.mrb[10].mxu0 %vm445_vm1, %v859_v46 }
 0x423   :  { %6533 = vmatprep.mubr.msk.f32.mxu0 %vm8164_vm0, %v9600_v56 }
 0x4ed   :  { %v8499_v47 = vpop.f32.mrb[2].mxu1 }
 0x4ee   :  { %v6510_v48 = vpop.f32.mrb[3].mxu1 }
 0x4f1   :  { %v8501_v49 = vpop.f32.mrb[8].mxu0  ;;  %v854_v50 = vpop.f32.mrb[4].mxu1 }
 0x4f2   :  { %v936_v51 = vmul.f32 0.35355338, %v854_v50  ;;  %v6515_v53 = vpop.f32.mrb[9].mxu0  ;;  %v6520_v55 = vpop.f32.mrb[5].mxu1 }
 0x4f4   :  { %v938_v58 = vadd.f32 %v936_v51, %v8464_v11 }
 0x4f5   :  { %v932_v62 = vpop.f32.mrb[10].mxu0 }
 0x4f6   :  { %v937_v63 = vmul.f32 0.35355338, %v932_v62  ;;  %v6525_v0 = vpop.f32.mrb[11].mxu0  ;;  %v940_v3 = vsel %vm445_vm1, %v938_v58, -inf }
 0x4f7   :  { %941 = vmax.xlane.f32.xlu0 %v940_v3 }
 0x4f8   :  { %v939_v4 = vadd.f32 %v937_v63, %v8467_v15 }
 0x4fa   :  { %v943_v5 = vsel %vm445_vm1, %v939_v4, -inf }
 0x4fb   :  { %944 = vmax.xlane.f32.xlu1 %v943_v5 }
 0x50c   :  { %1040 = vrot.lane.b32.xlu1 %v8451_v61, %s8166_s18 }
 0x50d   :  { %963 = vrot.lane.b32.xlu0 %v8431_v54, %s8166_s18 }
 0x510   :  { %1118 = vrot.lane.b32.xlu1 %v8429_v52, %s8167_s24 }
 0x514   :  { %1196 = vrot.lane.b32.xlu1 %v8439_v59, %s8167_s24 }
 0x518   :  { %1194 = vrot.lane.b32.xlu1 %v8448_v60, %s8167_s24 }
 0x584   :  { %v942_v6 = vpop.xlane.xlu0 %941 }
 0x585   :  { %v946_v7 = vsub.f32 %v938_v58, %v942_v6 }
 0x587   :  { %v948_v8 = vmul.f32 1.442695, %v946_v7 }
 0x588   :  { %v964_v9 = vpop.permute.xlu0 %963  ;;  %v945_v10 = vpop.xlane.xlu1 %944 }
 0x589   :  { %7799 = vpow2.f32 %v948_v8  ;;  %v947_v12 = vsub.f32 %v939_v4, %v945_v10  ;;  %6527 = vmatpush3.msra.mxu1 %v964_v9 }
 0x58a   :  { %6536 = vmatprep.subr.mxu1 %v9600_v56 }
 0x58b   :  { %v950_v13 = vmul.f32 1.442695, %v947_v12 }
 0x58c   :  { %v1041_v14 = vpop.permute.xlu1 %1040 }
 0x58d   :  { %7801 = vpow2.f32 %v950_v13  ;;  %6532 = vmatpush3.msra.mxu0 %v1041_v14 }
 0x58e   :  { %6541 = vmatprep.subr.mxu0 %v9600_v56 }
 0x590   :  { %v1119_v22 = vpop.permute.xlu1 %1118 }
 0x593   :  { %v7800_v16 = vpop.eup %7799 }
 0x594   :  { %v952_v17 = vsel %vm445_vm1, %v7800_v16, 0.0  ;;  %v1197_v26 = vpop.permute.xlu1 %1196 }
 0x595   :  { %953 = vadd.xlane.f32.xlu0 %v952_v17 }
 0x597   :  { %v7802_v18 = vpop.eup %7801 }
 0x598   :  { %v955_v19 = vsel %vm445_vm1, %v7802_v18, 0.0  ;;  %v1195_v29 = vpop.permute.xlu1 %1194 }
 0x599   :  { %956 = vadd.xlane.f32.xlu0 %v955_v19 }
 0x5af   :  { %1116 = vrot.lane.b32.xlu0 %v8435_v57, %s8167_s24 }
 0x622   :  { %v954_v20 = vpop.xlane.xlu0 %953 }
 0x623   :  { %7803 = vrcp.f32 %v954_v20 }
 0x626   :  { %v957_v21 = vpop.xlane.xlu0 %956 }
 0x627   :  { %7805 = vrcp.f32 %v957_v21 }
 0x62a   :  { %v1117_v28 = vpop.permute.xlu0 %1116 }
 0x62d   :  { %v7804_v23 = vpop.eup %7803 }
 0x62e   :  { %v960_v24 = vmul.f32 %v7804_v23, %v7800_v16 }
 0x630   :  { %6529 = vmatmul.mubr.msk.f32.vlgmr.msra.gmra.mrb[6].mxu1 %vm445_vm1, %v960_v24 }
 0x631   :  { %v7806_v25 = vpop.eup %7805  ;;  %6537 = vmatpush3.xpose.msk.msra.mxu1 %vm445_vm1, %v1119_v22  ;;  %6538 = vmatprep.mubr.msk.f32.mxu1 %vm8164_vm0, %v9600_v56 }
 0x632   :  { %v961_v27 = vmul.f32 %v7806_v25, %v7802_v18  ;;  %6546 = vmatprep.subr.mxu1 %v9600_v56 }
 0x634   :  { %6534 = vmatmul.mubr.msk.f32.vlgmr.msra.gmra.mrb[12].mxu0 %vm445_vm1, %v961_v27  ;;  %6539 = vmatmul.mubr.msk.f32.vlgmr.msra.gmra.mrb[8].mxu1 %vm445_vm1, %v1117_v28 }
 0x635   :  { %6542 = vmatpush3.xpose.msk.msra.mxu0 %vm445_vm1, %v1197_v26  ;;  %6543 = vmatprep.mubr.msk.f32.mxu0 %vm8164_vm0, %v9600_v56 }
 0x636   :  { %6551 = vmatprep.subr.mxu0 %v9600_v56  ;;  %6548 = vmatprep.mubr.msk.f32.mxu1 %vm8164_vm0, %v9600_v56 }
 0x638   :  { %6544 = vmatmul.mubr.msk.f32.vlgmr.msra.gmra.mrb[14].mxu0 %vm445_vm1, %v1195_v29 }
 0x639   :  { %6553 = vmatprep.mubr.msk.f32.mxu0 %vm8164_vm0, %v9600_v56 }
 0x703   :  { %v8539_v30 = vpop.f32.mrb[6].mxu1 }
 0x704   :  { %v6530_v31 = vpop.f32.mrb[7].mxu1 }
 0x707   :  { %v8541_v32 = vpop.f32.mrb[12].mxu0  ;;  %v1190_v33 = vpop.f32.mrb[8].mxu1 }
 0x708   :  { %v1272_v34 = vmul.f32 0.35355338, %v1190_v33  ;;  %v6535_v35 = vpop.f32.mrb[13].mxu0  ;;  %v6540_v36 = vpop.f32.mrb[9].mxu1 }
 0x70a   :  { %v1274_v37 = vadd.f32 %v1272_v34, %v8464_v11 }
 0x70b   :  { %v1268_v38 = vpop.f32.mrb[14].mxu0 }
 0x70c   :  { %v1273_v39 = vmul.f32 0.35355338, %v1268_v38  ;;  %v6545_v1 = vpop.f32.mrb[15].mxu0  ;;  %v1276_v43 = vsel %vm445_vm1, %v1274_v37, -inf }
 0x70d   :  { %1277 = vmax.xlane.f32.xlu0 %v1276_v43 }
 0x70e   :  { %v1275_v46 = vadd.f32 %v1273_v39, %v8467_v15 }
 0x710   :  { %v1279_v48 = vsel %vm445_vm1, %v1275_v46, -inf }
 0x711   :  { %1280 = vmax.xlane.f32.xlu1 %v1279_v48 }
 0x722   :  { %1374 = vrot.lane.b32.xlu1 %v8451_v61, %s8167_s24 }
 0x723   :  { %1298 = vrot.lane.b32.xlu0 %v8431_v54, %s8167_s24 }
 0x726   :  { %1452 = vrot.lane.b32.xlu1 %v8429_v52, %s8168_s6 }
 0x72a   :  { %1530 = vrot.lane.b32.xlu1 %v8439_v59, %s8168_s6 }
 0x72e   :  { %1528 = vrot.lane.b32.xlu1 %v8448_v60, %s8168_s6 }
 0x79a   :  { %v1278_v50 = vpop.xlane.xlu0 %1277 }
 0x79b   :  { %v1282_v51 = vsub.f32 %v1274_v37, %v1278_v50 }
 0x79d   :  { %v1284_v53 = vmul.f32 1.442695, %v1282_v51 }
 0x79e   :  { %v1299_v55 = vpop.permute.xlu0 %1298  ;;  %v1281_v58 = vpop.xlane.xlu1 %1280 }
 0x79f   :  { %7807 = vpow2.f32 %v1284_v53  ;;  %v1283_v62 = vsub.f32 %v1275_v46, %v1281_v58  ;;  %6547 = vmatpush3.msra.mxu1 %v1299_v55  ;;  %v1817_v53 = vld [vmem:[%s9617_s5 + $0x8] sm:$0xff]  ;;  %v1818_v58 = vld [vmem:[%s9617_s5 + $0x10] sm:$0xff] }
 0x7a0   :  { %6556 = vmatprep.subr.mxu1 %v9600_v56 }
 0x7a1   :  { %v1286_v63 = vmul.f32 1.442695, %v1283_v62  ;;  %v1819_v62 = vld [vmem:[%s9617_s5 + $0x18] sm:$0xff] }
 0x7a2   :  { %v1375_v0 = vpop.permute.xlu1 %1374 }
 0x7a3   :  { %7809 = vpow2.f32 %v1286_v63  ;;  %6552 = vmatpush3.msra.mxu0 %v1375_v0  ;;  %v6956_v63 = vpack.c.bf16 %v1819_v62, %v1818_v58 }
 0x7a4   :  { %6561 = vmatprep.subr.mxu0 %v9600_v56 }
 0x7a6   :  { %v1453_v6 = vpop.permute.xlu1 %1452 }
 0x7a9   :  { %v7808_v52 = vpop.eup %7807 }
 0x7aa   :  { %v1288_v59 = vsel %vm445_vm1, %v7808_v52, 0.0  ;;  %v1531_v10 = vpop.permute.xlu1 %1530 }
 0x7ab   :  { %1289 = vadd.xlane.f32.xlu0 %v1288_v59 }
 0x7ad   :  { %v7810_v60 = vpop.eup %7809 }
 0x7ae   :  { %v1291_v3 = vsel %vm445_vm1, %v7810_v60, 0.0  ;;  %v1529_v13 = vpop.permute.xlu1 %1528 }
 0x7af   :  { %1292 = vadd.xlane.f32.xlu0 %v1291_v3 }
 0x7c5   :  { %1450 = vrot.lane.b32.xlu0 %v8435_v57, %s8168_s6 }
 0x838   :  { %v1290_v4 = vpop.xlane.xlu0 %1289 }
 0x839   :  { %7811 = vrcp.f32 %v1290_v4 }
 0x83c   :  { %v1293_v5 = vpop.xlane.xlu0 %1292 }
 0x83d   :  { %7813 = vrcp.f32 %v1293_v5 }
 0x840   :  { %v1451_v57 = vpop.permute.xlu0 %1450 }
 0x843   :  { %v7812_v7 = vpop.eup %7811 }
 0x844   :  { %v1296_v8 = vmul.f32 %v7812_v7, %v7808_v52 }
 0x846   :  { %6549 = vmatmul.mubr.msk.f32.vlgmr.msra.gmra.mrb[10].mxu1 %vm445_vm1, %v1296_v8 }
 0x847   :  { %v7814_v9 = vpop.eup %7813  ;;  %6557 = vmatpush3.xpose.msk.msra.mxu1 %vm445_vm1, %v1453_v6  ;;  %6558 = vmatprep.mubr.msk.f32.mxu1 %vm8164_vm0, %v9600_v56 }
 0x848   :  { %v1297_v12 = vmul.f32 %v7814_v9, %v7810_v60  ;;  %6566 = vmatprep.subr.mxu1 %v9600_v56 }
 0x84a   :  { %6554 = vmatmul.mubr.msk.f32.vlgmr.msra.gmra.mrb[16].mxu0 %vm445_vm1, %v1297_v12  ;;  %6559 = vmatmul.mubr.msk.f32.vlgmr.msra.gmra.mrb[12].mxu1 %vm445_vm1, %v1451_v57 }
 0x84b   :  { %6562 = vmatpush3.xpose.msk.msra.mxu0 %vm445_vm1, %v1531_v10  ;;  %6563 = vmatprep.mubr.msk.f32.mxu0 %vm8164_vm0, %v9600_v56 }
 0x84c   :  { %6571 = vmatprep.subr.mxu0 %v9600_v56  ;;  %6568 = vmatprep.mubr.msk.f32.mxu1 %vm8164_vm0, %v9600_v56 }
 0x84e   :  { %6564 = vmatmul.mubr.msk.f32.vlgmr.msra.gmra.mrb[18].mxu0 %vm445_vm1, %v1529_v13 }
 0x84f   :  { %6573 = vmatprep.mubr.msk.f32.mxu0 %vm8164_vm0, %v9600_v56 }
 0x919   :  { %v1370_v14 = vpop.f32.mrb[10].mxu1 }
 0x91a   :  { %v6550_v16 = vpop.f32.mrb[11].mxu1 }
 0x91d   :  { %v1446_v17 = vpop.f32.mrb[16].mxu0  ;;  %v1524_v18 = vpop.f32.mrb[12].mxu1 }
 0x91e   :  { %v1606_v19 = vmul.f32 0.35355338, %v1524_v18  ;;  %v6555_v20 = vpop.f32.mrb[17].mxu0  ;;  %v6560_v21 = vpop.f32.mrb[13].mxu1 }
 0x920   :  { %v1608_v22 = vadd.f32 %v1606_v19, %v8464_v11 }
 0x921   :  { %v1602_v23 = vpop.f32.mrb[18].mxu0 }
 0x922   :  { %v1607_v24 = vmul.f32 0.35355338, %v1602_v23  ;;  %v6565_v25 = vpop.f32.mrb[19].mxu0  ;;  %v1610_v26 = vsel %vm445_vm1, %v1608_v22, -inf  ;;  %v1955_v23 = vld [vmem:[#allocation5] sm:$0xff] }
 0x923   :  { %1611 = vmax.xlane.f32.xlu0 %v1610_v26 }
 0x924   :  { %v1609_v27 = vadd.f32 %v1607_v24, %v8467_v15  ;;  %v1956_v24 = vld [vmem:[#allocation5 + $0x8] sm:$0xff] }
 0x925   :  { %v6960_v25 = vpack.c.bf16 %v1956_v24, %v1955_v23  ;;  %v2076_v23 = vld [vmem:[#allocation7 + $0x28] sm:$0xff] }
 0x926   :  { %v1613_v28 = vsel %vm445_vm1, %v1609_v27, -inf }
 0x927   :  { %1614 = vmax.xlane.f32.xlu1 %v1613_v28  ;;  %v1960_v28 = vld [vmem:[#allocation5 + $0x28] sm:$0xff] }
 0x938   :  { %1708 = vrot.lane.b32.xlu1 %v8451_v61, %s8168_s6 }
 0x93c   :  { %1786 = vrot.lane.b32.xlu1 %v8539_v30, %s8153_s29 }
 0x940   :  { %1788 = vrot.lane.b32.xlu1 %v8541_v32, %s8153_s29 }
 0x944   :  { %1796 = vrot.lane.b32.xlu1 %v1446_v17, %s8169_s27 }
 0x9b0   :  { %v1612_v29 = vpop.xlane.xlu0 %1611 }
 0x9b1   :  { %v1616_v31 = vsub.f32 %v1608_v22, %v1612_v29 }
 0x9b3   :  { %v1618_v33 = vmul.f32 1.442695, %v1616_v31  ;;  %v1961_v31 = vld [vmem:[#allocation5 + $0x30] sm:$0xff] }
 0x9b4   :  { %v1615_v34 = vpop.xlane.xlu1 %1614 }
 0x9b5   :  { %7815 = vpow2.f32 %v1618_v33  ;;  %v1617_v35 = vsub.f32 %v1609_v27, %v1615_v34  ;;  %v1959_v27 = vld [vmem:[#allocation5 + $0x20] sm:$0xff]  ;;  %v1962_v33 = vld [vmem:[#allocation5 + $0x38] sm:$0xff] }
 0x9b6   :  { %v6968_v29 = vpack.c.bf16 %v1960_v28, %v1959_v27  ;;  %v6972_v34 = vpack.c.bf16 %v1962_v33, %v1961_v31  ;;  %v2080_v27 = vld [vmem:[#allocation7 + $0x48] sm:$0xff]  ;;  %v2082_v31 = vld [vmem:[#allocation7 + $0x58] sm:$0xff] }
 0x9b7   :  { %v1620_v36 = vmul.f32 1.442695, %v1617_v35  ;;  %v1963_v35 = vld [vmem:[#allocation5 + $0x40] sm:$0xff] }
 0x9b8   :  { %v1709_v37 = vpop.permute.xlu1 %1708 }
 0x9b9   :  { %7817 = vpow2.f32 %v1620_v36  ;;  %6572 = vmatpush3.msra.mxu0 %v1709_v37  ;;  %v1964_v36 = vld [vmem:[#allocation5 + $0x48] sm:$0xff] }
 0x9ba   :  { %v6976_v37 = vpack.c.bf16 %v1964_v36, %v1963_v35  ;;  %v2084_v35 = vld [vmem:[#allocation7 + $0x68] sm:$0xff] }
 0x9bc   :  { %v1787_v3 = vpop.permute.xlu1 %1786 }
 0x9bd   :  { %v1808_v6 = vsel %vm445_vm1, %v8499_v47, %v1787_v3  ;;  %v6177_v47 = vld [vmem:[%s9618_s4] ss:$0 sm:$0xff] }
 0x9bf   :  { %v7816_v61 = vpop.eup %7815 }
 0x9c0   :  { %v1622_v38 = vsel %vm445_vm1, %v7816_v61, 0.0  ;;  %v1789_v4 = vpop.permute.xlu1 %1788 }
 0x9c1   :  { %1623 = vadd.xlane.f32.xlu0 %v1622_v38  ;;  %v1809_v12 = vsel %vm445_vm1, %v8501_v49, %v1789_v4  ;;  %v1966_v38 = vld [vmem:[#allocation5 + $0x58] sm:$0xff] }
 0x9c3   :  { %v7818_v30 = vpop.eup %7817 }
 0x9c4   :  { %v1625_v32 = vsel %vm445_vm1, %v7818_v30, 0.0  ;;  %v1797_v7 = vpop.permute.xlu1 %1796 }
 0x9c5   :  { %1626 = vadd.xlane.f32.xlu0 %v1625_v32  ;;  %v1812_v57 = vsel %vm1810_vm3, %v1809_v12, %v1797_v7  ;;  %v1967_v32 = vld [vmem:[#allocation5 + $0x60] sm:$0xff] }
 0x9db   :  { %1632 = vrot.lane.b32.xlu0 %v8431_v54, %s8168_s6  ;;  %v1816_v54 = vld [vmem:[%s9617_s5] sm:$0xff] }
 0x9dc   :  { %v6952_v55 = vpack.c.bf16 %v1817_v53, %v1816_v54 }
 0x9de   :  { %6953 = vmatprep.subr.bf16.mxu0 %v6952_v55 }
 0x9df   :  { %1794 = vrot.lane.b32.xlu0 %v1370_v14, %s8169_s27 }
 0xa4e   :  { %v1624_v39 = vpop.xlane.xlu0 %1623 }
 0xa4f   :  { %7819 = vrcp.f32 %v1624_v39  ;;  %v1968_v39 = vld [vmem:[#allocation5 + $0x68] sm:$0xff] }
 0xa52   :  { %v1627_v1 = vpop.xlane.xlu0 %1626 }
 0xa53   :  { %7821 = vrcp.f32 %v1627_v1  ;;  %v6984_v1 = vpack.c.bf16 %v1968_v39, %v1967_v32 }
 0xa56   :  { %v1633_v43 = vpop.permute.xlu0 %1632 }
 0xa57   :  { %6567 = vmatpush3.msra.mxu1 %v1633_v43  ;;  %v1969_v43 = vld [vmem:[#allocation5 + $0x70] sm:$0xff] }
 0xa59   :  { %v7820_v46 = vpop.eup %7819 }
 0xa5a   :  { %v1630_v48 = vmul.f32 %v7820_v46, %v7816_v61  ;;  %v1795_v5 = vpop.permute.xlu0 %1794  ;;  %v1965_v61 = vld [vmem:[#allocation5 + $0x50] sm:$0xff]  ;;  %v1970_v46 = vld [vmem:[#allocation5 + $0x78] sm:$0xff] }
 0xa5b   :  { %v1811_v8 = vsel %vm1810_vm3, %v1808_v6, %v1795_v5 }
 0xa5c   :  { %6569 = vmatmul.mubr.msk.f32.vlgmr.msra.gmra.mrb[14].mxu1 %vm445_vm1, %v1630_v48  ;;  %v6988_v48 = vpack.c.bf16 %v1970_v46, %v1969_v43 }
 0xa5d   :  { %v7822_v50 = vpop.eup %7821 }
 0xa5e   :  { %v1631_v51 = vmul.f32 %v7822_v50, %v7818_v30  ;;  %v6980_v30 = vpack.c.bf16 %v1966_v38, %v1965_v61  ;;  %v2071_v50 = vld [vmem:[#allocation7] sm:$0xff]  ;;  %v2086_v61 = vld [vmem:[#allocation7 + $0x78] sm:$0xff] }
 0xa60   :  { %6574 = vmatmul.mubr.msk.f32.vlgmr.msra.gmra.mrb[20].mxu0 %vm445_vm1, %v1631_v51  ;;  %v2072_v51 = vld [vmem:[#allocation7 + $0x8] sm:$0xff] }
 0xa61   :  { %6955 = vmatpush3.bf16.msra.mxu0 %v6952_v55  ;;  %v6992_v54 = vpack.c.bf16 %v2072_v51, %v2071_v50 }
 0xa62   :  { %6957 = vmatprep.subr.bf16.mxu0 %v6956_v63 }
 0xa63   :  { %6993 = vmatprep.subr.bf16.mxu1 %v6992_v54 }
 0xa64   :  { %6995 = vmatpush3.bf16.msra.mxu1 %v6992_v54 }
 0xa65   :  { %6959 = vmatpush3.bf16.msra.mxu0 %v6956_v63 }
 0xa66   :  { %6961 = vmatprep.subr.bf16.mxu0 %v6960_v25 }
 0xb2f   :  { %v1704_v0 = vpop.f32.mrb[14].mxu1 }
 0xb30   :  { %1802 = vrot.lane.b32.xlu0 %v1704_v0, %s8157_s30  ;;  %v6570_v52 = vpop.f32.mrb[15].mxu1 }
 0xb33   :  { %v1780_v59 = vpop.f32.mrb[20].mxu0 }
 0xb34   :  { %1804 = vrot.lane.b32.xlu1 %v1780_v59, %s8157_s30  ;;  %v6575_v60 = vpop.f32.mrb[21].mxu0 }
 0xba2   :  { %v1803_v9 = vpop.permute.xlu0 %1802 }
 0xba3   :  { %v1814_v10 = vsel %vm1813_vm2, %v1811_v8, %v1803_v9 }
 0xba4   :  { %6584 = vmatprep.mubr.msk.f32.mxu0 %vm1827_vm4, %v1814_v10  ;;  %v6180_v10 = vld [vmem:[%s9578_s8] ss:$0 sm:$0xff] }
 0xba6   :  { %v1805_v13 = vpop.permute.xlu1 %1804 }
 0xba7   :  { %v1815_v14 = vsel %vm1813_vm2, %v1812_v57, %v1805_v13  ;;  %v6181_v57 = vld [vmem:[%s9579_s9] ss:$0 sm:$0xff] }
 0xba8   :  { %6585 = vmatmul.mubr.msk.f32.vlgmr.msra.gmra.mrb[22].mxu0 %vm1827_vm4, %v1815_v14 }
 0xba9   :  { %6963 = vmatpush3.bf16.msra.mxu0 %v6960_v25  ;;  %v2077_v25 = vld [vmem:[#allocation7 + $0x30] sm:$0xff] }
 0xc7b   :  { %v6586_v16 = vpop.f32.mrb[22].mxu0 }
 0xc7c   :  { %v1906_v17 = vadd.f32 %v6586_v16, %v6177_v47  ;;  %v1900_v18 = vpop.f32.mrb[23].mxu0 }
 0xc7d   :  { %v1901_v19 = vadd.f32 %v6177_v47, %v1900_v18 }
 0xc7e   :  { %v8625_v20 = vadd.f32 %v1906_v17, %v8399_v40  ;;  %v1957_v40 = vld [vmem:[#allocation5 + $0x10] sm:$0xff] }
 0xc7f   :  { %v8628_v49 = vadd.f32 %v1901_v19, %v8401_v41  ;;  %v1958_v41 = vld [vmem:[#allocation5 + $0x18] sm:$0xff] }
 0xc80   :  { %1915 = vadd.xlane.f32.xlu1 %v8625_v20  ;;  %v1920_v22 = vmul.f32 %v8625_v20, %v8625_v20  ;;  %v6964_v26 = vpack.c.bf16 %v1958_v41, %v1957_v40  ;;  %v2078_v40 = vld [vmem:[#allocation7 + $0x38] sm:$0xff] }
 0xc81   :  { %1913 = vadd.xlane.f32.xlu0 %v8628_v49  ;;  %v1919_v21 = vmul.f32 %v8628_v49, %v8628_v49  ;;  %v7004_v41 = vpack.c.bf16 %v2078_v40, %v2077_v25 }
 0xc82   :  { %6965 = vmatprep.subr.bf16.mxu0 %v6964_v26 }
 0xc83   :  { %6967 = vmatpush3.bf16.msra.mxu0 %v6964_v26  ;;  %v2079_v26 = vld [vmem:[#allocation7 + $0x40] sm:$0xff] }
 0xc84   :  { %6969 = vmatprep.subr.bf16.mxu0 %v6968_v29  ;;  %v7008_v28 = vpack.c.bf16 %v2080_v27, %v2079_v26 }
 0xc85   :  { %1921 = vadd.xlane.f32.xlu0 %v1919_v21  ;;  %v2074_v21 = vld [vmem:[#allocation7 + $0x18] sm:$0xff] }
 0xc87   :  { %6971 = vmatpush3.bf16.msra.mxu0 %v6968_v29  ;;  %v2081_v29 = vld [vmem:[#allocation7 + $0x50] sm:$0xff] }
 0xc88   :  { %6973 = vmatprep.subr.bf16.mxu0 %v6972_v34  ;;  %v7012_v33 = vpack.c.bf16 %v2082_v31, %v2081_v29  ;;  %v2229_v31 = vld [vmem:[#allocation3 + $0x1e8] sm:$0xff] }
 0xc89   :  { %1923 = vadd.xlane.f32.xlu0 %v1920_v22 }
 0xc8b   :  { %6975 = vmatpush3.bf16.msra.mxu0 %v6972_v34  ;;  %v2083_v34 = vld [vmem:[#allocation7 + $0x60] sm:$0xff] }
 0xc8c   :  { %6977 = vmatprep.subr.bf16.mxu0 %v6976_v37  ;;  %v7016_v36 = vpack.c.bf16 %v2084_v35, %v2083_v34  ;;  %v2224_v34 = vld [vmem:[#allocation3 + $0x1c0] sm:$0xff]  ;;  %v2227_v35 = vld [vmem:[#allocation3 + $0x1d8] sm:$0xff] }
 0xc8f   :  { %6979 = vmatpush3.bf16.msra.mxu0 %v6976_v37  ;;  %v2085_v37 = vld [vmem:[#allocation7 + $0x70] sm:$0xff] }
 0xc90   :  { %6981 = vmatprep.subr.bf16.mxu0 %v6980_v30  ;;  %v7020_v38 = vpack.c.bf16 %v2086_v61, %v2085_v37  ;;  %v7060_v37 = vpack.c.bf16 %v2227_v35, %v2224_v34 }
 0xc93   :  { %6983 = vmatpush3.bf16.msra.mxu0 %v6980_v30  ;;  %v6182_v30 = vld [vmem:[%s9581_s11] ss:$0 sm:$0xff] }
 0xc94   :  { %6985 = vmatprep.subr.bf16.mxu0 %v6984_v1 }
 0xc97   :  { %6987 = vmatpush3.bf16.msra.mxu0 %v6984_v1 }
 0xc98   :  { %6989 = vmatprep.subr.bf16.mxu0 %v6988_v48 }
 0xc9b   :  { %6991 = vmatpush3.bf16.msra.mxu0 %v6988_v48 }
 0xd0d   :  { %v1916_v58 = vpop.xlane.xlu1 %1915 }
 0xd0e   :  { %v1914_v53 = vpop.xlane.xlu0 %1913  ;;  %v1918_v63 = vmul.f32 0.03125, %v1916_v58 }
 0xd0f   :  { %v1917_v55 = vmul.f32 0.03125, %v1914_v53 }
 0xd10   :  { %v1928_v3 = vmul.f32 %v1918_v63, %v1918_v63  ;;  %v1932_v13 = vsub.f32 %v8625_v20, %v1918_v63  ;;  %v2075_v20 = vld [vmem:[#allocation7 + $0x20] sm:$0xff] }
 0xd11   :  { %v1927_v0 = vmul.f32 %v1917_v55, %v1917_v55  ;;  %v1931_v8 = vsub.f32 %v8628_v49, %v1917_v55  ;;  %v2073_v49 = vld [vmem:[#allocation7 + $0x10] sm:$0xff]  ;;  %v7000_v24 = vpack.c.bf16 %v2076_v23, %v2075_v20  ;;  %v6183_v23 = vld [vmem:[%s9583_s13] ss:$0 sm:$0xff] }
 0xd12   :  { %v1922_v62 = vpop.xlane.xlu0 %1921  ;;  %v6996_v22 = vpack.c.bf16 %v2074_v21, %v2073_v49  ;;  %v2222_v49 = vld [vmem:[#allocation3 + $0x1b0] sm:$0xff] }
 0xd13   :  { %v1925_v52 = vmul.f32 0.03125, %v1922_v62 }
 0xd14   :  { %6997 = vmatprep.subr.bf16.mxu1 %v6996_v22 }
 0xd15   :  { %v1929_v59 = vsub.f32 %v1925_v52, %v1927_v0  ;;  %6999 = vmatpush3.bf16.msra.mxu1 %v6996_v22  ;;  %v2225_v22 = vld [vmem:[#allocation3 + $0x1c8] sm:$0xff] }
 0xd16   :  { %v1924_v60 = vpop.xlane.xlu0 %1923  ;;  %7001 = vmatprep.subr.bf16.mxu1 %v7000_v24  ;;  %v7030_v20 = vpack.c.bf16 %v2225_v22, %v2222_v49  ;;  %v2262_v22 = vld [vmem:[#allocation3 + $0x2f0] sm:$0xff] }
 0xd17   :  { %v1933_v4 = vadd.f32 1e-12, %v1929_v59  ;;  %v1926_v5 = vmul.f32 0.03125, %v1924_v60 }
 0xd19   :  { %7823 = vrsqrt.f32 %v1933_v4  ;;  %v1930_v6 = vsub.f32 %v1926_v5, %v1928_v3  ;;  %7003 = vmatpush3.bf16.msra.mxu1 %v7000_v24 }
 0xd1a   :  { %7005 = vmatprep.subr.bf16.mxu1 %v7004_v41 }
 0xd1b   :  { %v1934_v7 = vadd.f32 1e-12, %v1930_v6 }
 0xd1d   :  { %7825 = vrsqrt.f32 %v1934_v7  ;;  %7007 = vmatpush3.bf16.msra.mxu1 %v7004_v41  ;;  %v2217_v7 = vld [vmem:[#allocation3 + $0x188] sm:$0xff] }
 0xd1e   :  { %7009 = vmatprep.subr.bf16.mxu1 %v7008_v28 }
 0xd21   :  { %7011 = vmatpush3.bf16.msra.mxu1 %v7008_v28 }
 0xd22   :  { %7013 = vmatprep.subr.bf16.mxu1 %v7012_v33 }
 0xd23   :  { %v7824_v9 = vpop.eup %7823 }
 0xd24   :  { %v1937_v12 = vmul.f32 %v7824_v9, %v1931_v8  ;;  %v2220_v8 = vld [vmem:[#allocation3 + $0x1a0] sm:$0xff] }
 0xd25   :  { %7015 = vmatpush3.bf16.msra.mxu1 %v7012_v33  ;;  %v2216_v9 = vld [vmem:[#allocation3 + $0x180] sm:$0xff] }
 0xd26   :  { %v1945_v14 = vmul.f32 %v6180_v10, %v1937_v12  ;;  %7017 = vmatprep.subr.bf16.mxu1 %v7016_v36  ;;  %v2219_v12 = vld [vmem:[#allocation3 + $0x198] sm:$0xff]  ;;  %v2232_v33 = vld [vmem:[#allocation3 + $0x200] sm:$0xff] }
 0xd27   :  { %v7826_v47 = vpop.eup %7825 }
 0xd28   :  { %v1938_v16 = vmul.f32 %v7826_v47, %v1932_v13  ;;  %v8644_v17 = vadd.f32 %v6181_v57, %v1945_v14  ;;  %v2226_v13 = vld [vmem:[#allocation3 + $0x1d0] sm:$0xff]  ;;  %v7026_v14 = vpack.c.bf16 %v2219_v12, %v2216_v9  ;;  %v2256_v12 = vld [vmem:[#allocation3 + $0x2c0] sm:$0xff] }
 0xd29   :  { %7019 = vmatpush3.bf16.msra.mxu1 %v7016_v36  ;;  %v2228_v36 = vld [vmem:[#allocation3 + $0x1e0] sm:$0xff] }
 0xd2a   :  { %v1946_v18 = vmul.f32 %v6180_v10, %v1938_v16  ;;  %6619 = vmatprep.mubr.f32.mxu0 %v8644_v17  ;;  %7021 = vmatprep.subr.bf16.mxu1 %v7020_v38  ;;  %v7024_v10 = vpack.c.bf16 %v2220_v8, %v2217_v7  ;;  %v2218_v16 = vld [vmem:[#allocation3 + $0x190] sm:$0xff]  ;;  %v2249_v7 = vld [vmem:[#allocation3 + $0x288] sm:$0xff] }
 0xd2c   :  { %v8647_v19 = vadd.f32 %v6181_v57, %v1946_v18  ;;  %v2223_v57 = vld [vmem:[#allocation3 + $0x1b8] sm:$0xff]  ;;  %v2221_v18 = vld [vmem:[#allocation3 + $0x1a8] sm:$0xff]  ;;  %7025 = vmatprep.subr.bf16.mxu0 %v7024_v10 }
 0xd2d   :  { %7023 = vmatpush3.bf16.msra.mxu1 %v7020_v38  ;;  %v7028_v47 = vpack.c.bf16 %v2226_v13, %v2223_v57  ;;  %v7056_v21 = vpack.c.bf16 %v2221_v18, %v2218_v16  ;;  %v2235_v38 = vld [vmem:[#allocation3 + $0x218] sm:$0xff]  ;;  %v2253_v10 = vld [vmem:[#allocation3 + $0x2a8] sm:$0xff]  ;;  %v2248_v57 = vld [vmem:[#allocation3 + $0x280] sm:$0xff] }
 0xd2e   :  { %6620 = vmatmul.mubr.f32.vlgmr.msra.gmra.mrb[24].mxu0 %v8647_v19  ;;  %v7048_v13 = vpack.c.bf16 %v2256_v12, %v2253_v10  ;;  %v2255_v16 = vld [vmem:[#allocation3 + $0x2b8] sm:$0xff] }
 0xd2f   :  { %2346 = vmatprep.mubr.f32.mxu0 %v9600_v56  ;;  %7027 = vmatpush1.bf16.msra.mxu0 %v7026_v14  ;;  %v2251_v14 = vld [vmem:[#allocation3 + $0x298] sm:$0xff] }
 0xd30   :  { %7029 = vmatprep.subr.bf16.mxu0 %v7028_v47  ;;  %7057 = vmatprep.subr.bf16.mxu1 %v7056_v21  ;;  %v2252_v47 = vld [vmem:[#allocation3 + $0x2a0] sm:$0xff]  ;;  %v7076_v18 = vpack.c.bf16 %v2251_v14, %v2248_v57 }
 0xd31   :  { %v7050_v49 = vpack.c.bf16 %v2255_v16, %v2252_v47 }
 0xd33   :  { %7031 = vmatpush1.bf16.msra.mxu0 %v7030_v20  ;;  %v2254_v20 = vld [vmem:[#allocation3 + $0x2b0] sm:$0xff] }
 0xe01   :  { %v6621_v32 = vpop.f32.mrb[24].mxu0 }
 0xe02   :  { %v2050_v39 = vadd.f32 %v6621_v32, %v6182_v30  ;;  %v2044_v1 = vpop.f32.mrb[25].mxu0  ;;  %v2230_v32 = vld [vmem:[#allocation3 + $0x1f0] sm:$0xff] }
 0xe03   :  { %v2045_v43 = vadd.f32 %v6182_v30, %v2044_v1  ;;  %v2238_v30 = vld [vmem:[#allocation3 + $0x230] sm:$0xff]  ;;  %v2233_v1 = vld [vmem:[#allocation3 + $0x208] sm:$0xff] }
 0xe04   :  { %v2056_v46 = vmul.f32 0.044715, %v2050_v39  ;;  %v2054_v4 = vmul.f32 0.5, %v2050_v39 }
 0xe05   :  { %v2055_v48 = vmul.f32 0.044715, %v2045_v43  ;;  %v2053_v60 = vmul.f32 0.5, %v2045_v43 }
 0xe06   :  { %v2058_v50 = vmul.f32 %v2056_v46, %v2050_v39  ;;  %v2237_v46 = vld [vmem:[#allocation3 + $0x228] sm:$0xff] }
 0xe07   :  { %v2057_v51 = vmul.f32 %v2055_v48, %v2045_v43  ;;  %v7064_v48 = vpack.c.bf16 %v2233_v1, %v2230_v32 }
 0xe08   :  { %v2060_v54 = vmul.f32 %v2058_v50, %v2050_v39 }
 0xe09   :  { %v2059_v53 = vmul.f32 %v2057_v51, %v2045_v43  ;;  %v2241_v51 = vld [vmem:[#allocation3 + $0x248] sm:$0xff] }
 0xe0a   :  { %v2062_v55 = vadd.f32 %v2060_v54, %v2050_v39  ;;  %v7036_v39 = vpack.c.bf16 %v2238_v30, %v2235_v38  ;;  %v2244_v54 = vld [vmem:[#allocation3 + $0x260] sm:$0xff] }
 0xe0b   :  { %v2061_v58 = vadd.f32 %v2059_v53, %v2045_v43  ;;  %v2234_v43 = vld [vmem:[#allocation3 + $0x210] sm:$0xff]  ;;  %v2236_v53 = vld [vmem:[#allocation3 + $0x220] sm:$0xff] }
 0xe0c   :  { %v2064_v62 = vmul.f32 0.7978846, %v2062_v55  ;;  %v7038_v50 = vpack.c.bf16 %v2237_v46, %v2234_v43  ;;  %v7040_v55 = vpack.c.bf16 %v2244_v54, %v2241_v51  ;;  %v6184_v51 = vld [vmem:[%s9584_s14] ss:$0 sm:$0xff] }
 0xe0d   :  { %v2063_v63 = vmul.f32 0.7978846, %v2061_v58  ;;  %v2239_v58 = vld [vmem:[#allocation3 + $0x238] sm:$0xff] }
 0xe0e   :  { %7827 = vtanh.f32 %v2064_v62  ;;  %v2240_v62 = vld [vmem:[#allocation3 + $0x240] sm:$0xff] }
 0xe0f   :  { %7829 = vtanh.f32 %v2063_v63  ;;  %v2243_v63 = vld [vmem:[#allocation3 + $0x258] sm:$0xff] }
 0xe18   :  { %v7828_v0 = vpop.eup %7827 }
 0xe19   :  { %v7830_v52 = vpop.eup %7829  ;;  %v2068_v59 = vadd.f32 1.0, %v7828_v0  ;;  %v7068_v0 = vpack.c.bf16 %v2239_v58, %v2236_v53  ;;  %v6185_v53 = vld [vmem:[%s9585_s15] ss:$0 sm:$0xff] }
 0xe1a   :  { %v2067_v3 = vadd.f32 1.0, %v7830_v52  ;;  %v7042_v52 = vpack.c.bf16 %v2243_v63, %v2240_v62 }
 0xe1b   :  { %v2070_v6 = vmul.f32 %v2068_v59, %v2054_v4  ;;  %v2247_v59 = vld [vmem:[#allocation3 + $0x278] sm:$0xff] }
 0xe1c   :  { %v2069_v5 = vmul.f32 %v2067_v3, %v2053_v60  ;;  %v2250_v60 = vld [vmem:[#allocation3 + $0x290] sm:$0xff] }
 0xe1d   :  { %v2242_v3 = vld [vmem:[#allocation3 + $0x250] sm:$0xff]  ;;  %v7044_v4 = vpack.c.bf16 %v2250_v60, %v2247_v59 }
 0xe1e   :  { %6654 = vmatprep.mubr.f32.mxu1 %v2069_v5  ;;  %v2245_v5 = vld [vmem:[#allocation3 + $0x268] sm:$0xff] }
 0xe1f   :  { %6655 = vmatmul.mubr.f32.vlgmr.msra.gmra.mrb[16].mxu1 %v2070_v6  ;;  %v2246_v6 = vld [vmem:[#allocation3 + $0x270] sm:$0xff]  ;;  %v7072_v8 = vpack.c.bf16 %v2245_v5, %v2242_v3 }
 0xe20   :  { %7059 = vmatpush3.bf16.msra.mxu1 %v7056_v21  ;;  %v7046_v9 = vpack.c.bf16 %v2249_v7, %v2246_v6  ;;  %v2259_v21 = vld [vmem:[#allocation3 + $0x2d8] sm:$0xff] }
 0xe21   :  { %7061 = vmatprep.subr.bf16.mxu1 %v7060_v37 }
 0xe24   :  { %7063 = vmatpush3.bf16.msra.mxu1 %v7060_v37 }
 0xe25   :  { %7065 = vmatprep.subr.bf16.mxu1 %v7064_v48 }
 0xe28   :  { %7067 = vmatpush3.bf16.msra.mxu1 %v7064_v48 }
 0xe29   :  { %7069 = vmatprep.subr.bf16.mxu1 %v7068_v0 }
 0xe2c   :  { %7071 = vmatpush3.bf16.msra.mxu1 %v7068_v0 }
 0xe2d   :  { %7073 = vmatprep.subr.bf16.mxu1 %v7072_v8 }
 0xe30   :  { %7075 = vmatpush3.bf16.msra.mxu1 %v7072_v8 }
 0xe31   :  { %7077 = vmatprep.subr.bf16.mxu1 %v7076_v18 }
 0xe34   :  { %7079 = vmatpush3.bf16.msra.mxu1 %v7076_v18 }
 0xef2   :  { %v6656_v24 = vpop.f32.mrb[16].mxu1 }
 0xef3   :  { %v2160_v25 = vpop.f32.mrb[17].mxu1  ;;  %v2166_v40 = vadd.f32 %v6656_v24, %v6183_v23  ;;  %v2257_v24 = vld [vmem:[#allocation3 + $0x2c8] sm:$0xff] }
 0xef4   :  { %v2161_v41 = vadd.f32 %v6183_v23, %v2160_v25  ;;  %v7052_v23 = vpack.c.bf16 %v2262_v22, %v2259_v21  ;;  %v2258_v25 = vld [vmem:[#allocation3 + $0x2d0] sm:$0xff] }
 0xef5   :  { %v8661_v27 = vadd.f32 %v2166_v40, %v8647_v19  ;;  %v2231_v19 = vld [vmem:[#allocation3 + $0x1f8] sm:$0xff]  ;;  %v2261_v40 = vld [vmem:[#allocation3 + $0x2e8] sm:$0xff] }
 0xef6   :  { %v8658_v26 = vadd.f32 %v2161_v41, %v8644_v17  ;;  %v7032_v17 = vpack.c.bf16 %v2232_v33, %v2229_v31  ;;  %v7034_v61 = vpack.c.bf16 %v2231_v19, %v2228_v36  ;;  %v7080_v41 = vpack.c.bf16 %v2257_v24, %v2254_v20  ;;  %v2263_v31 = vld [vmem:[#allocation3 + $0x2f8] sm:$0xff] }
 0xef7   :  { %v2180_v29 = vmul.f32 %v8661_v27, %v8661_v27 }
 0xef8   :  { %2173 = vadd.xlane.f32.xlu0 %v8658_v26  ;;  %v2179_v28 = vmul.f32 %v8658_v26, %v8658_v26  ;;  %7033 = vmatprep.subr.bf16.mxu0 %v7032_v17 }
 0xef9   :  { %7035 = vmatpush1.bf16.msra.mxu0 %v7034_v61  ;;  %7081 = vmatprep.subr.bf16.mxu1 %v7080_v41 }
 0xefa   :  { %2181 = vadd.xlane.f32.xlu1 %v2179_v28  ;;  %7037 = vmatprep.subr.bf16.mxu0 %v7036_v39  ;;  %v7054_v28 = vpack.c.bf16 %v2261_v40, %v2258_v25 }
 0xefb   :  { %7083 = vmatpush3.bf16.msra.mxu1 %v7080_v41 }
 0xefc   :  { %2175 = vadd.xlane.f32.xlu0 %v8661_v27 }
 0xefd   :  { %7039 = vmatpush1.bf16.msra.mxu0 %v7038_v50 }
 0xefe   :  { %2183 = vadd.xlane.f32.xlu1 %v2180_v29  ;;  %7041 = vmatprep.subr.bf16.mxu0 %v7040_v55  ;;  %v2260_v29 = vld [vmem:[#allocation3 + $0x2e0] sm:$0xff] }
 0xeff   :  { %v7084_v33 = vpack.c.bf16 %v2263_v31, %v2260_v29 }
 0xf01   :  { %7043 = vmatpush1.bf16.msra.mxu0 %v7042_v52  ;;  %7085 = vmatprep.subr.bf16.mxu1 %v7084_v33 }
 0xf02   :  { %7045 = vmatprep.subr.bf16.mxu0 %v7044_v4  ;;  %7087 = vmatpush3.bf16.msra.mxu1 %v7084_v33 }
 0xf03   :  { %6697 = vmatprep.subr.mxu1 %v9600_v56 }
 0xf05   :  { %7047 = vmatpush1.bf16.msra.mxu0 %v7046_v9 }
 0xf06   :  { %7049 = vmatprep.subr.bf16.mxu0 %v7048_v13 }
 0xf09   :  { %7051 = vmatpush1.bf16.msra.mxu0 %v7050_v49 }
 0xf0a   :  { %7053 = vmatprep.subr.bf16.mxu0 %v7052_v23 }
 0xf0d   :  { %7055 = vmatpush1.bf16.msra.mxu0 %v7054_v28 }
 0xf0e   :  { %6692 = vmatprep.subr.mxu0 %v9600_v56 }
 0xf85   :  { %v2174_v34 = vpop.xlane.xlu0 %2173 }
 0xf86   :  { %v2177_v17 = vmul.f32 0.03125, %v2174_v34 }
 0xf87   :  { %v2182_v35 = vpop.xlane.xlu1 %2181 }
 0xf88   :  { %v2187_v36 = vmul.f32 %v2177_v17, %v2177_v17  ;;  %v2185_v19 = vmul.f32 0.03125, %v2182_v35  ;;  %v2191_v48 = vsub.f32 %v8658_v26, %v2177_v17 }
 0xf89   :  { %v2176_v37 = vpop.xlane.xlu0 %2175 }
 0xf8a   :  { %v2189_v61 = vsub.f32 %v2185_v19, %v2187_v36  ;;  %v2178_v38 = vmul.f32 0.03125, %v2176_v37 }
 0xf8b   :  { %v2184_v30 = vpop.xlane.xlu1 %2183 }
 0xf8c   :  { %v2193_v32 = vadd.f32 1e-12, %v2189_v61  ;;  %v2188_v39 = vmul.f32 %v2178_v38, %v2178_v38  ;;  %v2186_v1 = vmul.f32 0.03125, %v2184_v30  ;;  %v2192_v55 = vsub.f32 %v8661_v27, %v2178_v38  ;;  %v6186_v27 = vld [vmem:[%s9615_s3 + $0x3] sm:$0x7] }
 0xf8d   :  { %v2274_v59 = vrot.slane %v6186_v27, %v8415_v42  ;;  %v2270_v3 = vrot.slane %v6186_v27, %v8424_v45  ;;  %v2278_v6 = vrot.slane %v6186_v27, %v8421_v44 }
 0xf8e   :  { %7831 = vrsqrt.f32 %v2193_v32  ;;  %v2190_v43 = vsub.f32 %v2186_v1, %v2188_v39 }
 0xf90   :  { %v2194_v46 = vadd.f32 1e-12, %v2190_v43 }
 0xf92   :  { %7833 = vrsqrt.f32 %v2194_v46 }
 0xf98   :  { %v7832_v50 = vpop.eup %7831 }
 0xf99   :  { %v2197_v54 = vmul.f32 %v7832_v50, %v2191_v48 }
 0xf9b   :  { %v2205_v58 = vmul.f32 %v6184_v51, %v2197_v54 }
 0xf9c   :  { %v7834_v62 = vpop.eup %7833 }
 0xf9d   :  { %v8679_v63 = vadd.f32 %v6185_v53, %v2205_v58  ;;  %v2198_v0 = vmul.f32 %v7834_v62, %v2192_v55 }
 0xf9f   :  { %2347 = vmatmul.mubr.f32.vlgmr.msra.gmra.mrb[26].mxu0 %v8679_v63  ;;  %6689 = vmatprep.mubr.f32.mxu1 %v8679_v63  ;;  %v2206_v26 = vmul.f32 %v6184_v51, %v2198_v0 }
 0xfa0   :  { %2352 = vmatprep.mubr.f32.mxu0 %v9600_v56 }
 0xfa1   :  { %v8684_v52 = vadd.f32 %v6185_v53, %v2206_v26 }
 0xfa3   :  { %2353 = vmatmul.mubr.f32.gmra.mrb[28].mxu0 %v8684_v52  ;;  %6690 = vmatmul.mubr.f32.vlgmr.msra.gmra.mrb[18].mxu1 %v8684_v52 }
 0xfa4   :  { %6694 = vmatprep.mubr.msk.f32.mxu0 %vm8164_vm0, %v9600_v56  ;;  %6699 = vmatprep.mubr.msk.f32.mxu1 %vm8164_vm0, %v9600_v56 }
0x1072   :  { %v2348_v60 = vpop.f32.mrb[26].mxu0 }
0x1073   :  { %v2350_v4 = vpop.f32.mrb[27].mxu0  ;;  %v8702_v9 = vadd.f32 %v2348_v60, %v2270_v3 }
0x1074   :  { %v8697_v5 = vadd.f32 %v2350_v4, %v2274_v59 }
0x1076   :  { %v2354_v7 = vpop.f32.mrb[28].mxu0  ;;  %v6691_v8 = vpop.f32.mrb[18].mxu1  ;;  %6693 = vmatpush3.xpose.msk.msra.mxu0 %vm445_vm1, %v8697_v5 }
0x1077   :  { %v2356_v10 = vpop.f32.mrb[29].mxu0  ;;  %v2425_v12 = vpop.f32.mrb[19].mxu1  ;;  %6702 = vmatprep.subr.mxu0 %v9600_v56  ;;  %v8714_v14 = vadd.f32 %v2354_v7, %v2270_v3  ;;  %v8719_v47 = vadd.f32 %v6691_v8, %v2278_v6 }
0x1078   :  { %v8705_v57 = vadd.f32 %v2356_v10, %v2274_v59  ;;  %v8707_v13 = vadd.f32 %v2425_v12, %v2278_v6 }
0x1079   :  { %6695 = vmatmul.mubr.msk.f32.vlgmr.msra.gmra.mrb[30].mxu0 %vm445_vm1, %v8702_v9 }
0x107a   :  { %6698 = vmatpush3.xpose.msk.msra.mxu1 %vm445_vm1, %v8705_v57  ;;  %6703 = vmatpush3.msra.mxu0 %v8707_v13 }
0x107b   :  { %6707 = vmatprep.subr.mxu1 %v9600_v56  ;;  %6704 = vmatprep.mubr.msk.f32.mxu0 %vm8164_vm0, %v9600_v56 }
0x107c   :  { %6712 = vmatprep.subr.mxu0 %v9600_v56 }
0x107d   :  { %6700 = vmatmul.mubr.msk.f32.vlgmr.msra.gmra.mrb[20].mxu1 %vm445_vm1, %v8714_v14 }
0x107e   :  { %6708 = vmatpush3.msra.mxu1 %v8719_v47  ;;  %6709 = vmatprep.mubr.msk.f32.mxu1 %vm8164_vm0, %v9600_v56 }
0x107f   :  { %6717 = vmatprep.subr.mxu1 %v9600_v56 }
0x114c   :  { %v2506_v16 = vpop.f32.mrb[30].mxu0 }
0x114d   :  { %v2586_v18 = vmul.f32 0.35355338, %v2506_v16  ;;  %v6696_v49 = vpop.f32.mrb[31].mxu0 }
0x114f   :  { %v2588_v21 = vadd.f32 %v2586_v18, %v8464_v11 }
0x1150   :  { %v2582_v22 = vpop.f32.mrb[20].mxu1 }
0x1151   :  { %v2587_v20 = vmul.f32 0.35355338, %v2582_v22  ;;  %v6701_v23 = vpop.f32.mrb[21].mxu1  ;;  %v2590_v24 = vsel %vm445_vm1, %v2588_v21, -inf }
0x1152   :  { %2591 = vmax.xlane.f32.xlu0 %v2590_v24 }
0x1153   :  { %v2589_v25 = vadd.f32 %v2587_v20, %v8467_v15 }
0x1155   :  { %v2593_v40 = vsel %vm445_vm1, %v2589_v25, -inf }
0x1156   :  { %2594 = vmax.xlane.f32.xlu1 %v2593_v40 }
0x1167   :  { %2838 = vrot.lane.b32.xlu1 %v8705_v57, %s8166_s18 }
0x116b   :  { %2758 = vrot.lane.b32.xlu1 %v8702_v9, %s8166_s18 }
0x11df   :  { %v2592_v41 = vpop.xlane.xlu0 %2591 }
0x11e0   :  { %v2596_v28 = vsub.f32 %v2588_v21, %v2592_v41 }
0x11e2   :  { %v2598_v29 = vmul.f32 1.442695, %v2596_v28 }
0x11e3   :  { %v2595_v31 = vpop.xlane.xlu1 %2594 }
0x11e4   :  { %7835 = vpow2.f32 %v2598_v29  ;;  %v2597_v33 = vsub.f32 %v2589_v25, %v2595_v31 }
0x11e6   :  { %v2600_v34 = vmul.f32 1.442695, %v2597_v33 }
0x11e7   :  { %v2839_v37 = vpop.permute.xlu1 %2838 }
0x11e8   :  { %7837 = vpow2.f32 %v2600_v34 }
0x11eb   :  { %v2759_v61 = vpop.permute.xlu1 %2758 }
0x11ee   :  { %v7836_v17 = vpop.eup %7835 }
0x11ef   :  { %v2602_v35 = vsel %vm445_vm1, %v7836_v17, 0.0 }
0x11f0   :  { %2603 = vadd.xlane.f32.xlu0 %v2602_v35 }
0x11f2   :  { %v7838_v36 = vpop.eup %7837 }
0x11f3   :  { %v2605_v19 = vsel %vm445_vm1, %v7838_v36, 0.0 }
0x11f4   :  { %2606 = vadd.xlane.f32.xlu1 %v2605_v19 }
0x1205   :  { %2836 = vrot.lane.b32.xlu1 %v8714_v14, %s8166_s18 }
0x1206   :  { %2760 = vrot.lane.b32.xlu0 %v8697_v5, %s8166_s18 }
0x127d   :  { %v2604_v38 = vpop.xlane.xlu0 %2603 }
0x127e   :  { %7839 = vrcp.f32 %v2604_v38 }
0x1281   :  { %v2607_v30 = vpop.xlane.xlu1 %2606  ;;  %v2761_v1 = vpop.permute.xlu0 %2760 }
0x1282   :  { %7841 = vrcp.f32 %v2607_v30 }
0x1285   :  { %v2837_v48 = vpop.permute.xlu1 %2836 }
0x1288   :  { %v7840_v32 = vpop.eup %7839 }
0x1289   :  { %v2610_v39 = vmul.f32 %v7840_v32, %v7836_v17 }
0x128b   :  { %6705 = vmatmul.mubr.msk.f32.vlgmr.msra.gmra.mrb[32].mxu0 %vm445_vm1, %v2610_v39 }
0x128c   :  { %v7842_v43 = vpop.eup %7841  ;;  %6713 = vmatpush3.xpose.msk.msra.mxu0 %vm445_vm1, %v2761_v1  ;;  %6714 = vmatprep.mubr.msk.f32.mxu0 %vm8164_vm0, %v9600_v56 }
0x128d   :  { %v2611_v46 = vmul.f32 %v7842_v43, %v7838_v36  ;;  %6722 = vmatprep.subr.mxu0 %v9600_v56 }
0x128f   :  { %6710 = vmatmul.mubr.msk.f32.vlgmr.msra.gmra.mrb[22].mxu1 %vm445_vm1, %v2611_v46  ;;  %6715 = vmatmul.mubr.msk.f32.vlgmr.msra.gmra.mrb[34].mxu0 %vm445_vm1, %v2759_v61 }
0x1290   :  { %6718 = vmatpush3.xpose.msk.msra.mxu1 %vm445_vm1, %v2839_v37  ;;  %6719 = vmatprep.mubr.msk.f32.mxu1 %vm8164_vm0, %v9600_v56 }
0x1291   :  { %6727 = vmatprep.subr.mxu1 %v9600_v56  ;;  %6724 = vmatprep.mubr.msk.f32.mxu0 %vm8164_vm0, %v9600_v56 }
0x1293   :  { %6720 = vmatmul.mubr.msk.f32.vlgmr.msra.gmra.mrb[24].mxu1 %vm445_vm1, %v2837_v48 }
0x1294   :  { %6729 = vmatprep.mubr.msk.f32.mxu1 %vm8164_vm0, %v9600_v56 }
0x135e   :  { %v8758_v50 = vpop.f32.mrb[32].mxu0 }
0x135f   :  { %v6706_v51 = vpop.f32.mrb[33].mxu0 }
0x1362   :  { %v8760_v54 = vpop.f32.mrb[22].mxu1  ;;  %v2832_v53 = vpop.f32.mrb[34].mxu0 }
0x1363   :  { %v2914_v55 = vmul.f32 0.35355338, %v2832_v53  ;;  %v6711_v58 = vpop.f32.mrb[23].mxu1  ;;  %v6716_v62 = vpop.f32.mrb[35].mxu0 }
0x1365   :  { %v2916_v0 = vadd.f32 %v2914_v55, %v8464_v11 }
0x1366   :  { %v2910_v26 = vpop.f32.mrb[24].mxu1 }
0x1367   :  { %v2915_v27 = vmul.f32 0.35355338, %v2910_v26  ;;  %v6721_v59 = vpop.f32.mrb[25].mxu1  ;;  %v2918_v60 = vsel %vm445_vm1, %v2916_v0, -inf }
0x1368   :  { %2919 = vmax.xlane.f32.xlu0 %v2918_v60 }
0x1369   :  { %v2917_v3 = vadd.f32 %v2915_v27, %v8467_v15 }
0x136b   :  { %v2921_v4 = vsel %vm445_vm1, %v2917_v3, -inf }
0x136c   :  { %2922 = vmax.xlane.f32.xlu1 %v2921_v4 }
0x137d   :  { %3018 = vrot.lane.b32.xlu1 %v8719_v47, %s8166_s18 }
0x137e   :  { %2941 = vrot.lane.b32.xlu0 %v8707_v13, %s8166_s18 }
0x1381   :  { %3096 = vrot.lane.b32.xlu1 %v8697_v5, %s8167_s24 }
0x1385   :  { %3174 = vrot.lane.b32.xlu1 %v8705_v57, %s8167_s24 }
0x1389   :  { %3172 = vrot.lane.b32.xlu1 %v8714_v14, %s8167_s24 }
0x13f5   :  { %v2920_v6 = vpop.xlane.xlu0 %2919 }
0x13f6   :  { %v2924_v7 = vsub.f32 %v2916_v0, %v2920_v6 }
0x13f8   :  { %v2926_v8 = vmul.f32 1.442695, %v2924_v7 }
0x13f9   :  { %v2942_v10 = vpop.permute.xlu0 %2941  ;;  %v2923_v12 = vpop.xlane.xlu1 %2922 }
0x13fa   :  { %7843 = vpow2.f32 %v2926_v8  ;;  %v2925_v16 = vsub.f32 %v2917_v3, %v2923_v12  ;;  %6723 = vmatpush3.msra.mxu0 %v2942_v10 }
0x13fb   :  { %6732 = vmatprep.subr.mxu0 %v9600_v56 }
0x13fc   :  { %v2928_v18 = vmul.f32 1.442695, %v2925_v16 }
0x13fd   :  { %v3019_v49 = vpop.permute.xlu1 %3018 }
0x13fe   :  { %7845 = vpow2.f32 %v2928_v18  ;;  %6728 = vmatpush3.msra.mxu1 %v3019_v49 }
0x13ff   :  { %6737 = vmatprep.subr.mxu1 %v9600_v56 }
0x1401   :  { %v3097_v40 = vpop.permute.xlu1 %3096 }
0x1404   :  { %v7844_v21 = vpop.eup %7843 }
0x1405   :  { %v2930_v22 = vsel %vm445_vm1, %v7844_v21, 0.0  ;;  %v3175_v31 = vpop.permute.xlu1 %3174 }
0x1406   :  { %2931 = vadd.xlane.f32.xlu0 %v2930_v22 }
0x1408   :  { %v7846_v20 = vpop.eup %7845 }
0x1409   :  { %v2933_v23 = vsel %vm445_vm1, %v7846_v20, 0.0  ;;  %v3173_v17 = vpop.permute.xlu1 %3172 }
0x140a   :  { %2934 = vadd.xlane.f32.xlu0 %v2933_v23 }
0x1420   :  { %3094 = vrot.lane.b32.xlu0 %v8702_v9, %s8167_s24 }
0x1493   :  { %v2932_v24 = vpop.xlane.xlu0 %2931 }
0x1494   :  { %7847 = vrcp.f32 %v2932_v24 }
0x1497   :  { %v2935_v25 = vpop.xlane.xlu0 %2934 }
0x1498   :  { %7849 = vrcp.f32 %v2935_v25 }
0x149b   :  { %v3095_v34 = vpop.permute.xlu0 %3094 }
0x149e   :  { %v7848_v41 = vpop.eup %7847 }
0x149f   :  { %v2938_v28 = vmul.f32 %v7848_v41, %v7844_v21 }
0x14a1   :  { %6725 = vmatmul.mubr.msk.f32.vlgmr.msra.gmra.mrb[36].mxu0 %vm445_vm1, %v2938_v28 }
0x14a2   :  { %v7850_v29 = vpop.eup %7849  ;;  %6733 = vmatpush3.xpose.msk.msra.mxu0 %vm445_vm1, %v3097_v40  ;;  %6734 = vmatprep.mubr.msk.f32.mxu0 %vm8164_vm0, %v9600_v56 }
0x14a3   :  { %v2939_v33 = vmul.f32 %v7850_v29, %v7846_v20  ;;  %6742 = vmatprep.subr.mxu0 %v9600_v56 }
0x14a5   :  { %6730 = vmatmul.mubr.msk.f32.vlgmr.msra.gmra.mrb[26].mxu1 %vm445_vm1, %v2939_v33  ;;  %6735 = vmatmul.mubr.msk.f32.vlgmr.msra.gmra.mrb[38].mxu0 %vm445_vm1, %v3095_v34 }
0x14a6   :  { %6738 = vmatpush3.xpose.msk.msra.mxu1 %vm445_vm1, %v3175_v31  ;;  %6739 = vmatprep.mubr.msk.f32.mxu1 %vm8164_vm0, %v9600_v56 }
0x14a7   :  { %6747 = vmatprep.subr.mxu1 %v9600_v56  ;;  %6744 = vmatprep.mubr.msk.f32.mxu0 %vm8164_vm0, %v9600_v56 }
0x14a9   :  { %6740 = vmatmul.mubr.msk.f32.vlgmr.msra.gmra.mrb[28].mxu1 %vm445_vm1, %v3173_v17 }
0x14aa   :  { %6749 = vmatprep.mubr.msk.f32.mxu1 %vm8164_vm0, %v9600_v56 }
0x1574   :  { %v8798_v35 = vpop.f32.mrb[36].mxu0 }
0x1575   :  { %v6726_v36 = vpop.f32.mrb[37].mxu0 }
0x1578   :  { %v8800_v19 = vpop.f32.mrb[26].mxu1  ;;  %v3168_v37 = vpop.f32.mrb[38].mxu0 }
0x1579   :  { %v3250_v61 = vmul.f32 0.35355338, %v3168_v37  ;;  %v6731_v38 = vpop.f32.mrb[27].mxu1  ;;  %v6736_v30 = vpop.f32.mrb[39].mxu0 }
0x157b   :  { %v3252_v32 = vadd.f32 %v3250_v61, %v8464_v11 }
0x157c   :  { %v3246_v39 = vpop.f32.mrb[28].mxu1 }
0x157d   :  { %v3251_v1 = vmul.f32 0.35355338, %v3246_v39  ;;  %v6741_v43 = vpop.f32.mrb[29].mxu1  ;;  %v3254_v46 = vsel %vm445_vm1, %v3252_v32, -inf }
0x157e   :  { %3255 = vmax.xlane.f32.xlu0 %v3254_v46 }
0x157f   :  { %v3253_v48 = vadd.f32 %v3251_v1, %v8467_v15 }
0x1581   :  { %v3257_v51 = vsel %vm445_vm1, %v3253_v48, -inf }
0x1582   :  { %3258 = vmax.xlane.f32.xlu1 %v3257_v51 }
0x1593   :  { %3352 = vrot.lane.b32.xlu1 %v8719_v47, %s8167_s24 }
0x1594   :  { %3276 = vrot.lane.b32.xlu0 %v8707_v13, %s8167_s24 }
0x1597   :  { %3430 = vrot.lane.b32.xlu1 %v8697_v5, %s8168_s6 }
0x159b   :  { %3508 = vrot.lane.b32.xlu1 %v8705_v57, %s8168_s6 }
0x159f   :  { %3506 = vrot.lane.b32.xlu1 %v8714_v14, %s8168_s6 }
0x160b   :  { %v3256_v53 = vpop.xlane.xlu0 %3255 }
0x160c   :  { %v3260_v55 = vsub.f32 %v3252_v32, %v3256_v53  ;;  %v6212_v53 = vld [vmem:[%s9617_s5 + $0x28] sm:$0xff] }
0x160e   :  { %v3262_v58 = vmul.f32 1.442695, %v3260_v55 }
0x160f   :  { %v3277_v62 = vpop.permute.xlu0 %3276  ;;  %v3259_v0 = vpop.xlane.xlu1 %3258 }
0x1610   :  { %7851 = vpow2.f32 %v3262_v58  ;;  %v3261_v26 = vsub.f32 %v3253_v48, %v3259_v0  ;;  %6743 = vmatpush3.msra.mxu0 %v3277_v62  ;;  %v6213_v58 = vld [vmem:[%s9617_s5 + $0x30] sm:$0xff]  ;;  %v6214_v62 = vld [vmem:[%s9617_s5 + $0x38] sm:$0xff] }
0x1611   :  { %6752 = vmatprep.subr.mxu0 %v9600_v56  ;;  %v7092_v0 = vpack.c.bf16 %v6214_v62, %v6213_v58 }
0x1612   :  { %v3264_v27 = vmul.f32 1.442695, %v3261_v26 }
0x1613   :  { %v3353_v59 = vpop.permute.xlu1 %3352 }
0x1614   :  { %7853 = vpow2.f32 %v3264_v27  ;;  %6748 = vmatpush3.msra.mxu1 %v3353_v59 }
0x1615   :  { %6757 = vmatprep.subr.mxu1 %v9600_v56 }
0x1617   :  { %v3431_v6 = vpop.permute.xlu1 %3430 }
0x161a   :  { %v7852_v5 = vpop.eup %7851 }
0x161b   :  { %v3266_v57 = vsel %vm445_vm1, %v7852_v5, 0.0  ;;  %v3509_v12 = vpop.permute.xlu1 %3508 }
0x161c   :  { %3267 = vadd.xlane.f32.xlu0 %v3266_v57 }
0x161e   :  { %v7854_v14 = vpop.eup %7853 }
0x161f   :  { %v3269_v60 = vsel %vm445_vm1, %v7854_v14, 0.0  ;;  %v3507_v18 = vpop.permute.xlu1 %3506 }
0x1620   :  { %3270 = vadd.xlane.f32.xlu0 %v3269_v60 }
0x1636   :  { %3428 = vrot.lane.b32.xlu0 %v8702_v9, %s8168_s6 }
0x16a9   :  { %v3268_v3 = vpop.xlane.xlu0 %3267 }
0x16aa   :  { %7855 = vrcp.f32 %v3268_v3 }
0x16ad   :  { %v3271_v4 = vpop.xlane.xlu0 %3270 }
0x16ae   :  { %7857 = vrcp.f32 %v3271_v4 }
0x16b1   :  { %v3429_v9 = vpop.permute.xlu0 %3428 }
0x16b4   :  { %v7856_v7 = vpop.eup %7855 }
0x16b5   :  { %v3274_v8 = vmul.f32 %v7856_v7, %v7852_v5 }
0x16b7   :  { %6745 = vmatmul.mubr.msk.f32.vlgmr.msra.gmra.mrb[40].mxu0 %vm445_vm1, %v3274_v8 }
0x16b8   :  { %v7858_v10 = vpop.eup %7857  ;;  %6753 = vmatpush3.xpose.msk.msra.mxu0 %vm445_vm1, %v3431_v6  ;;  %6754 = vmatprep.mubr.msk.f32.mxu0 %vm8164_vm0, %v9600_v56 }
0x16b9   :  { %v3275_v16 = vmul.f32 %v7858_v10, %v7854_v14  ;;  %6762 = vmatprep.subr.mxu0 %v9600_v56 }
0x16bb   :  { %6750 = vmatmul.mubr.msk.f32.vlgmr.msra.gmra.mrb[30].mxu1 %vm445_vm1, %v3275_v16  ;;  %6755 = vmatmul.mubr.msk.f32.vlgmr.msra.gmra.mrb[42].mxu0 %vm445_vm1, %v3429_v9 }
0x16bc   :  { %6758 = vmatpush3.xpose.msk.msra.mxu1 %vm445_vm1, %v3509_v12  ;;  %6759 = vmatprep.mubr.msk.f32.mxu1 %vm8164_vm0, %v9600_v56 }
0x16bd   :  { %6767 = vmatprep.subr.mxu1 %v9600_v56  ;;  %6764 = vmatprep.mubr.msk.f32.mxu0 %vm8164_vm0, %v9600_v56 }
0x16bf   :  { %6760 = vmatmul.mubr.msk.f32.vlgmr.msra.gmra.mrb[32].mxu1 %vm445_vm1, %v3507_v18 }
0x16c0   :  { %6769 = vmatprep.mubr.msk.f32.mxu1 %vm8164_vm0, %v9600_v56 }
0x178a   :  { %v3348_v49 = vpop.f32.mrb[40].mxu0 }
0x178b   :  { %v6746_v21 = vpop.f32.mrb[41].mxu0 }
0x178e   :  { %v3424_v22 = vpop.f32.mrb[30].mxu1  ;;  %v3502_v20 = vpop.f32.mrb[42].mxu0 }
0x178f   :  { %v3584_v23 = vmul.f32 0.35355338, %v3502_v20  ;;  %v6751_v24 = vpop.f32.mrb[31].mxu1  ;;  %v6756_v25 = vpop.f32.mrb[43].mxu0 }
0x1790   :  { %v3935_v25 = vld [vmem:[#allocation5 + $0x80] sm:$0xff] }
0x1791   :  { %v3586_v40 = vadd.f32 %v3584_v23, %v8464_v11 }
0x1792   :  { %v3580_v41 = vpop.f32.mrb[32].mxu1 }
0x1793   :  { %v3585_v28 = vmul.f32 0.35355338, %v3580_v41  ;;  %v6761_v29 = vpop.f32.mrb[33].mxu1  ;;  %v3588_v31 = vsel %vm445_vm1, %v3586_v40, -inf }
0x1794   :  { %3589 = vmax.xlane.f32.xlu0 %v3588_v31  ;;  %v3939_v29 = vld [vmem:[#allocation5 + $0xa0] sm:$0xff]  ;;  %v3940_v31 = vld [vmem:[#allocation5 + $0xa8] sm:$0xff] }
0x1795   :  { %v3587_v33 = vadd.f32 %v3585_v28, %v8467_v15 }
0x1797   :  { %v3591_v34 = vsel %vm445_vm1, %v3587_v33, -inf }
0x1798   :  { %3592 = vmax.xlane.f32.xlu1 %v3591_v34  ;;  %v3941_v34 = vld [vmem:[#allocation5 + $0xb0] sm:$0xff] }
0x17a9   :  { %3686 = vrot.lane.b32.xlu1 %v8719_v47, %s8168_s6 }
0x17ad   :  { %3764 = vrot.lane.b32.xlu1 %v8798_v35, %s8153_s29 }
0x17b1   :  { %3766 = vrot.lane.b32.xlu1 %v8800_v19, %s8153_s29 }
0x17b5   :  { %3774 = vrot.lane.b32.xlu1 %v3424_v22, %s8169_s27 }
0x1821   :  { %v3590_v11 = vpop.xlane.xlu0 %3589 }
0x1822   :  { %v3594_v17 = vsub.f32 %v3586_v40, %v3590_v11  ;;  %v3936_v40 = vld [vmem:[#allocation5 + $0x88] sm:$0xff]  ;;  %v3942_v11 = vld [vmem:[#allocation5 + $0xb8] sm:$0xff] }
0x1823   :  { %v7096_v41 = vpack.c.bf16 %v3936_v40, %v3935_v25  ;;  %v4059_v25 = vld [vmem:[#allocation7 + $0xb0] sm:$0xff]  ;;  %v4060_v40 = vld [vmem:[#allocation7 + $0xb8] sm:$0xff] }
0x1824   :  { %v3596_v36 = vmul.f32 1.442695, %v3594_v17  ;;  %v7108_v17 = vpack.c.bf16 %v3942_v11, %v3941_v34  ;;  %v4065_v34 = vld [vmem:[#allocation7 + $0xe0] sm:$0xff]  ;;  %v4066_v11 = vld [vmem:[#allocation7 + $0xe8] sm:$0xff] }
0x1825   :  { %v3593_v37 = vpop.xlane.xlu1 %3592 }
0x1826   :  { %7859 = vpow2.f32 %v3596_v36  ;;  %v3595_v15 = vsub.f32 %v3587_v33, %v3593_v37  ;;  %v7104_v33 = vpack.c.bf16 %v3940_v31, %v3939_v29  ;;  %v3943_v36 = vld [vmem:[#allocation5 + $0xc0] sm:$0xff]  ;;  %v3944_v37 = vld [vmem:[#allocation5 + $0xc8] sm:$0xff]  ;;  %v4063_v29 = vld [vmem:[#allocation7 + $0xd0] sm:$0xff] }
0x1827   :  { %v4064_v31 = vld [vmem:[#allocation7 + $0xd8] sm:$0xff] }
0x1828   :  { %v3598_v61 = vmul.f32 1.442695, %v3595_v15  ;;  %v7112_v15 = vpack.c.bf16 %v3944_v37, %v3943_v36  ;;  %v4067_v36 = vld [vmem:[#allocation7 + $0xf0] sm:$0xff]  ;;  %v4068_v37 = vld [vmem:[#allocation7 + $0xf8] sm:$0xff] }
0x1829   :  { %v3687_v38 = vpop.permute.xlu1 %3686 }
0x182a   :  { %7861 = vpow2.f32 %v3598_v61  ;;  %6768 = vmatpush3.msra.mxu1 %v3687_v38  ;;  %v3945_v61 = vld [vmem:[#allocation5 + $0xd0] sm:$0xff]  ;;  %v3946_v38 = vld [vmem:[#allocation5 + $0xd8] sm:$0xff] }
0x182b   :  { %7097 = vmatprep.subr.bf16.mxu1 %v7096_v41 }
0x182d   :  { %v3765_v57 = vpop.permute.xlu1 %3764 }
0x182e   :  { %v3786_v3 = vsel %vm445_vm1, %v8758_v50, %v3765_v57  ;;  %v6216_v50 = vld [vmem:[%s9618_s4 + $0x1] ss:$0 sm:$0xff] }
0x1830   :  { %v7860_v30 = vpop.eup %7859 }
0x1831   :  { %v3600_v47 = vsel %vm445_vm1, %v7860_v30, 0.0  ;;  %v3767_v14 = vpop.permute.xlu1 %3766 }
0x1832   :  { %3601 = vadd.xlane.f32.xlu0 %v3600_v47  ;;  %v3787_v10 = vsel %vm445_vm1, %v8760_v54, %v3767_v14  ;;  %v3947_v47 = vld [vmem:[#allocation5 + $0xe0] sm:$0xff] }
0x1834   :  { %v7862_v35 = vpop.eup %7861 }
0x1835   :  { %v3603_v32 = vsel %vm445_vm1, %v7862_v35, 0.0  ;;  %v3775_v4 = vpop.permute.xlu1 %3774 }
0x1836   :  { %3604 = vadd.xlane.f32.xlu0 %v3603_v32  ;;  %v3789_v12 = vsel %vm1810_vm3, %v3787_v10, %v3775_v4 }
0x184c   :  { %3610 = vrot.lane.b32.xlu0 %v8707_v13, %s8168_s6  ;;  %v6211_v13 = vld [vmem:[%s9617_s5 + $0x20] sm:$0xff] }
0x184d   :  { %v7088_v55 = vpack.c.bf16 %v6212_v53, %v6211_v13 }
0x1850   :  { %3772 = vrot.lane.b32.xlu0 %v3348_v49, %s8169_s27 }
0x18bf   :  { %v3602_v19 = vpop.xlane.xlu0 %3601 }
0x18c0   :  { %7863 = vrcp.f32 %v3602_v19  ;;  %v3949_v19 = vld [vmem:[#allocation5 + $0xf0] sm:$0xff] }
0x18c3   :  { %v3605_v39 = vpop.xlane.xlu0 %3604 }
0x18c4   :  { %7865 = vrcp.f32 %v3605_v39  ;;  %v3950_v39 = vld [vmem:[#allocation5 + $0xf8] sm:$0xff] }
0x18c7   :  { %v3611_v1 = vpop.permute.xlu0 %3610 }
0x18c8   :  { %6763 = vmatpush3.msra.mxu0 %v3611_v1  ;;  %v7124_v1 = vpack.c.bf16 %v3950_v39, %v3949_v19 }
0x18c9   :  { %7089 = vmatprep.subr.bf16.mxu0 %v7088_v55 }
0x18ca   :  { %v7864_v43 = vpop.eup %7863 }
0x18cb   :  { %v3608_v46 = vmul.f32 %v7864_v43, %v7860_v30  ;;  %v3773_v60 = vpop.permute.xlu0 %3772  ;;  %v7116_v30 = vpack.c.bf16 %v3946_v38, %v3945_v61  ;;  %v4053_v43 = vld [vmem:[#allocation7 + $0x80] sm:$0xff] }
0x18cc   :  { %v3788_v6 = vsel %vm1810_vm3, %v3786_v3, %v3773_v60  ;;  %v6224_v61 = vld [vmem:[%s9581_s11 + $0x1] ss:$0 sm:$0xff] }
0x18cd   :  { %6765 = vmatmul.mubr.msk.f32.vlgmr.msra.gmra.mrb[44].mxu0 %vm445_vm1, %v3608_v46  ;;  %v4054_v46 = vld [vmem:[#allocation7 + $0x88] sm:$0xff] }
0x18ce   :  { %v7866_v48 = vpop.eup %7865  ;;  %7091 = vmatpush3.bf16.msra.mxu0 %v7088_v55 }
0x18cf   :  { %v3609_v51 = vmul.f32 %v7866_v48, %v7862_v35  ;;  %7093 = vmatprep.subr.bf16.mxu0 %v7092_v0  ;;  %v3948_v35 = vld [vmem:[#allocation5 + $0xe8] sm:$0xff]  ;;  %v7128_v48 = vpack.c.bf16 %v4054_v46, %v4053_v43 }
0x18d0   :  { %v7120_v32 = vpack.c.bf16 %v3948_v35, %v3947_v47 }
0x18d1   :  { %6770 = vmatmul.mubr.msk.f32.vlgmr.msra.gmra.mrb[34].mxu1 %vm445_vm1, %v3609_v51 }
0x18d2   :  { %7095 = vmatpush3.bf16.msra.mxu0 %v7092_v0  ;;  %7099 = vmatpush3.bf16.msra.mxu1 %v7096_v41  ;;  %v7140_v41 = vpack.c.bf16 %v4060_v40, %v4059_v25  ;;  %v4208_v25 = vld [vmem:[%s9586_s16 + $0x40] sm:$0xff]  ;;  %v4209_v40 = vld [vmem:[%s9586_s16 + $0x48] sm:$0xff] }
0x18d3   :  { %7129 = vmatprep.subr.bf16.mxu0 %v7128_v48 }
0x19a0   :  { %v3682_v26 = vpop.f32.mrb[44].mxu0 }
0x19a1   :  { %3780 = vrot.lane.b32.xlu0 %v3682_v26, %s8157_s30  ;;  %v6766_v27 = vpop.f32.mrb[45].mxu0 }
0x19a4   :  { %v3758_v59 = vpop.f32.mrb[34].mxu1 }
0x19a5   :  { %3782 = vrot.lane.b32.xlu1 %v3758_v59, %s8157_s30  ;;  %v6771_v5 = vpop.f32.mrb[35].mxu1 }
0x1a13   :  { %v3781_v7 = vpop.permute.xlu0 %3780 }
0x1a14   :  { %v3790_v8 = vsel %vm1813_vm2, %v3788_v6, %v3781_v7  ;;  %v6221_v6 = vld [vmem:[%s9578_s8 + $0x1] ss:$0 sm:$0xff] }
0x1a15   :  { %6780 = vmatprep.mubr.msk.f32.mxu0 %vm1827_vm4, %v3790_v8  ;;  %v6222_v8 = vld [vmem:[%s9579_s9 + $0x1] ss:$0 sm:$0xff] }
0x1a17   :  { %v3783_v16 = vpop.permute.xlu1 %3782 }
0x1a18   :  { %v3791_v9 = vsel %vm1813_vm2, %v3789_v12, %v3783_v16 }
0x1a19   :  { %6781 = vmatmul.mubr.msk.f32.vlgmr.msra.gmra.mrb[46].mxu0 %vm1827_vm4, %v3791_v9 }
0x1a1a   :  { %7131 = vmatpush3.bf16.msra.mxu0 %v7128_v48 }
0x1aec   :  { %v6782_v18 = vpop.f32.mrb[46].mxu0 }
0x1aed   :  { %v3883_v49 = vadd.f32 %v6782_v18, %v6216_v50  ;;  %v3877_v21 = vpop.f32.mrb[47].mxu0 }
0x1aee   :  { %v3878_v22 = vadd.f32 %v6216_v50, %v3877_v21  ;;  %v4055_v21 = vld [vmem:[#allocation7 + $0x90] sm:$0xff] }
0x1aef   :  { %v8884_v20 = vadd.f32 %v3883_v49, %v8684_v52  ;;  %v3937_v52 = vld [vmem:[#allocation5 + $0x90] sm:$0xff] }
0x1af0   :  { %v8887_v54 = vadd.f32 %v3878_v22, %v8679_v63  ;;  %v3938_v63 = vld [vmem:[#allocation5 + $0x98] sm:$0xff] }
0x1af1   :  { %3894 = vadd.xlane.f32.xlu1 %v8884_v20  ;;  %v3899_v24 = vmul.f32 %v8884_v20, %v8884_v20  ;;  %v7100_v28 = vpack.c.bf16 %v3938_v63, %v3937_v52  ;;  %v4056_v22 = vld [vmem:[#allocation7 + $0x98] sm:$0xff]  ;;  %v4061_v52 = vld [vmem:[#allocation7 + $0xc0] sm:$0xff]  ;;  %v4062_v63 = vld [vmem:[#allocation7 + $0xc8] sm:$0xff] }
0x1af2   :  { %3892 = vadd.xlane.f32.xlu0 %v8887_v54  ;;  %v3898_v23 = vmul.f32 %v8887_v54, %v8887_v54 }
0x1af3   :  { %7101 = vmatprep.subr.bf16.mxu1 %v7100_v28 }
0x1af4   :  { %7103 = vmatpush3.bf16.msra.mxu1 %v7100_v28  ;;  %v7144_v28 = vpack.c.bf16 %v4062_v63, %v4061_v52  ;;  %v7176_v52 = vpack.c.bf16 %v4209_v40, %v4208_v25  ;;  %v4211_v63 = vld [vmem:[%s9586_s16 + $0x58] sm:$0xff]  ;;  %v4355_v25 = vld [vmem:[#allocation10 + $0x1c8] sm:$0xff] }
0x1af5   :  { %7105 = vmatprep.subr.bf16.mxu1 %v7104_v33  ;;  %v4359_v40 = vld [vmem:[#allocation10 + $0x1e8] sm:$0xff] }
0x1af6   :  { %3900 = vadd.xlane.f32.xlu0 %v3898_v23  ;;  %v4057_v23 = vld [vmem:[#allocation7 + $0xa0] sm:$0xff] }
0x1af8   :  { %7107 = vmatpush3.bf16.msra.mxu1 %v7104_v33  ;;  %v7148_v33 = vpack.c.bf16 %v4064_v31, %v4063_v29  ;;  %v4212_v29 = vld [vmem:[%s9586_s16 + $0x60] sm:$0xff]  ;;  %v4213_v31 = vld [vmem:[%s9586_s16 + $0x68] sm:$0xff] }
0x1af9   :  { %7109 = vmatprep.subr.bf16.mxu1 %v7108_v17 }
0x1afa   :  { %3902 = vadd.xlane.f32.xlu0 %v3899_v24  ;;  %v4058_v24 = vld [vmem:[#allocation7 + $0xa8] sm:$0xff] }
0x1afc   :  { %7111 = vmatpush3.bf16.msra.mxu1 %v7108_v17  ;;  %v7152_v17 = vpack.c.bf16 %v4066_v11, %v4065_v34  ;;  %v4214_v34 = vld [vmem:[%s9586_s16 + $0x70] sm:$0xff]  ;;  %v4215_v11 = vld [vmem:[%s9586_s16 + $0x78] sm:$0xff] }
0x1afd   :  { %7113 = vmatprep.subr.bf16.mxu1 %v7112_v15 }
0x1b00   :  { %7115 = vmatpush3.bf16.msra.mxu1 %v7112_v15  ;;  %v7156_v15 = vpack.c.bf16 %v4068_v37, %v4067_v36  ;;  %v4299_v36 = vld [vmem:[#allocation10 + $0x8] sm:$0xff] }
0x1b01   :  { %7117 = vmatprep.subr.bf16.mxu1 %v7116_v30  ;;  %v4303_v37 = vld [vmem:[#allocation10 + $0x28] sm:$0xff] }
0x1b04   :  { %7119 = vmatpush3.bf16.msra.mxu1 %v7116_v30 }
0x1b05   :  { %7121 = vmatprep.subr.bf16.mxu1 %v7120_v32 }
0x1b08   :  { %7123 = vmatpush3.bf16.msra.mxu1 %v7120_v32 }
0x1b09   :  { %7125 = vmatprep.subr.bf16.mxu1 %v7124_v1 }
0x1b0c   :  { %7127 = vmatpush3.bf16.msra.mxu1 %v7124_v1 }
0x1b7e   :  { %v3895_v53 = vpop.xlane.xlu1 %3894 }
0x1b7f   :  { %v3893_v51 = vpop.xlane.xlu0 %3892  ;;  %v3897_v58 = vmul.f32 0.03125, %v3895_v53 }
0x1b80   :  { %v3896_v13 = vmul.f32 0.03125, %v3893_v51 }
0x1b81   :  { %v3907_v59 = vmul.f32 %v3897_v58, %v3897_v58  ;;  %v3911_v10 = vsub.f32 %v8884_v20, %v3897_v58  ;;  %v7136_v20 = vpack.c.bf16 %v4058_v24, %v4057_v23  ;;  %v4206_v23 = vld [vmem:[%s9586_s16 + $0x30] sm:$0xff]  ;;  %v4207_v24 = vld [vmem:[%s9586_s16 + $0x38] sm:$0xff] }
0x1b82   :  { %v3906_v62 = vmul.f32 %v3896_v13, %v3896_v13  ;;  %v3910_v3 = vsub.f32 %v8887_v54, %v3896_v13  ;;  %v7132_v54 = vpack.c.bf16 %v4056_v22, %v4055_v21  ;;  %v4204_v21 = vld [vmem:[%s9586_s16 + $0x20] sm:$0xff]  ;;  %v4205_v22 = vld [vmem:[%s9586_s16 + $0x28] sm:$0xff] }
0x1b83   :  { %v3901_v55 = vpop.xlane.xlu0 %3900 }
0x1b84   :  { %v3904_v0 = vmul.f32 0.03125, %v3901_v55  ;;  %7133 = vmatprep.subr.bf16.mxu0 %v7132_v54 }
0x1b85   :  { %7135 = vmatpush3.bf16.msra.mxu0 %v7132_v54  ;;  %v7168_v54 = vpack.c.bf16 %v4205_v22, %v4204_v21  ;;  %v4347_v21 = vld [vmem:[#allocation10 + $0x188] sm:$0xff] }
0x1b86   :  { %v3908_v26 = vsub.f32 %v3904_v0, %v3906_v62  ;;  %7137 = vmatprep.subr.bf16.mxu0 %v7136_v20  ;;  %v4351_v22 = vld [vmem:[#allocation10 + $0x1a8] sm:$0xff] }
0x1b87   :  { %v3903_v27 = vpop.xlane.xlu0 %3902 }
0x1b88   :  { %v3912_v5 = vadd.f32 1e-12, %v3908_v26  ;;  %v3905_v57 = vmul.f32 0.03125, %v3903_v27 }
0x1b89   :  { %7139 = vmatpush3.bf16.msra.mxu0 %v7136_v20  ;;  %v7172_v20 = vpack.c.bf16 %v4207_v24, %v4206_v23  ;;  %v4346_v23 = vld [vmem:[#allocation10 + $0x180] sm:$0xff] }
0x1b8a   :  { %7867 = vrsqrt.f32 %v3912_v5  ;;  %v3909_v14 = vsub.f32 %v3905_v57, %v3907_v59  ;;  %7141 = vmatprep.subr.bf16.mxu0 %v7140_v41  ;;  %v4200_v57 = vld [vmem:[%s9586_s16] sm:$0xff] }
0x1b8b   :  { %v4350_v24 = vld [vmem:[#allocation10 + $0x1a0] sm:$0xff] }
0x1b8c   :  { %v3913_v60 = vadd.f32 1e-12, %v3909_v14  ;;  %v4201_v14 = vld [vmem:[%s9586_s16 + $0x8] sm:$0xff] }
0x1b8d   :  { %7143 = vmatpush3.bf16.msra.mxu0 %v7140_v41  ;;  %v4210_v41 = vld [vmem:[%s9586_s16 + $0x50] sm:$0xff] }
0x1b8e   :  { %7869 = vrsqrt.f32 %v3913_v60  ;;  %7145 = vmatprep.subr.bf16.mxu0 %v7144_v28  ;;  %v7160_v60 = vpack.c.bf16 %v4201_v14, %v4200_v57  ;;  %v4331_v14 = vld [vmem:[#allocation10 + $0x108] sm:$0xff] }
0x1b90   :  { %7161 = vmatprep.subr.bf16.mxu1 %v7160_v60 }
0x1b91   :  { %7147 = vmatpush3.bf16.msra.mxu0 %v7144_v28  ;;  %v7180_v28 = vpack.c.bf16 %v4211_v63, %v4210_v41  ;;  %v7220_v41 = vpack.c.bf16 %v4359_v40, %v4355_v25  ;;  %v4340_v25 = vld [vmem:[#allocation10 + $0x150] sm:$0xff] }
0x1b92   :  { %7149 = vmatprep.subr.bf16.mxu0 %v7148_v33  ;;  %v4344_v40 = vld [vmem:[#allocation10 + $0x170] sm:$0xff] }
0x1b94   :  { %v7868_v4 = vpop.eup %7867 }
0x1b95   :  { %v3916_v7 = vmul.f32 %v7868_v4, %v3910_v3  ;;  %7151 = vmatpush3.bf16.msra.mxu0 %v7148_v33  ;;  %v6226_v3 = vld [vmem:[%s9583_s13 + $0x1] ss:$0 sm:$0xff]  ;;  %v7184_v33 = vpack.c.bf16 %v4213_v31, %v4212_v29 }
0x1b96   :  { %7153 = vmatprep.subr.bf16.mxu0 %v7152_v17 }
0x1b97   :  { %v3924_v12 = vmul.f32 %v6221_v6, %v3916_v7 }
0x1b98   :  { %v7870_v16 = vpop.eup %7869 }
0x1b99   :  { %v3917_v9 = vmul.f32 %v7870_v16, %v3911_v10  ;;  %v8903_v50 = vadd.f32 %v6222_v8, %v3924_v12  ;;  %7155 = vmatpush3.bf16.msra.mxu0 %v7152_v17  ;;  %v7188_v17 = vpack.c.bf16 %v4215_v11, %v4214_v34 }
0x1b9a   :  { %7157 = vmatprep.subr.bf16.mxu0 %v7156_v15 }
0x1b9b   :  { %v3925_v18 = vmul.f32 %v6221_v6, %v3917_v9  ;;  %6815 = vmatprep.mubr.f32.mxu1 %v8903_v50 }
0x1b9d   :  { %v8906_v49 = vadd.f32 %v6222_v8, %v3925_v18  ;;  %7159 = vmatpush3.bf16.msra.mxu0 %v7156_v15  ;;  %v4202_v18 = vld [vmem:[%s9586_s16 + $0x10] sm:$0xff]  ;;  %v4301_v15 = vld [vmem:[#allocation10 + $0x18] sm:$0xff] }
0x1b9f   :  { %6816 = vmatmul.mubr.f32.vlgmr.msra.gmra.mrb[36].mxu1 %v8906_v49 }
0x1ba0   :  { %7163 = vmatpush3.bf16.msra.mxu1 %v7160_v60  ;;  %v4335_v60 = vld [vmem:[#allocation10 + $0x128] sm:$0xff] }
0x1c72   :  { %v6817_v38 = vpop.f32.mrb[36].mxu1 }
0x1c73   :  { %v4031_v30 = vadd.f32 %v6817_v38, %v6224_v61  ;;  %v4025_v47 = vpop.f32.mrb[37].mxu1  ;;  %v4305_v38 = vld [vmem:[#allocation10 + $0x38] sm:$0xff] }
0x1c74   :  { %v4026_v35 = vadd.f32 %v6224_v61, %v4025_v47  ;;  %v7192_v61 = vpack.c.bf16 %v4303_v37, %v4299_v36  ;;  %v4302_v47 = vld [vmem:[#allocation10 + $0x20] sm:$0xff] }
0x1c75   :  { %v4037_v32 = vmul.f32 0.044715, %v4031_v30  ;;  %v4035_v27 = vmul.f32 0.5, %v4031_v30 }
0x1c76   :  { %v4036_v19 = vmul.f32 0.044715, %v4026_v35  ;;  %v4034_v0 = vmul.f32 0.5, %v4026_v35  ;;  %7193 = vmatprep.subr.bf16.mxu0 %v7192_v61 }
0x1c77   :  { %v4039_v39 = vmul.f32 %v4037_v32, %v4031_v30 }
0x1c78   :  { %v4038_v1 = vmul.f32 %v4036_v19, %v4026_v35  ;;  %v4307_v19 = vld [vmem:[#allocation10 + $0x48] sm:$0xff] }
0x1c79   :  { %v4041_v43 = vmul.f32 %v4039_v39, %v4031_v30  ;;  %v4311_v39 = vld [vmem:[#allocation10 + $0x68] sm:$0xff] }
0x1c7a   :  { %v4040_v46 = vmul.f32 %v4038_v1, %v4026_v35  ;;  %v7196_v1 = vpack.c.bf16 %v4311_v39, %v4307_v19 }
0x1c7b   :  { %v4043_v48 = vadd.f32 %v4041_v43, %v4031_v30  ;;  %v4298_v30 = vld [vmem:[#allocation10] sm:$0xff] }
0x1c7c   :  { %v4042_v51 = vadd.f32 %v4040_v46, %v4026_v35  ;;  %v7224_v35 = vpack.c.bf16 %v4305_v38, %v4301_v15  ;;  %v7194_v32 = vpack.c.bf16 %v4302_v47, %v4298_v30  ;;  %v4306_v43 = vld [vmem:[#allocation10 + $0x40] sm:$0xff] }
0x1c7d   :  { %v4045_v13 = vmul.f32 0.7978846, %v4043_v48  ;;  %v4310_v46 = vld [vmem:[#allocation10 + $0x60] sm:$0xff] }
0x1c7e   :  { %v4044_v53 = vmul.f32 0.7978846, %v4042_v51  ;;  %v7198_v48 = vpack.c.bf16 %v4310_v46, %v4306_v43  ;;  %v4315_v51 = vld [vmem:[#allocation10 + $0x88] sm:$0xff]  ;;  %v6230_v43 = vld [vmem:[%s9585_s15 + $0x1] ss:$0 sm:$0xff] }
0x1c7f   :  { %7871 = vtanh.f32 %v4045_v13  ;;  %v4319_v13 = vld [vmem:[#allocation10 + $0xa8] sm:$0xff] }
0x1c80   :  { %7873 = vtanh.f32 %v4044_v53  ;;  %v7200_v53 = vpack.c.bf16 %v4319_v13, %v4315_v51  ;;  %v4304_v51 = vld [vmem:[#allocation10 + $0x30] sm:$0xff] }
0x1c89   :  { %v7872_v55 = vpop.eup %7871 }
0x1c8a   :  { %v7874_v58 = vpop.eup %7873  ;;  %v4049_v62 = vadd.f32 1.0, %v7872_v55  ;;  %v4314_v55 = vld [vmem:[#allocation10 + $0x80] sm:$0xff] }
0x1c8b   :  { %v4048_v26 = vadd.f32 1.0, %v7874_v58  ;;  %v4318_v58 = vld [vmem:[#allocation10 + $0xa0] sm:$0xff] }
0x1c8c   :  { %v4051_v5 = vmul.f32 %v4049_v62, %v4035_v27  ;;  %v7202_v62 = vpack.c.bf16 %v4318_v58, %v4314_v55 }
0x1c8d   :  { %v4050_v59 = vmul.f32 %v4048_v26, %v4034_v0  ;;  %v4323_v0 = vld [vmem:[#allocation10 + $0xc8] sm:$0xff] }
0x1c8e   :  { %v4327_v26 = vld [vmem:[#allocation10 + $0xe8] sm:$0xff] }
0x1c8f   :  { %6850 = vmatprep.mubr.f32.mxu0 %v4050_v59  ;;  %v7204_v27 = vpack.c.bf16 %v4327_v26, %v4323_v0  ;;  %v4322_v59 = vld [vmem:[#allocation10 + $0xc0] sm:$0xff]  ;;  %v4308_v0 = vld [vmem:[#allocation10 + $0x50] sm:$0xff] }
0x1c90   :  { %6851 = vmatmul.mubr.f32.vlgmr.msra.gmra.mrb[48].mxu0 %v4051_v5  ;;  %v4326_v5 = vld [vmem:[#allocation10 + $0xe0] sm:$0xff]  ;;  %v4312_v26 = vld [vmem:[#allocation10 + $0x70] sm:$0xff] }
0x1c91   :  { %4448 = vmatprep.mubr.f32.mxu0 %v9600_v56  ;;  %7195 = vmatpush1.bf16.msra.mxu0 %v7194_v32  ;;  %v7206_v57 = vpack.c.bf16 %v4326_v5, %v4322_v59  ;;  %v6229_v32 = vld [vmem:[%s9584_s14 + $0x1] ss:$0 sm:$0xff]  ;;  %v7230_v5 = vpack.c.bf16 %v4312_v26, %v4308_v0 }
0x1c92   :  { %7197 = vmatprep.subr.bf16.mxu0 %v7196_v1  ;;  %v4321_v59 = vld [vmem:[#allocation10 + $0xb8] sm:$0xff] }
0x1c95   :  { %7199 = vmatpush1.bf16.msra.mxu0 %v7198_v48  ;;  %v4300_v48 = vld [vmem:[#allocation10 + $0x10] sm:$0xff] }
0x1c96   :  { %7201 = vmatprep.subr.bf16.mxu0 %v7200_v53  ;;  %v4309_v53 = vld [vmem:[#allocation10 + $0x58] sm:$0xff]  ;;  %v7226_v58 = vpack.c.bf16 %v4304_v51, %v4300_v48  ;;  %v4540_v48 = vld [vmem:[#allocation11 + $0x10] sm:$0xff] }
0x1c97   :  { %v4544_v51 = vld [vmem:[#allocation11 + $0x30] sm:$0xff] }
0x1c98   :  { %v8993_v26 = vpack.c.bf16 %v4544_v51, %v4540_v48  ;;  %v4581_v48 = vld [vmem:[#allocation11 + $0x158] sm:$0xff] }
0x1c99   :  { %7203 = vmatpush1.bf16.msra.mxu0 %v7202_v62  ;;  %v4585_v51 = vld [vmem:[#allocation11 + $0x178] sm:$0xff] }
0x1c9a   :  { %7205 = vmatprep.subr.bf16.mxu0 %v7204_v27  ;;  %v4317_v27 = vld [vmem:[#allocation10 + $0x98] sm:$0xff] }
0x1c9d   :  { %7207 = vmatpush1.bf16.msra.mxu0 %v7206_v57  ;;  %v7232_v57 = vpack.c.bf16 %v4321_v59, %v4317_v27  ;;  %v4546_v27 = vld [vmem:[#allocation11 + $0x40] sm:$0xff] }
0x1c9e   :  { %v4550_v59 = vld [vmem:[#allocation11 + $0x60] sm:$0xff] }
0x1d63   :  { %v6852_v4 = vpop.f32.mrb[48].mxu0 }
0x1d64   :  { %v4149_v6 = vadd.f32 %v6852_v4, %v6226_v3  ;;  %v4143_v7 = vpop.f32.mrb[49].mxu0  ;;  %v4330_v4 = vld [vmem:[#allocation10 + $0x100] sm:$0xff] }
0x1d65   :  { %v4144_v8 = vadd.f32 %v6226_v3, %v4143_v7  ;;  %v7208_v3 = vpack.c.bf16 %v4335_v60, %v4331_v14  ;;  %v4316_v14 = vld [vmem:[#allocation10 + $0x90] sm:$0xff] }
0x1d66   :  { %v8923_v10 = vadd.f32 %v4149_v6, %v8906_v49  ;;  %v4334_v6 = vld [vmem:[#allocation10 + $0x120] sm:$0xff]  ;;  %v4320_v60 = vld [vmem:[#allocation10 + $0xb0] sm:$0xff] }
0x1d67   :  { %v8926_v12 = vadd.f32 %v4144_v8, %v8903_v50  ;;  %v4203_v50 = vld [vmem:[%s9586_s16 + $0x18] sm:$0xff]  ;;  %v7210_v7 = vpack.c.bf16 %v4334_v6, %v4330_v4  ;;  %7209 = vmatprep.subr.bf16.mxu0 %v7208_v3  ;;  %v4339_v8 = vld [vmem:[#allocation10 + $0x148] sm:$0xff]  ;;  %v7234_v6 = vpack.c.bf16 %v4320_v60, %v4316_v14 }
0x1d68   :  { %4160 = vadd.xlane.f32.xlu1 %v8923_v10  ;;  %v4165_v16 = vmul.f32 %v8923_v10, %v8923_v10  ;;  %v7164_v49 = vpack.c.bf16 %v4203_v50, %v4202_v18  ;;  %v4338_v18 = vld [vmem:[#allocation10 + $0x140] sm:$0xff]  ;;  %v4325_v3 = vld [vmem:[#allocation10 + $0xd8] sm:$0xff]  ;;  %v4552_v14 = vld [vmem:[#allocation11 + $0x70] sm:$0xff] }
0x1d69   :  { %4158 = vadd.xlane.f32.xlu0 %v8926_v12  ;;  %v4164_v9 = vmul.f32 %v8926_v12, %v8926_v12  ;;  %v4342_v50 = vld [vmem:[#allocation10 + $0x160] sm:$0xff]  ;;  %7211 = vmatpush1.bf16.msra.mxu0 %v7210_v7  ;;  %v4329_v4 = vld [vmem:[#allocation10 + $0xf8] sm:$0xff]  ;;  %v4555_v60 = vld [vmem:[#allocation11 + $0x88] sm:$0xff] }
0x1d6a   :  { %7165 = vmatprep.subr.bf16.mxu1 %v7164_v49  ;;  %v7236_v7 = vpack.c.bf16 %v4329_v4, %v4325_v3 }
0x1d6b   :  { %7167 = vmatpush3.bf16.msra.mxu1 %v7164_v49  ;;  %v7214_v49 = vpack.c.bf16 %v4342_v50, %v4338_v18  ;;  %v4337_v18 = vld [vmem:[#allocation10 + $0x138] sm:$0xff] }
0x1d6c   :  { %4168 = vadd.xlane.f32.xlu1 %v4165_v16  ;;  %7169 = vmatprep.subr.bf16.mxu1 %v7168_v54  ;;  %v4343_v16 = vld [vmem:[#allocation10 + $0x168] sm:$0xff] }
0x1d6d   :  { %4166 = vadd.xlane.f32.xlu0 %v4164_v9  ;;  %v7212_v9 = vpack.c.bf16 %v4343_v16, %v4339_v8  ;;  %v4324_v8 = vld [vmem:[#allocation10 + $0xd0] sm:$0xff] }
0x1d6e   :  { %v4328_v16 = vld [vmem:[#allocation10 + $0xf0] sm:$0xff] }
0x1d6f   :  { %7171 = vmatpush3.bf16.msra.mxu1 %v7168_v54  ;;  %7213 = vmatprep.subr.bf16.mxu0 %v7212_v9  ;;  %v7216_v54 = vpack.c.bf16 %v4351_v22, %v4347_v21  ;;  %v4333_v9 = vld [vmem:[#allocation10 + $0x118] sm:$0xff]  ;;  %v7238_v50 = vpack.c.bf16 %v4328_v16, %v4324_v8  ;;  %v4332_v21 = vld [vmem:[#allocation10 + $0x110] sm:$0xff]  ;;  %v9001_v16 = vpack.c.bf16 %v4550_v59, %v4546_v27  ;;  %v4587_v59 = vld [vmem:[#allocation11 + $0x188] sm:$0xff] }
0x1d70   :  { %7173 = vmatprep.subr.bf16.mxu1 %v7172_v20  ;;  %7215 = vmatpush1.bf16.msra.mxu0 %v7214_v49  ;;  %v7240_v49 = vpack.c.bf16 %v4337_v18, %v4333_v9  ;;  %v4336_v22 = vld [vmem:[#allocation10 + $0x130] sm:$0xff]  ;;  %v4561_v8 = vld [vmem:[#allocation11 + $0xb8] sm:$0xff]  ;;  %v4554_v18 = vld [vmem:[#allocation11 + $0x80] sm:$0xff] }
0x1d71   :  { %7217 = vmatprep.subr.bf16.mxu0 %v7216_v54  ;;  %v4341_v54 = vld [vmem:[#allocation10 + $0x158] sm:$0xff]  ;;  %v4584_v27 = vld [vmem:[#allocation11 + $0x170] sm:$0xff] }
0x1d73   :  { %7175 = vmatpush3.bf16.msra.mxu1 %v7172_v20  ;;  %v7218_v20 = vpack.c.bf16 %v4350_v24, %v4346_v23  ;;  %v4345_v23 = vld [vmem:[#allocation10 + $0x178] sm:$0xff]  ;;  %v7242_v24 = vpack.c.bf16 %v4336_v22, %v4332_v21 }
0x1d74   :  { %7177 = vmatprep.subr.bf16.mxu1 %v7176_v52 }
0x1d75   :  { %7219 = vmatpush1.bf16.msra.mxu0 %v7218_v20  ;;  %v7244_v20 = vpack.c.bf16 %v4345_v23, %v4341_v54  ;;  %v4556_v54 = vld [vmem:[#allocation11 + $0x90] sm:$0xff] }
0x1d76   :  { %7221 = vmatprep.subr.bf16.mxu0 %v7220_v41  ;;  %v4349_v41 = vld [vmem:[#allocation10 + $0x198] sm:$0xff]  ;;  %v4560_v23 = vld [vmem:[#allocation11 + $0xb0] sm:$0xff] }
0x1d77   :  { %7179 = vmatpush3.bf16.msra.mxu1 %v7176_v52 }
0x1d78   :  { %7181 = vmatprep.subr.bf16.mxu1 %v7180_v28 }
0x1d7b   :  { %7183 = vmatpush3.bf16.msra.mxu1 %v7180_v28 }
0x1d7c   :  { %7185 = vmatprep.subr.bf16.mxu1 %v7184_v33 }
0x1d7f   :  { %7187 = vmatpush3.bf16.msra.mxu1 %v7184_v33 }
0x1d80   :  { %7189 = vmatprep.subr.bf16.mxu1 %v7188_v17 }
0x1d83   :  { %7191 = vmatpush3.bf16.msra.mxu1 %v7188_v17 }
0x1d84   :  { %7225 = vmatprep.subr.bf16.mxu1 %v7224_v35 }
0x1df5   :  { %v4161_v52 = vpop.xlane.xlu1 %4160 }
0x1df6   :  { %v4163_v63 = vmul.f32 0.03125, %v4161_v52  ;;  %v4159_v28 = vpop.xlane.xlu0 %4158  ;;  %v4353_v52 = vld [vmem:[#allocation10 + $0x1b8] sm:$0xff] }
0x1df7   :  { %v4162_v29 = vmul.f32 0.03125, %v4159_v28  ;;  %v7248_v28 = vpack.c.bf16 %v4353_v52, %v4349_v41  ;;  %v9017_v52 = vpack.c.bf16 %v4560_v23, %v4556_v54  ;;  %v4592_v54 = vld [vmem:[#allocation11 + $0x1b0] sm:$0xff]  ;;  %v4595_v23 = vld [vmem:[#allocation11 + $0x1c8] sm:$0xff] }
0x1df8   :  { %v4173_v33 = vmul.f32 %v4163_v63, %v4163_v63  ;;  %v4177_v30 = vsub.f32 %v8923_v10, %v4163_v63  ;;  %v4313_v10 = vld [vmem:[#allocation10 + $0x78] sm:$0xff]  ;;  %v7246_v63 = vpack.c.bf16 %v4344_v40, %v4340_v25 }
0x1df9   :  { %v4169_v31 = vpop.xlane.xlu1 %4168  ;;  %v4172_v17 = vmul.f32 %v4162_v29, %v4162_v29  ;;  %v4176_v35 = vsub.f32 %v8926_v12, %v4162_v29  ;;  %v7228_v62 = vpack.c.bf16 %v4313_v10, %v4309_v53  ;;  %v4348_v29 = vld [vmem:[#allocation10 + $0x190] sm:$0xff]  ;;  %v4547_v53 = vld [vmem:[#allocation11 + $0x48] sm:$0xff]  ;;  %v4565_v25 = vld [vmem:[#allocation11 + $0xd8] sm:$0xff] }
0x1dfa   :  { %v4171_v34 = vmul.f32 0.03125, %v4169_v31  ;;  %v4167_v11 = vpop.xlane.xlu0 %4166  ;;  %v4352_v31 = vld [vmem:[#allocation10 + $0x1b0] sm:$0xff]  ;;  %v4569_v40 = vld [vmem:[#allocation11 + $0xf8] sm:$0xff] }
0x1dfb   :  { %v4170_v36 = vmul.f32 0.03125, %v4167_v11  ;;  %v7250_v11 = vpack.c.bf16 %v4352_v31, %v4348_v29  ;;  %v9023_v31 = vpack.c.bf16 %v4569_v40, %v4565_v25  ;;  %v4601_v25 = vld [vmem:[#allocation11 + $0x1f8] sm:$0xff] }
0x1dfc   :  { %v4175_v37 = vsub.f32 %v4171_v34, %v4173_v33  ;;  %v4357_v33 = vld [vmem:[#allocation10 + $0x1d8] sm:$0xff] }
0x1dfd   :  { %v4174_v15 = vsub.f32 %v4170_v36, %v4172_v17  ;;  %v4361_v34 = vld [vmem:[#allocation10 + $0x1f8] sm:$0xff]  ;;  %v4354_v36 = vld [vmem:[#allocation10 + $0x1c0] sm:$0xff] }
0x1dfe   :  { %v4179_v61 = vadd.f32 1e-12, %v4175_v37  ;;  %v7252_v17 = vpack.c.bf16 %v4361_v34, %v4357_v33  ;;  %v4358_v37 = vld [vmem:[#allocation10 + $0x1e0] sm:$0xff]  ;;  %v4564_v33 = vld [vmem:[#allocation11 + $0xd0] sm:$0xff] }
0x1dff   :  { %v4178_v38 = vadd.f32 1e-12, %v4174_v15  ;;  %v4356_v15 = vld [vmem:[#allocation10 + $0x1d0] sm:$0xff] }
0x1e00   :  { %7875 = vrsqrt.f32 %v4179_v61  ;;  %v7222_v61 = vpack.c.bf16 %v4358_v37, %v4354_v36  ;;  %v4568_v34 = vld [vmem:[#allocation11 + $0xf0] sm:$0xff]  ;;  %v4573_v36 = vld [vmem:[#allocation11 + $0x118] sm:$0xff] }
0x1e01   :  { %7877 = vrsqrt.f32 %v4178_v38  ;;  %v4360_v38 = vld [vmem:[#allocation10 + $0x1f0] sm:$0xff]  ;;  %v4577_v37 = vld [vmem:[#allocation11 + $0x138] sm:$0xff] }
0x1e02   :  { %7223 = vmatpush1.bf16.msra.mxu0 %v7222_v61  ;;  %v9031_v61 = vpack.c.bf16 %v4568_v34, %v4564_v33 }
0x1e0a   :  { %v7876_v47 = vpop.eup %7875 }
0x1e0b   :  { %v7878_v19 = vpop.eup %7877  ;;  %v4183_v39 = vmul.f32 %v7876_v47, %v4177_v30  ;;  %v7254_v30 = vpack.c.bf16 %v4360_v38, %v4356_v15  ;;  %v4539_v47 = vld [vmem:[#allocation11 + $0x8] sm:$0xff]  ;;  %v4570_v38 = vld [vmem:[#allocation11 + $0x100] sm:$0xff] }
0x1e0c   :  { %v4182_v1 = vmul.f32 %v7878_v19, %v4176_v35  ;;  %v4543_v35 = vld [vmem:[#allocation11 + $0x28] sm:$0xff] }
0x1e0d   :  { %v4191_v46 = vmul.f32 %v6229_v32, %v4183_v39  ;;  %v8985_v19 = vpack.c.bf16 %v4543_v35, %v4539_v47  ;;  %v4545_v39 = vld [vmem:[#allocation11 + $0x38] sm:$0xff]  ;;  %v9037_v35 = vpack.c.bf16 %v4577_v37, %v4573_v36  ;;  %v4600_v36 = vld [vmem:[#allocation11 + $0x1f0] sm:$0xff] }
0x1e0e   :  { %v4190_v13 = vmul.f32 %v6229_v32, %v4182_v1  ;;  %v4541_v32 = vld [vmem:[#allocation11 + $0x18] sm:$0xff] }
0x1e0f   :  { %v4199_v12 = vadd.f32 %v6230_v43, %v4191_v46  ;;  %v8987_v1 = vpack.c.bf16 %v4545_v39, %v4541_v32  ;;  %7257 = vmatprep.subr.bf16.mxu0 %v8985_v19  ;;  %v4542_v46 = vld [vmem:[#allocation11 + $0x20] sm:$0xff]  ;;  %v4572_v32 = vld [vmem:[#allocation11 + $0x110] sm:$0xff] }
0x1e10   :  { %v4198_v55 = vadd.f32 %v6230_v43, %v4190_v13  ;;  %v4538_v43 = vld [vmem:[#allocation11] sm:$0xff]  ;;  %v6231_v13 = vld [vmem:[#allocation8] ss:$0 sm:$0xff]  ;;  %v4576_v39 = vld [vmem:[#allocation11 + $0x130] sm:$0xff] }
0x1e11   :  { %v8991_v0 = vpack.c.bf16 %v4542_v46, %v4538_v43  ;;  %v4579_v43 = vld [vmem:[#allocation11 + $0x148] sm:$0xff] }
0x1e12   :  { %6885 = vmatprep.mubr.f32.mxu1 %v4198_v55  ;;  %v4551_v55 = vld [vmem:[#allocation11 + $0x68] sm:$0xff] }
0x1e13   :  { %6886 = vmatmul.mubr.f32.vlgmr.msra.gmra.mrb[38].mxu1 %v4199_v12  ;;  %v4553_v12 = vld [vmem:[#allocation11 + $0x78] sm:$0xff]  ;;  %v8995_v3 = vpack.c.bf16 %v4551_v55, %v4547_v53  ;;  %v4583_v46 = vld [vmem:[#allocation11 + $0x168] sm:$0xff]  ;;  %v9043_v53 = vpack.c.bf16 %v4576_v39, %v4572_v32  ;;  %v4582_v55 = vld [vmem:[#allocation11 + $0x160] sm:$0xff]  ;;  %v4378_v32 = vsub.s32 3, %v8412_v2 }
0x1e14   :  { %7227 = vmatpush1.bf16.msra.mxu1 %v7226_v58  ;;  %4525 = vmatprep.mubr.f32.mxu1 %v9600_v56  ;;  %v4549_v58 = vld [vmem:[#allocation11 + $0x58] sm:$0xff] }
0x1e15   :  { %7229 = vmatprep.subr.bf16.mxu1 %v7228_v62  ;;  %v8997_v4 = vpack.c.bf16 %v4553_v12, %v4549_v58  ;;  %v9047_v58 = vpack.c.bf16 %v4583_v46, %v4579_v43  ;;  %v9049_v12 = vpack.c.bf16 %v4585_v51, %v4581_v48 }
0x1e18   :  { %7231 = vmatpush1.bf16.msra.mxu1 %v7230_v5 }
0x1e19   :  { %7233 = vmatprep.subr.bf16.mxu1 %v7232_v57  ;;  %v4548_v57 = vld [vmem:[#allocation11 + $0x50] sm:$0xff] }
0x1e1a   :  { %v9003_v9 = vpack.c.bf16 %v4552_v14, %v4548_v57  ;;  %v4589_v57 = vld [vmem:[#allocation11 + $0x198] sm:$0xff] }
0x1e1b   :  { %v4593_v14 = vld [vmem:[#allocation11 + $0x1b8] sm:$0xff] }
0x1e1c   :  { %7235 = vmatpush1.bf16.msra.mxu1 %v7234_v6  ;;  %v4559_v6 = vld [vmem:[#allocation11 + $0xa8] sm:$0xff] }
0x1e1d   :  { %7237 = vmatprep.subr.bf16.mxu1 %v7236_v7  ;;  %v4557_v7 = vld [vmem:[#allocation11 + $0x98] sm:$0xff]  ;;  %v9007_v21 = vpack.c.bf16 %v4559_v6, %v4555_v60 }
0x1e1e   :  { %v9009_v22 = vpack.c.bf16 %v4561_v8, %v4557_v7  ;;  %v4586_v7 = vld [vmem:[#allocation11 + $0x180] sm:$0xff] }
0x1e1f   :  { %v4590_v8 = vld [vmem:[#allocation11 + $0x1a0] sm:$0xff] }
0x1e20   :  { %7239 = vmatpush1.bf16.msra.mxu1 %v7238_v50  ;;  %v4558_v50 = vld [vmem:[#allocation11 + $0xa0] sm:$0xff]  ;;  %v9065_v40 = vpack.c.bf16 %v4590_v8, %v4586_v7 }
0x1e21   :  { %7241 = vmatprep.subr.bf16.mxu1 %v7240_v49  ;;  %v9015_v41 = vpack.c.bf16 %v4558_v50, %v4554_v18  ;;  %v9061_v50 = vpack.c.bf16 %v4593_v14, %v4589_v57 }
0x1e24   :  { %7243 = vmatpush1.bf16.msra.mxu1 %v7242_v24  ;;  %v4563_v24 = vld [vmem:[#allocation11 + $0xc8] sm:$0xff] }
0x1e25   :  { %7245 = vmatprep.subr.bf16.mxu1 %v7244_v20  ;;  %v4567_v20 = vld [vmem:[#allocation11 + $0xe8] sm:$0xff] }
0x1e26   :  { %v9021_v29 = vpack.c.bf16 %v4567_v20, %v4563_v24  ;;  %v4599_v24 = vld [vmem:[#allocation11 + $0x1e8] sm:$0xff]  ;;  %v4597_v20 = vld [vmem:[#allocation11 + $0x1d8] sm:$0xff] }
0x1e27   :  { %v9071_v33 = vpack.c.bf16 %v4599_v24, %v4595_v23  ;;  %v9073_v34 = vpack.c.bf16 %v4601_v25, %v4597_v20 }
0x1e28   :  { %7247 = vmatpush1.bf16.msra.mxu1 %v7246_v63  ;;  %v4562_v63 = vld [vmem:[#allocation11 + $0xc0] sm:$0xff] }
0x1e29   :  { %7249 = vmatprep.subr.bf16.mxu1 %v7248_v28  ;;  %v4566_v28 = vld [vmem:[#allocation11 + $0xe0] sm:$0xff] }
0x1e2a   :  { %v9029_v15 = vpack.c.bf16 %v4566_v28, %v4562_v63  ;;  %v4594_v28 = vld [vmem:[#allocation11 + $0x1c0] sm:$0xff] }
0x1e2c   :  { %7251 = vmatpush1.bf16.msra.mxu1 %v7250_v11  ;;  %v4571_v11 = vld [vmem:[#allocation11 + $0x108] sm:$0xff] }
0x1e2d   :  { %7253 = vmatprep.subr.bf16.mxu1 %v7252_v17  ;;  %v4575_v17 = vld [vmem:[#allocation11 + $0x128] sm:$0xff] }
0x1e2e   :  { %v9035_v47 = vpack.c.bf16 %v4575_v17, %v4571_v11  ;;  %v4598_v11 = vld [vmem:[#allocation11 + $0x1e0] sm:$0xff]  ;;  %v4596_v17 = vld [vmem:[#allocation11 + $0x1d0] sm:$0xff] }
0x1e2f   :  { %v9077_v37 = vpack.c.bf16 %v4598_v11, %v4594_v28 }
0x1e30   :  { %7255 = vmatpush1.bf16.msra.mxu1 %v7254_v30  ;;  %v4574_v30 = vld [vmem:[#allocation11 + $0x120] sm:$0xff] }
0x1e31   :  { %7289 = vmatprep.subr.bf16.mxu1 %v8987_v1 }
0x1ee6   :  { %v6887_v10 = vpop.f32.mrb[38].mxu1 }
0x1ee7   :  { %v4289_v62 = vpop.f32.mrb[39].mxu1  ;;  %v4295_v49 = vadd.f32 %v6887_v10, %v6231_v13  ;;  %v4578_v10 = vld [vmem:[#allocation11 + $0x140] sm:$0xff] }
0x1ee8   :  { %v4290_v5 = vadd.f32 %v6231_v13, %v4289_v62  ;;  %v9041_v13 = vpack.c.bf16 %v4574_v30, %v4570_v38  ;;  %v4580_v62 = vld [vmem:[#allocation11 + $0x150] sm:$0xff]  ;;  %v9053_v60 = vpack.c.bf16 %v4582_v55, %v4578_v10  ;;  %v9079_v38 = vpack.c.bf16 %v4600_v36, %v4596_v17  ;;  %v4362_v30 = vld [vmem:[%s9590_s20] sm:$0xf] }
0x1ee9   :  { %v9055_v6 = vpack.c.bf16 %v4584_v27, %v4580_v62  ;;  %v4367_v39 = vrot.slane %v4362_v30, %v8424_v45  ;;  %v4375_v43 = vrot.slane %v4362_v30, %v8421_v44  ;;  %v4371_v46 = vrot.slane %v4362_v30, %v8415_v42 }
0x1eea   :  { %4449 = vmatmul.mubr.f32.vlgmr.msra.gmra.mrb[50].mxu0 %v4290_v5  ;;  %4526 = vmatmul.mubr.f32.vlgmr.msra.gmra.mrb[40].mxu1 %v4290_v5  ;;  %v4591_v5 = vld [vmem:[#allocation11 + $0x1a8] sm:$0xff]  ;;  %v4379_v48 = vrot.slane %v4362_v30, %v4378_v32 }
0x1eeb   :  { %7259 = vmatpush1.bf16.msra.mxu0 %v8991_v0  ;;  %7291 = vmatpush1.bf16.msra.mxu1 %v8993_v26  ;;  %v9059_v18 = vpack.c.bf16 %v4591_v5, %v4587_v59 }
0x1eec   :  { %4454 = vmatprep.mubr.f32.mxu0 %v9600_v56  ;;  %4531 = vmatprep.mubr.f32.mxu1 %v9600_v56 }
0x1eed   :  { %7261 = vmatprep.subr.bf16.mxu0 %v8995_v3  ;;  %7293 = vmatprep.subr.bf16.mxu1 %v8997_v4 }
0x1eee   :  { %4455 = vmatmul.mubr.f32.gmra.mrb[52].mxu0 %v4295_v49  ;;  %4532 = vmatmul.mubr.f32.gmra.mrb[42].mxu1 %v4295_v49  ;;  %v4588_v49 = vld [vmem:[#allocation11 + $0x190] sm:$0xff] }
0x1eef   :  { %7263 = vmatpush1.bf16.msra.mxu0 %v9001_v16  ;;  %7295 = vmatpush1.bf16.msra.mxu1 %v9003_v9  ;;  %v9067_v63 = vpack.c.bf16 %v4592_v54, %v4588_v49 }
0x1ef0   :  { %7265 = vmatprep.subr.bf16.mxu0 %v9007_v21  ;;  %7297 = vmatprep.subr.bf16.mxu1 %v9009_v22 }
0x1ef1   :  { %4683 = vmatprep.mubr.f32.mxu0 %v9600_v56  ;;  %4754 = vmatprep.mubr.f32.mxu1 %v9600_v56 }
0x1ef3   :  { %7267 = vmatpush1.bf16.msra.mxu0 %v9015_v41  ;;  %7299 = vmatpush1.bf16.msra.mxu1 %v9017_v52 }
0x1ef4   :  { %7269 = vmatprep.subr.bf16.mxu0 %v9021_v29  ;;  %7301 = vmatprep.subr.bf16.mxu1 %v9023_v31 }
0x1ef7   :  { %7271 = vmatpush1.bf16.msra.mxu0 %v9029_v15  ;;  %7303 = vmatpush1.bf16.msra.mxu1 %v9031_v61 }
0x1ef8   :  { %7273 = vmatprep.subr.bf16.mxu0 %v9035_v47  ;;  %7305 = vmatprep.subr.bf16.mxu1 %v9037_v35 }
0x1efb   :  { %7275 = vmatpush1.bf16.msra.mxu0 %v9041_v13  ;;  %7307 = vmatpush1.bf16.msra.mxu1 %v9043_v53 }
0x1efc   :  { %7277 = vmatprep.subr.bf16.mxu0 %v9047_v58  ;;  %7309 = vmatprep.subr.bf16.mxu1 %v9049_v12 }
0x1eff   :  { %7279 = vmatpush1.bf16.msra.mxu0 %v9053_v60  ;;  %7311 = vmatpush1.bf16.msra.mxu1 %v9055_v6 }
0x1f00   :  { %7281 = vmatprep.subr.bf16.mxu0 %v9059_v18  ;;  %7313 = vmatprep.subr.bf16.mxu1 %v9061_v50 }
0x1f03   :  { %7283 = vmatpush1.bf16.msra.mxu0 %v9065_v40  ;;  %7315 = vmatpush1.bf16.msra.mxu1 %v9067_v63 }
0x1f04   :  { %7285 = vmatprep.subr.bf16.mxu0 %v9071_v33  ;;  %7317 = vmatprep.subr.bf16.mxu1 %v9073_v34 }
0x1f07   :  { %7287 = vmatpush1.bf16.msra.mxu0 %v9077_v37  ;;  %7319 = vmatpush1.bf16.msra.mxu1 %v9079_v38 }
0x1f08   :  { %7321 = vmatprep.subr.bf16.mxu0 %v8985_v19  ;;  %7353 = vmatprep.subr.bf16.mxu1 %v8987_v1 }
0x1f0a   :  { %4684 = vmatmul.mubr.f32.vlgmr.msra.gmra.mrb[54].mxu0 %v9600_v56  ;;  %4755 = vmatmul.mubr.f32.vlgmr.msra.gmra.mrb[44].mxu1 %v9600_v56 }
0x1f0b   :  { %7323 = vmatpush1.bf16.msra.mxu0 %v8991_v0  ;;  %7355 = vmatpush1.bf16.msra.mxu1 %v8993_v26 }
0x1f0c   :  { %7325 = vmatprep.subr.bf16.mxu0 %v8995_v3  ;;  %7357 = vmatprep.subr.bf16.mxu1 %v8997_v4 }
0x1f0d   :  { %4869 = vmatprep.mubr.f32.mxu0 %v9600_v56  ;;  %4940 = vmatprep.mubr.f32.mxu1 %v9600_v56 }
0x1f0f   :  { %7327 = vmatpush1.bf16.msra.mxu0 %v9001_v16  ;;  %7359 = vmatpush1.bf16.msra.mxu1 %v9003_v9 }
0x1f10   :  { %7329 = vmatprep.subr.bf16.mxu0 %v9007_v21  ;;  %7361 = vmatprep.subr.bf16.mxu1 %v9009_v22 }
0x1f13   :  { %7331 = vmatpush1.bf16.msra.mxu0 %v9015_v41  ;;  %7363 = vmatpush1.bf16.msra.mxu1 %v9017_v52 }
0x1f14   :  { %7333 = vmatprep.subr.bf16.mxu0 %v9021_v29  ;;  %7365 = vmatprep.subr.bf16.mxu1 %v9023_v31 }
0x1f17   :  { %7335 = vmatpush1.bf16.msra.mxu0 %v9029_v15  ;;  %7367 = vmatpush1.bf16.msra.mxu1 %v9031_v61 }
0x1f18   :  { %7337 = vmatprep.subr.bf16.mxu0 %v9035_v47  ;;  %7369 = vmatprep.subr.bf16.mxu1 %v9037_v35 }
0x1f1b   :  { %7339 = vmatpush1.bf16.msra.mxu0 %v9041_v13  ;;  %7371 = vmatpush1.bf16.msra.mxu1 %v9043_v53 }
0x1f1c   :  { %7341 = vmatprep.subr.bf16.mxu0 %v9047_v58  ;;  %7373 = vmatprep.subr.bf16.mxu1 %v9049_v12 }
0x1f1f   :  { %7343 = vmatpush1.bf16.msra.mxu0 %v9053_v60  ;;  %7375 = vmatpush1.bf16.msra.mxu1 %v9055_v6 }
0x1f20   :  { %7345 = vmatprep.subr.bf16.mxu0 %v9059_v18  ;;  %7377 = vmatprep.subr.bf16.mxu1 %v9061_v50 }
0x1f23   :  { %7347 = vmatpush1.bf16.msra.mxu0 %v9065_v40  ;;  %7379 = vmatpush1.bf16.msra.mxu1 %v9067_v63 }
0x1f24   :  { %7349 = vmatprep.subr.bf16.mxu0 %v9071_v33  ;;  %7381 = vmatprep.subr.bf16.mxu1 %v9073_v34 }
0x1f27   :  { %7351 = vmatpush1.bf16.msra.mxu0 %v9077_v37  ;;  %7383 = vmatpush1.bf16.msra.mxu1 %v9079_v38 }
0x1f28   :  { %7385 = vmatprep.subr.bf16.mxu0 %v8985_v19  ;;  %7417 = vmatprep.subr.bf16.mxu1 %v8987_v1 }
0x1fbd   :  { %v4450_v51 = vpop.f32.mrb[50].mxu0  ;;  %v4527_v10 = vpop.f32.mrb[40].mxu1 }
0x1fbe   :  { %v9130_v55 = vadd.f32 %v4450_v51, %v4367_v39  ;;  %v9132_v62 = vadd.f32 %v4527_v10, %v4375_v43  ;;  %v4452_v27 = vpop.f32.mrb[51].mxu0  ;;  %v4529_v59 = vpop.f32.mrb[41].mxu1 }
0x1fbf   :  { %v9134_v5 = vadd.f32 %v4452_v27, %v4371_v46  ;;  %v9136_v57 = vadd.f32 %v4529_v59, %v4379_v48 }
0x1fc0   :  { %v4793_v2 = vrot.slane %v9130_v55, 1  ;;  %v4795_v44 = vrot.slane %v9132_v62, 1  ;;  %v4975_v42 = vrot.slane %v9130_v55, 2  ;;  %v4977_v45 = vrot.slane %v9132_v62, 2 }
0x1fc1   :  { %v4456_v14 = vpop.f32.mrb[52].mxu0  ;;  %v4533_v7 = vpop.f32.mrb[42].mxu1  ;;  %v4794_v8 = vrot.slane %v9134_v5, 1  ;;  %v4796_v49 = vrot.slane %v9136_v57, 1  ;;  %v4976_v54 = vrot.slane %v9134_v5, 2  ;;  %v4978_v23 = vrot.slane %v9136_v57, 2 }
0x1fc2   :  { %v9146_v24 = vadd.f32 %v4456_v14, %v4367_v39  ;;  %v9148_v20 = vadd.f32 %v4533_v7, %v4375_v43  ;;  %v4458_v25 = vpop.f32.mrb[53].mxu0  ;;  %v4535_v28 = vpop.f32.mrb[43].mxu1  ;;  %v5165_v11 = vrot.slane %v9130_v55, 3  ;;  %v5167_v17 = vrot.slane %v9132_v62, 3 }
0x1fc3   :  { %v9152_v36 = vadd.f32 %v4458_v25, %v4371_v46  ;;  %v9154_v30 = vadd.f32 %v4535_v28, %v4379_v48  ;;  %v5166_v32 = vrot.slane %v9134_v5, 3  ;;  %v5168_v51 = vrot.slane %v9136_v57, 3 }
0x1fc4   :  { %v4606_v10 = vrot.slane %v9146_v24, 7  ;;  %v4608_v39 = vrot.slane %v9148_v20, 7  ;;  %v9162_v43 = vsel %vm4614_vm5, %v4793_v2, %v9146_v24  ;;  %v9166_v27 = vsel %vm4614_vm5, %v4795_v44, %v9148_v20 }
0x1fc5   :  { %9619 = vst [vmem:[#allocation17_spill] sm:$0xff] %v9162_v43  ;;  %9620 = vst [vmem:[#allocation18_spill] sm:$0xff] %v9166_v27  ;;  %v4607_v46 = vrot.slane %v9152_v36, 7  ;;  %v4609_v48 = vrot.slane %v9154_v30, 7  ;;  %v9172_v59 = vsel %vm4614_vm5, %v4794_v8, %v9152_v36  ;;  %v9176_v14 = vsel %vm4614_vm5, %v4796_v49, %v9154_v30 }
0x1fc6   :  { %9621 = vst [vmem:[#allocation19_spill] sm:$0xff] %v9172_v59  ;;  %9622 = vst [vmem:[#allocation20_spill] sm:$0xff] %v9176_v14  ;;  %v9180_v2 = vsel %vm4614_vm5, %v9130_v55, %v4606_v10  ;;  %v9184_v44 = vsel %vm4614_vm5, %v9132_v62, %v4608_v39  ;;  %v4983_v7 = vrot.slane %v9146_v24, 1  ;;  %v4985_v25 = vrot.slane %v9148_v20, 1 }
0x1fc7   :  { %v9190_v8 = vsel %vm4614_vm5, %v9134_v5, %v4607_v46  ;;  %v9194_v49 = vsel %vm4614_vm5, %v9136_v57, %v4609_v48  ;;  %v4984_v28 = vrot.slane %v9152_v36, 1  ;;  %v4986_v10 = vrot.slane %v9154_v30, 1 }
0x1fc8   :  { %v9199_v56 = vsel %vm4614_vm5, %v4975_v42, %v4983_v7  ;;  %v9202_v39 = vsel %vm4614_vm5, %v4977_v45, %v4985_v25  ;;  %v5173_v14 = vrot.slane %v9146_v24, 2  ;;  %v5175_v59 = vrot.slane %v9148_v20, 2 }
0x1fc9   :  { %v9207_v46 = vsel %vm4614_vm5, %v4976_v54, %v4984_v28  ;;  %v9210_v48 = vsel %vm4614_vm5, %v4978_v23, %v4986_v10  ;;  %v5174_v27 = vrot.slane %v9152_v36, 2  ;;  %v5176_v43 = vrot.slane %v9154_v30, 2 }
0x1fca   :  { %v9215_v42 = vsel %vm4614_vm5, %v5165_v11, %v5173_v14  ;;  %v9218_v45 = vsel %vm4614_vm5, %v5167_v17, %v5175_v59  ;;  %v5355_v7 = vrot.slane %v9130_v55, 4  ;;  %v5363_v25 = vrot.slane %v9146_v24, 3 }
0x1fcb   :  { %9623 = vst [vmem:[#allocation21_spill] sm:$0xff] %v9215_v42  ;;  %9624 = vst [vmem:[#allocation22_spill] sm:$0xff] %v9218_v45  ;;  %v9223_v54 = vsel %vm4614_vm5, %v5166_v32, %v5174_v27  ;;  %v9226_v23 = vsel %vm4614_vm5, %v5168_v51, %v5176_v43  ;;  %v5357_v28 = vrot.slane %v9132_v62, 4  ;;  %v5365_v10 = vrot.slane %v9148_v20, 3 }
0x1fcc   :  { %9625 = vst [vmem:[#allocation23_spill] sm:$0xff] %v9223_v54  ;;  %9626 = vst [vmem:[#allocation24_spill] sm:$0xff] %v9226_v23  ;;  %v9231_v11 = vsel %vm4614_vm5, %v5355_v7, %v5363_v25  ;;  %v5356_v17 = vrot.slane %v9134_v5, 4  ;;  %v5364_v59 = vrot.slane %v9152_v36, 3  ;;  %v5358_v14 = vrot.slane %v9136_v57, 4 }
0x1fcd   :  { %9627 = vst [vmem:[#allocation25_spill] sm:$0xff] %v9231_v11  ;;  %v9237_v45 = vsel %vm4614_vm5, %v5357_v28, %v5365_v10  ;;  %v5366_v32 = vrot.slane %v9154_v30, 3  ;;  %v5545_v51 = vrot.slane %v9130_v55, 5  ;;  %v5553_v43 = vrot.slane %v9146_v24, 4 }
0x1fce   :  { %9628 = vst [vmem:[#allocation26_spill] sm:$0xff] %v9237_v45  ;;  %v9243_v27 = vsel %vm4614_vm5, %v5356_v17, %v5364_v59  ;;  %v5547_v7 = vrot.slane %v9132_v62, 5  ;;  %v5555_v25 = vrot.slane %v9148_v20, 4  ;;  %v5546_v11 = vrot.slane %v9134_v5, 5 }
0x1fcf   :  { %9629 = vst [vmem:[#allocation27_spill] sm:$0xff] %v9243_v27  ;;  %v9249_v23 = vsel %vm4614_vm5, %v5358_v14, %v5366_v32  ;;  %v9252_v28 = vsel %vm4614_vm5, %v5545_v51, %v5553_v43  ;;  %v5554_v10 = vrot.slane %v9152_v36, 4  ;;  %v5548_v45 = vrot.slane %v9136_v57, 5 }
0x1fd0   :  { %9630 = vst [vmem:[#allocation28_spill] sm:$0xff] %v9249_v23  ;;  %9631 = vst [vmem:[#allocation29_spill] sm:$0xff] %v9252_v28  ;;  %v9257_v54 = vsel %vm4614_vm5, %v5547_v7, %v5555_v25  ;;  %v5556_v17 = vrot.slane %v9154_v30, 4  ;;  %v5735_v59 = vrot.slane %v9130_v55, 6  ;;  %v5743_v27 = vrot.slane %v9146_v24, 5 }
0x1fd1   :  { %9632 = vst [vmem:[#allocation30_spill] sm:$0xff] %v9257_v54  ;;  %v9263_v42 = vsel %vm4614_vm5, %v5546_v11, %v5554_v10  ;;  %v5737_v14 = vrot.slane %v9132_v62, 6  ;;  %v5745_v32 = vrot.slane %v9148_v20, 5  ;;  %v5736_v51 = vrot.slane %v9134_v5, 6 }
0x1fd2   :  { %9633 = vst [vmem:[#allocation31_spill] sm:$0xff] %v9263_v42  ;;  %v9269_v43 = vsel %vm4614_vm5, %v5548_v45, %v5556_v17  ;;  %v9272_v7 = vsel %vm4614_vm5, %v5735_v59, %v5743_v27  ;;  %v5744_v25 = vrot.slane %v9152_v36, 5  ;;  %v5738_v54 = vrot.slane %v9136_v57, 6 }
0x1fd3   :  { %v9277_v28 = vsel %vm4614_vm5, %v5737_v14, %v5745_v32  ;;  %v5746_v11 = vrot.slane %v9154_v30, 5  ;;  %v5925_v10 = vrot.slane %v9130_v55, 7  ;;  %v5933_v42 = vrot.slane %v9146_v24, 6 }
0x1fd4   :  { %v9283_v23 = vsel %vm4614_vm5, %v5736_v51, %v5744_v25  ;;  %v5927_v45 = vrot.slane %v9132_v62, 7  ;;  %v5935_v27 = vrot.slane %v9148_v20, 6  ;;  %v5926_v14 = vrot.slane %v9134_v5, 7 }
0x1fd5   :  { %v9288_v17 = vsel %vm4614_vm5, %v5738_v54, %v5746_v11  ;;  %v9291_v59 = vsel %vm4614_vm5, %v5925_v10, %v5933_v42  ;;  %v5934_v32 = vrot.slane %v9152_v36, 6  ;;  %v5928_v24 = vrot.slane %v9136_v57, 7 }
0x1fd6   :  { %v9296_v55 = vsel %vm4614_vm5, %v5927_v45, %v5935_v27  ;;  %v5936_v51 = vrot.slane %v9154_v30, 6 }
0x1fd7   :  { %v9301_v62 = vsel %vm4614_vm5, %v5926_v14, %v5934_v32 }
0x1fd8   :  { %9634 = vst [vmem:[#allocation32_spill] sm:$0xff] %v9301_v62  ;;  %v9304_v20 = vsel %vm4614_vm5, %v5928_v24, %v5936_v51 }
0x1fd9   :  { %9635 = vst [vmem:[#allocation33_spill] sm:$0xff] %v9304_v20 }
0x1fdd   :  { %v4685_v54 = vpop.f32.mrb[54].mxu0  ;;  %v4756_v42 = vpop.f32.mrb[44].mxu1 }
0x1fde   :  { %v4761_v25 = vadd.f32 %v4685_v54, %v9180_v2  ;;  %v4763_v5 = vadd.f32 %v4756_v42, %v9184_v44  ;;  %v4687_v36 = vpop.f32.mrb[55].mxu0  ;;  %v4758_v11 = vpop.f32.mrb[45].mxu1 }
0x1fdf   :  { %v4762_v10 = vadd.f32 %v4687_v36, %v9190_v8  ;;  %v4764_v57 = vadd.f32 %v4758_v11, %v9194_v49 }
0x1fe0   :  { %v6232_v45 = vmul.f32 -1.442695, %v4761_v25 }
0x1fe1   :  { %v6233_v30 = vmul.f32 -1.442695, %v4762_v10  ;;  %v6234_v27 = vmul.f32 -1.442695, %v4764_v57 }
0x1fe2   :  { %7879 = vpow2.f32 %v6232_v45 }
0x1fe3   :  { %7881 = vpow2.f32 %v6233_v30 }
0x1fe4   :  { %7883 = vpow2.f32 %v6234_v27  ;;  %v9637_v27 = vld [vmem:[#allocation17_spill] sm:$0xff] }
0x1fe5   :  { %7885 = vtanh.f32 %v4763_v5  ;;  %v9636_v5 = vmov 0.0  }
0x1fec   :  { %v7880_v14 = vpop.eup %7879 }
0x1fed   :  { %v7882_v32 = vpop.eup %7881  ;;  %v4768_v24 = vadd.f32 1.0, %v7880_v14 }
0x1fee   :  { %v4774_v51 = vadd.f32 1.0, %v7882_v32  ;;  %v7884_v2 = vpop.eup %7883  ;;  %v9638_v32 = vld [vmem:[#allocation18_spill] sm:$0xff] }
0x1fef   :  { %7887 = vrcp.f32 %v4768_v24  ;;  %v7886_v44 = vpop.eup %7885  ;;  %v4781_v36 = vadd.f32 1.0, %v7884_v2 }
0x1ff0   :  { %7889 = vrcp.f32 %v4774_v51 }
0x1ff1   :  { %7891 = vrcp.f32 %v4781_v36 }
0x1ff9   :  { %v7888_v54 = vpop.eup %7887 }
0x1ffa   :  { %v7890_v42 = vpop.eup %7889  ;;  %v4785_v8 = vmul.f32 %v7888_v54, %v7886_v44  ;;  %v9639_v44 = vld [vmem:[#allocation19_spill] sm:$0xff] }
0x1ffb   :  { %v4784_v49 = vmul.f32 0.0, %v7890_v42  ;;  %v7892_v11 = vpop.eup %7891  ;;  %v9640_v42 = vld [vmem:[#allocation20_spill] sm:$0xff] }
0x1ffd   :  { %v9310_v25 = vadd.f32 %v4785_v8, %v4784_v49 }
0x1fff   :  { %7893 = vtanh.f32 %v9310_v25 }
0x2009   :  { %v7894_v10 = vpop.eup %7893 }
0x200a   :  { %v4788_v57 = vmul.f32 %v7894_v10, %v7892_v11 }
0x200c   :  { %4870 = vmatmul.mubr.f32.vlgmr.msra.gmra.mrb[56].mxu0 %v4788_v57  ;;  %4941 = vmatmul.mubr.f32.vlgmr.msra.gmra.mrb[46].mxu1 %v4788_v57 }
0x200d   :  { %7387 = vmatpush1.bf16.msra.mxu0 %v8991_v0  ;;  %7419 = vmatpush1.bf16.msra.mxu1 %v8993_v26 }
0x200e   :  { %7389 = vmatprep.subr.bf16.mxu0 %v8995_v3  ;;  %7421 = vmatprep.subr.bf16.mxu1 %v8997_v4 }
0x200f   :  { %5059 = vmatprep.mubr.f32.mxu0 %v9636_v5  ;;  %5130 = vmatprep.mubr.f32.mxu1 %v9636_v5 }
0x2011   :  { %7391 = vmatpush1.bf16.msra.mxu0 %v9001_v16  ;;  %7423 = vmatpush1.bf16.msra.mxu1 %v9003_v9 }
0x2012   :  { %7393 = vmatprep.subr.bf16.mxu0 %v9007_v21  ;;  %7425 = vmatprep.subr.bf16.mxu1 %v9009_v22 }
0x2015   :  { %7395 = vmatpush1.bf16.msra.mxu0 %v9015_v41  ;;  %7427 = vmatpush1.bf16.msra.mxu1 %v9017_v52 }
0x2016   :  { %7397 = vmatprep.subr.bf16.mxu0 %v9021_v29  ;;  %7429 = vmatprep.subr.bf16.mxu1 %v9023_v31 }
0x2019   :  { %7399 = vmatpush1.bf16.msra.mxu0 %v9029_v15  ;;  %7431 = vmatpush1.bf16.msra.mxu1 %v9031_v61 }
0x201a   :  { %7401 = vmatprep.subr.bf16.mxu0 %v9035_v47  ;;  %7433 = vmatprep.subr.bf16.mxu1 %v9037_v35 }
0x201d   :  { %7403 = vmatpush1.bf16.msra.mxu0 %v9041_v13  ;;  %7435 = vmatpush1.bf16.msra.mxu1 %v9043_v53 }
0x201e   :  { %7405 = vmatprep.subr.bf16.mxu0 %v9047_v58  ;;  %7437 = vmatprep.subr.bf16.mxu1 %v9049_v12 }
0x2021   :  { %7407 = vmatpush1.bf16.msra.mxu0 %v9053_v60  ;;  %7439 = vmatpush1.bf16.msra.mxu1 %v9055_v6 }
0x2022   :  { %7409 = vmatprep.subr.bf16.mxu0 %v9059_v18  ;;  %7441 = vmatprep.subr.bf16.mxu1 %v9061_v50 }
0x2025   :  { %7411 = vmatpush1.bf16.msra.mxu0 %v9065_v40  ;;  %7443 = vmatpush1.bf16.msra.mxu1 %v9067_v63 }
0x2026   :  { %7413 = vmatprep.subr.bf16.mxu0 %v9071_v33  ;;  %7445 = vmatprep.subr.bf16.mxu1 %v9073_v34 }
0x2029   :  { %7415 = vmatpush1.bf16.msra.mxu0 %v9077_v37  ;;  %7447 = vmatpush1.bf16.msra.mxu1 %v9079_v38 }
0x202a   :  { %7449 = vmatprep.subr.bf16.mxu0 %v8985_v19  ;;  %7481 = vmatprep.subr.bf16.mxu1 %v8987_v1 }
0x20df   :  { %v4871_v45 = vpop.f32.mrb[56].mxu0  ;;  %v4942_v30 = vpop.f32.mrb[46].mxu1 }
0x20e0   :  { %v4947_v14 = vadd.f32 %v4871_v45, %v9637_v27  ;;  %v4949_v24 = vadd.f32 %v4942_v30, %v9638_v32  ;;  %v4873_v51 = vpop.f32.mrb[57].mxu0  ;;  %v4944_v2 = vpop.f32.mrb[47].mxu1 }
0x20e1   :  { %v4948_v54 = vadd.f32 %v4873_v51, %v9639_v44  ;;  %v4950_v8 = vadd.f32 %v4944_v2, %v9640_v42 }
0x20e2   :  { %v6235_v36 = vmul.f32 -1.442695, %v4947_v14 }
0x20e3   :  { %v6236_v49 = vmul.f32 -1.442695, %v4948_v54  ;;  %v6237_v11 = vmul.f32 -1.442695, %v4950_v8 }
0x20e4   :  { %7895 = vpow2.f32 %v6235_v36 }
0x20e5   :  { %7897 = vpow2.f32 %v6236_v49 }
0x20e6   :  { %7899 = vpow2.f32 %v6237_v11 }
0x20e7   :  { %7901 = vtanh.f32 %v4949_v24 }
0x20ee   :  { %v7896_v10 = vpop.eup %7895 }
0x20ef   :  { %v7898_v57 = vpop.eup %7897  ;;  %v4954_v20 = vadd.f32 1.0, %v7896_v10 }
0x20f0   :  { %v4960_v62 = vadd.f32 1.0, %v7898_v57  ;;  %v7900_v45 = vpop.eup %7899 }
0x20f1   :  { %7903 = vrcp.f32 %v4954_v20  ;;  %v7902_v30 = vpop.eup %7901  ;;  %v4967_v44 = vadd.f32 1.0, %v7900_v45 }
0x20f2   :  { %7905 = vrcp.f32 %v4960_v62 }
0x20f3   :  { %7907 = vrcp.f32 %v4967_v44 }
0x20fb   :  { %v7904_v27 = vpop.eup %7903 }
0x20fc   :  { %v7906_v32 = vpop.eup %7905  ;;  %v4971_v51 = vmul.f32 %v7904_v27, %v7902_v30 }
0x20fd   :  { %v4970_v14 = vmul.f32 %v7906_v32, %v9310_v25  ;;  %v7908_v54 = vpop.eup %7907 }
0x20ff   :  { %v9352_v2 = vadd.f32 %v4971_v51, %v4970_v14 }
0x2101   :  { %7909 = vtanh.f32 %v9352_v2 }
0x210b   :  { %v7910_v42 = vpop.eup %7909 }
0x210c   :  { %v4974_v8 = vmul.f32 %v7910_v42, %v7908_v54 }
0x210e   :  { %5060 = vmatmul.mubr.f32.vlgmr.msra.gmra.mrb[58].mxu0 %v4974_v8  ;;  %5131 = vmatmul.mubr.f32.vlgmr.msra.gmra.mrb[48].mxu1 %v4974_v8 }
0x210f   :  { %7451 = vmatpush1.bf16.msra.mxu0 %v8991_v0  ;;  %7483 = vmatpush1.bf16.msra.mxu1 %v8993_v26 }
0x2110   :  { %7453 = vmatprep.subr.bf16.mxu0 %v8995_v3  ;;  %7485 = vmatprep.subr.bf16.mxu1 %v8997_v4 }
0x2111   :  { %5249 = vmatprep.mubr.f32.mxu0 %v9636_v5  ;;  %5320 = vmatprep.mubr.f32.mxu1 %v9636_v5 }
0x2113   :  { %7455 = vmatpush1.bf16.msra.mxu0 %v9001_v16  ;;  %7487 = vmatpush1.bf16.msra.mxu1 %v9003_v9 }
0x2114   :  { %7457 = vmatprep.subr.bf16.mxu0 %v9007_v21  ;;  %7489 = vmatprep.subr.bf16.mxu1 %v9009_v22 }
0x2117   :  { %7459 = vmatpush1.bf16.msra.mxu0 %v9015_v41  ;;  %7491 = vmatpush1.bf16.msra.mxu1 %v9017_v52 }
0x2118   :  { %7461 = vmatprep.subr.bf16.mxu0 %v9021_v29  ;;  %7493 = vmatprep.subr.bf16.mxu1 %v9023_v31 }
0x211b   :  { %7463 = vmatpush1.bf16.msra.mxu0 %v9029_v15  ;;  %7495 = vmatpush1.bf16.msra.mxu1 %v9031_v61 }
0x211c   :  { %7465 = vmatprep.subr.bf16.mxu0 %v9035_v47  ;;  %7497 = vmatprep.subr.bf16.mxu1 %v9037_v35 }
0x211f   :  { %7467 = vmatpush1.bf16.msra.mxu0 %v9041_v13  ;;  %7499 = vmatpush1.bf16.msra.mxu1 %v9043_v53 }
0x2120   :  { %7469 = vmatprep.subr.bf16.mxu0 %v9047_v58  ;;  %7501 = vmatprep.subr.bf16.mxu1 %v9049_v12 }
0x2123   :  { %7471 = vmatpush1.bf16.msra.mxu0 %v9053_v60  ;;  %7503 = vmatpush1.bf16.msra.mxu1 %v9055_v6 }
0x2124   :  { %7473 = vmatprep.subr.bf16.mxu0 %v9059_v18  ;;  %7505 = vmatprep.subr.bf16.mxu1 %v9061_v50 }
0x2127   :  { %7475 = vmatpush1.bf16.msra.mxu0 %v9065_v40  ;;  %7507 = vmatpush1.bf16.msra.mxu1 %v9067_v63 }
0x2128   :  { %7477 = vmatprep.subr.bf16.mxu0 %v9071_v33  ;;  %7509 = vmatprep.subr.bf16.mxu1 %v9073_v34 }
0x212b   :  { %7479 = vmatpush1.bf16.msra.mxu0 %v9077_v37  ;;  %7511 = vmatpush1.bf16.msra.mxu1 %v9079_v38 }
0x212c   :  { %7513 = vmatprep.subr.bf16.mxu0 %v8985_v19  ;;  %7545 = vmatprep.subr.bf16.mxu1 %v8987_v1 }
0x21e1   :  { %v5061_v62 = vpop.f32.mrb[58].mxu0  ;;  %v5132_v20 = vpop.f32.mrb[48].mxu1 }
0x21e2   :  { %v5137_v25 = vadd.f32 %v5061_v62, %v9199_v56  ;;  %v5139_v24 = vadd.f32 %v5132_v20, %v9202_v39  ;;  %v5063_v36 = vpop.f32.mrb[59].mxu0  ;;  %v5134_v49 = vpop.f32.mrb[49].mxu1 }
0x21e3   :  { %v5138_v11 = vadd.f32 %v5063_v36, %v9207_v46  ;;  %v5140_v10 = vadd.f32 %v5134_v49, %v9210_v48  ;;  %v9641_v36 = vld [vmem:[#allocation21_spill] sm:$0xff] }
0x21e4   :  { %v6238_v57 = vmul.f32 -1.442695, %v5137_v25 }
0x21e5   :  { %v6239_v45 = vmul.f32 -1.442695, %v5138_v11  ;;  %v6240_v30 = vmul.f32 -1.442695, %v5140_v10  ;;  %v9642_v11 = vld [vmem:[#allocation22_spill] sm:$0xff] }
0x21e6   :  { %7911 = vpow2.f32 %v6238_v57 }
0x21e7   :  { %7913 = vpow2.f32 %v6239_v45 }
0x21e8   :  { %7915 = vpow2.f32 %v6240_v30  ;;  %v9643_v30 = vld [vmem:[#allocation23_spill] sm:$0xff] }
0x21e9   :  { %7917 = vtanh.f32 %v5139_v24 }
0x21f0   :  { %v7912_v27 = vpop.eup %7911 }
0x21f1   :  { %v7914_v32 = vpop.eup %7913  ;;  %v5144_v51 = vadd.f32 1.0, %v7912_v27 }
0x21f2   :  { %v5150_v44 = vadd.f32 1.0, %v7914_v32  ;;  %v7916_v56 = vpop.eup %7915  ;;  %v9644_v32 = vld [vmem:[#allocation24_spill] sm:$0xff] }
0x21f3   :  { %7919 = vrcp.f32 %v5144_v51  ;;  %v7918_v39 = vpop.eup %7917  ;;  %v5157_v42 = vadd.f32 1.0, %v7916_v56 }
0x21f4   :  { %7921 = vrcp.f32 %v5150_v44 }
0x21f5   :  { %7923 = vrcp.f32 %v5157_v42 }
0x21fd   :  { %v7920_v14 = vpop.eup %7919 }
0x21fe   :  { %v7922_v54 = vpop.eup %7921  ;;  %v5161_v46 = vmul.f32 %v7920_v14, %v7918_v39 }
0x21ff   :  { %v5160_v48 = vmul.f32 %v7922_v54, %v9352_v2  ;;  %v7924_v62 = vpop.eup %7923 }
0x2201   :  { %v9394_v8 = vadd.f32 %v5161_v46, %v5160_v48 }
0x2203   :  { %7925 = vtanh.f32 %v9394_v8 }
0x220d   :  { %v7926_v20 = vpop.eup %7925 }
0x220e   :  { %v5164_v25 = vmul.f32 %v7926_v20, %v7924_v62 }
0x2210   :  { %5250 = vmatmul.mubr.f32.vlgmr.msra.gmra.mrb[60].mxu0 %v5164_v25  ;;  %5321 = vmatmul.mubr.f32.vlgmr.msra.gmra.mrb[50].mxu1 %v5164_v25 }
0x2211   :  { %7515 = vmatpush1.bf16.msra.mxu0 %v8991_v0  ;;  %7547 = vmatpush1.bf16.msra.mxu1 %v8993_v26 }
0x2212   :  { %7517 = vmatprep.subr.bf16.mxu0 %v8995_v3  ;;  %7549 = vmatprep.subr.bf16.mxu1 %v8997_v4 }
0x2213   :  { %5439 = vmatprep.mubr.f32.mxu0 %v9636_v5  ;;  %5510 = vmatprep.mubr.f32.mxu1 %v9636_v5 }
0x2215   :  { %7519 = vmatpush1.bf16.msra.mxu0 %v9001_v16  ;;  %7551 = vmatpush1.bf16.msra.mxu1 %v9003_v9 }
0x2216   :  { %7521 = vmatprep.subr.bf16.mxu0 %v9007_v21  ;;  %7553 = vmatprep.subr.bf16.mxu1 %v9009_v22 }
0x2219   :  { %7523 = vmatpush1.bf16.msra.mxu0 %v9015_v41  ;;  %7555 = vmatpush1.bf16.msra.mxu1 %v9017_v52 }
0x221a   :  { %7525 = vmatprep.subr.bf16.mxu0 %v9021_v29  ;;  %7557 = vmatprep.subr.bf16.mxu1 %v9023_v31 }
0x221d   :  { %7527 = vmatpush1.bf16.msra.mxu0 %v9029_v15  ;;  %7559 = vmatpush1.bf16.msra.mxu1 %v9031_v61 }
0x221e   :  { %7529 = vmatprep.subr.bf16.mxu0 %v9035_v47  ;;  %7561 = vmatprep.subr.bf16.mxu1 %v9037_v35 }
0x2221   :  { %7531 = vmatpush1.bf16.msra.mxu0 %v9041_v13  ;;  %7563 = vmatpush1.bf16.msra.mxu1 %v9043_v53 }
0x2222   :  { %7533 = vmatprep.subr.bf16.mxu0 %v9047_v58  ;;  %7565 = vmatprep.subr.bf16.mxu1 %v9049_v12 }
0x2225   :  { %7535 = vmatpush1.bf16.msra.mxu0 %v9053_v60  ;;  %7567 = vmatpush1.bf16.msra.mxu1 %v9055_v6 }
0x2226   :  { %7537 = vmatprep.subr.bf16.mxu0 %v9059_v18  ;;  %7569 = vmatprep.subr.bf16.mxu1 %v9061_v50 }
0x2229   :  { %7539 = vmatpush1.bf16.msra.mxu0 %v9065_v40  ;;  %7571 = vmatpush1.bf16.msra.mxu1 %v9067_v63 }
0x222a   :  { %7541 = vmatprep.subr.bf16.mxu0 %v9071_v33  ;;  %7573 = vmatprep.subr.bf16.mxu1 %v9073_v34 }
0x222d   :  { %7543 = vmatpush1.bf16.msra.mxu0 %v9077_v37  ;;  %7575 = vmatpush1.bf16.msra.mxu1 %v9079_v38 }
0x222e   :  { %7577 = vmatprep.subr.bf16.mxu0 %v8985_v19  ;;  %7609 = vmatprep.subr.bf16.mxu1 %v8987_v1 }
0x22e3   :  { %v5251_v2 = vpop.f32.mrb[60].mxu0  ;;  %v5322_v24 = vpop.f32.mrb[50].mxu1 }
0x22e4   :  { %v5327_v49 = vadd.f32 %v5251_v2, %v9641_v36  ;;  %v5329_v10 = vadd.f32 %v5322_v24, %v9642_v11  ;;  %v5253_v57 = vpop.f32.mrb[61].mxu0  ;;  %v5324_v45 = vpop.f32.mrb[51].mxu1 }
0x22e5   :  { %v5328_v27 = vadd.f32 %v5253_v57, %v9643_v30  ;;  %v5330_v51 = vadd.f32 %v5324_v45, %v9644_v32  ;;  %v9645_v30 = vld [vmem:[#allocation25_spill] sm:$0xff]  ;;  %v9646_v32 = vld [vmem:[#allocation26_spill] sm:$0xff] }
0x22e6   :  { %v6241_v44 = vmul.f32 -1.442695, %v5327_v49 }
0x22e7   :  { %v6242_v56 = vmul.f32 -1.442695, %v5328_v27  ;;  %v6243_v39 = vmul.f32 -1.442695, %v5330_v51 }
0x22e8   :  { %7927 = vpow2.f32 %v6241_v44 }
0x22e9   :  { %7929 = vpow2.f32 %v6242_v56 }
0x22ea   :  { %7931 = vpow2.f32 %v6243_v39  ;;  %v9647_v39 = vld [vmem:[#allocation27_spill] sm:$0xff] }
0x22eb   :  { %7933 = vtanh.f32 %v5329_v10 }
0x22f2   :  { %v7928_v14 = vpop.eup %7927 }
0x22f3   :  { %v7930_v54 = vpop.eup %7929  ;;  %v5334_v46 = vadd.f32 1.0, %v7928_v14 }
0x22f4   :  { %v5340_v42 = vadd.f32 1.0, %v7930_v54  ;;  %v7932_v48 = vpop.eup %7931  ;;  %v9648_v54 = vld [vmem:[#allocation28_spill] sm:$0xff] }
0x22f5   :  { %7935 = vrcp.f32 %v5334_v46  ;;  %v7934_v62 = vpop.eup %7933  ;;  %v5347_v24 = vadd.f32 1.0, %v7932_v48 }
0x22f6   :  { %7937 = vrcp.f32 %v5340_v42 }
0x22f7   :  { %7939 = vrcp.f32 %v5347_v24 }
0x22ff   :  { %v7936_v20 = vpop.eup %7935 }
0x2300   :  { %v7938_v25 = vpop.eup %7937  ;;  %v5351_v2 = vmul.f32 %v7936_v20, %v7934_v62 }
0x2301   :  { %v5350_v36 = vmul.f32 %v7938_v25, %v9394_v8  ;;  %v7940_v11 = vpop.eup %7939 }
0x2303   :  { %v9436_v49 = vadd.f32 %v5351_v2, %v5350_v36 }
0x2305   :  { %7941 = vtanh.f32 %v9436_v49 }
0x230f   :  { %v7942_v57 = vpop.eup %7941 }
0x2310   :  { %v5354_v45 = vmul.f32 %v7942_v57, %v7940_v11 }
0x2312   :  { %5440 = vmatmul.mubr.f32.vlgmr.msra.gmra.mrb[62].mxu0 %v5354_v45  ;;  %5511 = vmatmul.mubr.f32.vlgmr.msra.gmra.mrb[52].mxu1 %v5354_v45 }
0x2313   :  { %7579 = vmatpush1.bf16.msra.mxu0 %v8991_v0  ;;  %7611 = vmatpush1.bf16.msra.mxu1 %v8993_v26 }
0x2314   :  { %7581 = vmatprep.subr.bf16.mxu0 %v8995_v3  ;;  %7613 = vmatprep.subr.bf16.mxu1 %v8997_v4 }
0x2315   :  { %5629 = vmatprep.mubr.f32.mxu0 %v9636_v5  ;;  %5700 = vmatprep.mubr.f32.mxu1 %v9636_v5 }
0x2317   :  { %7583 = vmatpush1.bf16.msra.mxu0 %v9001_v16  ;;  %7615 = vmatpush1.bf16.msra.mxu1 %v9003_v9 }
0x2318   :  { %7585 = vmatprep.subr.bf16.mxu0 %v9007_v21  ;;  %7617 = vmatprep.subr.bf16.mxu1 %v9009_v22 }
0x231b   :  { %7587 = vmatpush1.bf16.msra.mxu0 %v9015_v41  ;;  %7619 = vmatpush1.bf16.msra.mxu1 %v9017_v52 }
0x231c   :  { %7589 = vmatprep.subr.bf16.mxu0 %v9021_v29  ;;  %7621 = vmatprep.subr.bf16.mxu1 %v9023_v31 }
0x231f   :  { %7591 = vmatpush1.bf16.msra.mxu0 %v9029_v15  ;;  %7623 = vmatpush1.bf16.msra.mxu1 %v9031_v61 }
0x2320   :  { %7593 = vmatprep.subr.bf16.mxu0 %v9035_v47  ;;  %7625 = vmatprep.subr.bf16.mxu1 %v9037_v35 }
0x2323   :  { %7595 = vmatpush1.bf16.msra.mxu0 %v9041_v13  ;;  %7627 = vmatpush1.bf16.msra.mxu1 %v9043_v53 }
0x2324   :  { %7597 = vmatprep.subr.bf16.mxu0 %v9047_v58  ;;  %7629 = vmatprep.subr.bf16.mxu1 %v9049_v12 }
0x2327   :  { %7599 = vmatpush1.bf16.msra.mxu0 %v9053_v60  ;;  %7631 = vmatpush1.bf16.msra.mxu1 %v9055_v6 }
0x2328   :  { %7601 = vmatprep.subr.bf16.mxu0 %v9059_v18  ;;  %7633 = vmatprep.subr.bf16.mxu1 %v9061_v50 }
0x232b   :  { %7603 = vmatpush1.bf16.msra.mxu0 %v9065_v40  ;;  %7635 = vmatpush1.bf16.msra.mxu1 %v9067_v63 }
0x232c   :  { %7605 = vmatprep.subr.bf16.mxu0 %v9071_v33  ;;  %7637 = vmatprep.subr.bf16.mxu1 %v9073_v34 }
0x232f   :  { %7607 = vmatpush1.bf16.msra.mxu0 %v9077_v37  ;;  %7639 = vmatpush1.bf16.msra.mxu1 %v9079_v38 }
0x2330   :  { %7641 = vmatprep.subr.bf16.mxu0 %v8985_v19  ;;  %7673 = vmatprep.subr.bf16.mxu1 %v8987_v1 }
0x23e5   :  { %v5441_v8 = vpop.f32.mrb[62].mxu0  ;;  %v5512_v10 = vpop.f32.mrb[52].mxu1 }
0x23e6   :  { %v5517_v27 = vadd.f32 %v5441_v8, %v9645_v30  ;;  %v5519_v51 = vadd.f32 %v5512_v10, %v9646_v32  ;;  %v5443_v44 = vpop.f32.mrb[63].mxu0  ;;  %v5514_v56 = vpop.f32.mrb[53].mxu1 }
0x23e7   :  { %v5518_v14 = vadd.f32 %v5443_v44, %v9647_v39  ;;  %v5520_v46 = vadd.f32 %v5514_v56, %v9648_v54  ;;  %v9649_v39 = vld [vmem:[#allocation29_spill] sm:$0xff]  ;;  %v9650_v54 = vld [vmem:[#allocation30_spill] sm:$0xff] }
0x23e8   :  { %v6244_v42 = vmul.f32 -1.442695, %v5517_v27 }
0x23e9   :  { %v6245_v48 = vmul.f32 -1.442695, %v5518_v14  ;;  %v6246_v62 = vmul.f32 -1.442695, %v5520_v46 }
0x23ea   :  { %7943 = vpow2.f32 %v6244_v42 }
0x23eb   :  { %7945 = vpow2.f32 %v6245_v48 }
0x23ec   :  { %7947 = vpow2.f32 %v6246_v62  ;;  %v9651_v62 = vld [vmem:[#allocation31_spill] sm:$0xff] }
0x23ed   :  { %7949 = vtanh.f32 %v5519_v51 }
0x23f4   :  { %v7944_v20 = vpop.eup %7943 }
0x23f5   :  { %v7946_v25 = vpop.eup %7945  ;;  %v5524_v2 = vadd.f32 1.0, %v7944_v20 }
0x23f6   :  { %v5530_v24 = vadd.f32 1.0, %v7946_v25  ;;  %v7948_v36 = vpop.eup %7947 }
0x23f7   :  { %7951 = vrcp.f32 %v5524_v2  ;;  %v7950_v11 = vpop.eup %7949  ;;  %v5537_v10 = vadd.f32 1.0, %v7948_v36 }
0x23f8   :  { %7953 = vrcp.f32 %v5530_v24 }
0x23f9   :  { %7955 = vrcp.f32 %v5537_v10 }
0x2401   :  { %v7952_v57 = vpop.eup %7951 }
0x2402   :  { %v7954_v45 = vpop.eup %7953  ;;  %v5541_v8 = vmul.f32 %v7952_v57, %v7950_v11 }
0x2403   :  { %v5540_v30 = vmul.f32 %v7954_v45, %v9436_v49  ;;  %v7956_v32 = vpop.eup %7955 }
0x2405   :  { %v9478_v27 = vadd.f32 %v5541_v8, %v5540_v30 }
0x2407   :  { %7957 = vtanh.f32 %v9478_v27 }
0x2411   :  { %v7958_v44 = vpop.eup %7957 }
0x2412   :  { %v5544_v56 = vmul.f32 %v7958_v44, %v7956_v32 }
0x2414   :  { %5630 = vmatmul.mubr.f32.vlgmr.msra.gmra.mrb[64].mxu0 %v5544_v56  ;;  %5701 = vmatmul.mubr.f32.vlgmr.msra.gmra.mrb[54].mxu1 %v5544_v56 }
0x2415   :  { %7643 = vmatpush1.bf16.msra.mxu0 %v8991_v0  ;;  %7675 = vmatpush1.bf16.msra.mxu1 %v8993_v26 }
0x2416   :  { %7645 = vmatprep.subr.bf16.mxu0 %v8995_v3  ;;  %7677 = vmatprep.subr.bf16.mxu1 %v8997_v4 }
0x2417   :  { %5819 = vmatprep.mubr.f32.mxu0 %v9636_v5  ;;  %5890 = vmatprep.mubr.f32.mxu1 %v9636_v5 }
0x2419   :  { %7647 = vmatpush1.bf16.msra.mxu0 %v9001_v16  ;;  %7679 = vmatpush1.bf16.msra.mxu1 %v9003_v9 }
0x241a   :  { %7649 = vmatprep.subr.bf16.mxu0 %v9007_v21  ;;  %7681 = vmatprep.subr.bf16.mxu1 %v9009_v22 }
0x241d   :  { %7651 = vmatpush1.bf16.msra.mxu0 %v9015_v41  ;;  %7683 = vmatpush1.bf16.msra.mxu1 %v9017_v52 }
0x241e   :  { %7653 = vmatprep.subr.bf16.mxu0 %v9021_v29  ;;  %7685 = vmatprep.subr.bf16.mxu1 %v9023_v31 }
0x2421   :  { %7655 = vmatpush1.bf16.msra.mxu0 %v9029_v15  ;;  %7687 = vmatpush1.bf16.msra.mxu1 %v9031_v61 }
0x2422   :  { %7657 = vmatprep.subr.bf16.mxu0 %v9035_v47  ;;  %7689 = vmatprep.subr.bf16.mxu1 %v9037_v35 }
0x2425   :  { %7659 = vmatpush1.bf16.msra.mxu0 %v9041_v13  ;;  %7691 = vmatpush1.bf16.msra.mxu1 %v9043_v53 }
0x2426   :  { %7661 = vmatprep.subr.bf16.mxu0 %v9047_v58  ;;  %7693 = vmatprep.subr.bf16.mxu1 %v9049_v12 }
0x2429   :  { %7663 = vmatpush1.bf16.msra.mxu0 %v9053_v60  ;;  %7695 = vmatpush1.bf16.msra.mxu1 %v9055_v6 }
0x242a   :  { %7665 = vmatprep.subr.bf16.mxu0 %v9059_v18  ;;  %7697 = vmatprep.subr.bf16.mxu1 %v9061_v50 }
0x242d   :  { %7667 = vmatpush1.bf16.msra.mxu0 %v9065_v40  ;;  %7699 = vmatpush1.bf16.msra.mxu1 %v9067_v63 }
0x242e   :  { %7669 = vmatprep.subr.bf16.mxu0 %v9071_v33  ;;  %7701 = vmatprep.subr.bf16.mxu1 %v9073_v34 }
0x2431   :  { %7671 = vmatpush1.bf16.msra.mxu0 %v9077_v37  ;;  %7703 = vmatpush1.bf16.msra.mxu1 %v9079_v38 }
0x2432   :  { %7705 = vmatprep.subr.bf16.mxu0 %v8985_v19  ;;  %7737 = vmatprep.subr.bf16.mxu1 %v8987_v1 }
0x24e7   :  { %v5631_v49 = vpop.f32.mrb[64].mxu0  ;;  %v5702_v51 = vpop.f32.mrb[54].mxu1 }
0x24e8   :  { %v5707_v14 = vadd.f32 %v5631_v49, %v9649_v39  ;;  %v5709_v46 = vadd.f32 %v5702_v51, %v9650_v54  ;;  %v5633_v42 = vpop.f32.mrb[65].mxu0  ;;  %v5704_v48 = vpop.f32.mrb[55].mxu1 }
0x24e9   :  { %v5708_v20 = vadd.f32 %v5633_v42, %v9651_v62  ;;  %v5710_v25 = vadd.f32 %v5704_v48, %v9269_v43 }
0x24ea   :  { %v6247_v2 = vmul.f32 -1.442695, %v5707_v14 }
0x24eb   :  { %v6248_v24 = vmul.f32 -1.442695, %v5708_v20  ;;  %v6249_v36 = vmul.f32 -1.442695, %v5710_v25 }
0x24ec   :  { %7959 = vpow2.f32 %v6247_v2 }
0x24ed   :  { %7961 = vpow2.f32 %v6248_v24 }
0x24ee   :  { %7963 = vpow2.f32 %v6249_v36 }
0x24ef   :  { %7965 = vtanh.f32 %v5709_v46 }
0x24f6   :  { %v7960_v19 = vpop.eup %7959 }
0x24f7   :  { %v7962_v11 = vpop.eup %7961  ;;  %v5714_v1 = vadd.f32 1.0, %v7960_v19 }
0x24f8   :  { %v5720_v57 = vadd.f32 1.0, %v7962_v11  ;;  %v7964_v45 = vpop.eup %7963 }
0x24f9   :  { %7967 = vrcp.f32 %v5714_v1  ;;  %v7966_v8 = vpop.eup %7965  ;;  %v5727_v44 = vadd.f32 1.0, %v7964_v45  ;;  %v6256_v45 = vld [vmem:[%s9591_s21] ss:$0 sm:$0xff] }
0x24fa   :  { %7969 = vrcp.f32 %v5720_v57 }
0x24fb   :  { %7971 = vrcp.f32 %v5727_v44 }
0x2503   :  { %v7968_v10 = vpop.eup %7967 }
0x2504   :  { %v7970_v30 = vpop.eup %7969  ;;  %v5731_v32 = vmul.f32 %v7968_v10, %v7966_v8 }
0x2505   :  { %v5730_v43 = vmul.f32 %v7970_v30, %v9478_v27  ;;  %v7972_v49 = vpop.eup %7971 }
0x2507   :  { %v9520_v56 = vadd.f32 %v5731_v32, %v5730_v43  ;;  %v6257_v32 = vld [vmem:[#allocation2] ss:$0 sm:$0xff] }
0x2509   :  { %7973 = vtanh.f32 %v9520_v56 }
0x2513   :  { %v7974_v51 = vpop.eup %7973 }
0x2514   :  { %v5734_v39 = vmul.f32 %v7974_v51, %v7972_v49 }
0x2516   :  { %5820 = vmatmul.mubr.f32.vlgmr.msra.gmra.mrb[66].mxu0 %v5734_v39  ;;  %5891 = vmatmul.mubr.f32.vlgmr.msra.gmra.mrb[56].mxu1 %v5734_v39 }
0x2517   :  { %7707 = vmatpush1.bf16.msra.mxu0 %v8991_v0  ;;  %7739 = vmatpush1.bf16.msra.mxu1 %v8993_v26 }
0x2518   :  { %7709 = vmatprep.subr.bf16.mxu0 %v8995_v3  ;;  %7741 = vmatprep.subr.bf16.mxu1 %v8997_v4 }
0x2519   :  { %6009 = vmatprep.mubr.f32.mxu0 %v9636_v5  ;;  %6080 = vmatprep.mubr.f32.mxu1 %v9636_v5  ;;  %v9653_v5 = vld [vmem:[#allocation33_spill] sm:$0xff] }
0x251b   :  { %7711 = vmatpush1.bf16.msra.mxu0 %v9001_v16  ;;  %7743 = vmatpush1.bf16.msra.mxu1 %v9003_v9 }
0x251c   :  { %7713 = vmatprep.subr.bf16.mxu0 %v9007_v21  ;;  %7745 = vmatprep.subr.bf16.mxu1 %v9009_v22 }
0x251f   :  { %7715 = vmatpush1.bf16.msra.mxu0 %v9015_v41  ;;  %7747 = vmatpush1.bf16.msra.mxu1 %v9017_v52 }
0x2520   :  { %7717 = vmatprep.subr.bf16.mxu0 %v9021_v29  ;;  %7749 = vmatprep.subr.bf16.mxu1 %v9023_v31 }
0x2523   :  { %7719 = vmatpush1.bf16.msra.mxu0 %v9029_v15  ;;  %7751 = vmatpush1.bf16.msra.mxu1 %v9031_v61 }
0x2524   :  { %7721 = vmatprep.subr.bf16.mxu0 %v9035_v47  ;;  %7753 = vmatprep.subr.bf16.mxu1 %v9037_v35 }
0x2527   :  { %7723 = vmatpush1.bf16.msra.mxu0 %v9041_v13  ;;  %7755 = vmatpush1.bf16.msra.mxu1 %v9043_v53 }
0x2528   :  { %7725 = vmatprep.subr.bf16.mxu0 %v9047_v58  ;;  %7757 = vmatprep.subr.bf16.mxu1 %v9049_v12 }
0x252b   :  { %7727 = vmatpush1.bf16.msra.mxu0 %v9053_v60  ;;  %7759 = vmatpush1.bf16.msra.mxu1 %v9055_v6 }
0x252c   :  { %7729 = vmatprep.subr.bf16.mxu0 %v9059_v18  ;;  %7761 = vmatprep.subr.bf16.mxu1 %v9061_v50 }
0x252f   :  { %7731 = vmatpush1.bf16.msra.mxu0 %v9065_v40  ;;  %7763 = vmatpush1.bf16.msra.mxu1 %v9067_v63 }
0x2530   :  { %7733 = vmatprep.subr.bf16.mxu0 %v9071_v33  ;;  %7765 = vmatprep.subr.bf16.mxu1 %v9073_v34 }
0x2533   :  { %7735 = vmatpush1.bf16.msra.mxu0 %v9077_v37  ;;  %7767 = vmatpush1.bf16.msra.mxu1 %v9079_v38 }
0x25e9   :  { %v5821_v0 = vpop.f32.mrb[66].mxu0  ;;  %v5892_v26 = vpop.f32.mrb[56].mxu1 }
0x25ea   :  { %v5897_v3 = vadd.f32 %v5821_v0, %v9272_v7  ;;  %v5899_v4 = vadd.f32 %v5892_v26, %v9277_v28  ;;  %v5823_v16 = vpop.f32.mrb[67].mxu0  ;;  %v5894_v9 = vpop.f32.mrb[57].mxu1  ;;  %v9652_v7 = vld [vmem:[#allocation32_spill] sm:$0xff] }
0x25eb   :  { %v5898_v21 = vadd.f32 %v5823_v16, %v9283_v23  ;;  %v5900_v22 = vadd.f32 %v5894_v9, %v9288_v17 }
0x25ec   :  { %v6250_v41 = vmul.f32 -1.442695, %v5897_v3 }
0x25ed   :  { %v6251_v52 = vmul.f32 -1.442695, %v5898_v21  ;;  %v6252_v29 = vmul.f32 -1.442695, %v5900_v22 }
0x25ee   :  { %7975 = vpow2.f32 %v6250_v41 }
0x25ef   :  { %7977 = vpow2.f32 %v6251_v52 }
0x25f0   :  { %7979 = vpow2.f32 %v6252_v29 }
0x25f1   :  { %7981 = vtanh.f32 %v5899_v4 }
0x25f8   :  { %v7976_v31 = vpop.eup %7975 }
0x25f9   :  { %v7978_v15 = vpop.eup %7977  ;;  %v5904_v61 = vadd.f32 1.0, %v7976_v31 }
0x25fa   :  { %v5910_v47 = vadd.f32 1.0, %v7978_v15  ;;  %v7980_v35 = vpop.eup %7979 }
0x25fb   :  { %7983 = vrcp.f32 %v5904_v61  ;;  %v7982_v13 = vpop.eup %7981  ;;  %v5917_v60 = vadd.f32 1.0, %v7980_v35 }
0x25fc   :  { %7985 = vrcp.f32 %v5910_v47 }
0x25fd   :  { %7987 = vrcp.f32 %v5917_v60 }
0x2605   :  { %v7984_v53 = vpop.eup %7983 }
0x2606   :  { %v7986_v58 = vpop.eup %7985  ;;  %v5921_v12 = vmul.f32 %v7984_v53, %v7982_v13 }
0x2607   :  { %v5920_v6 = vmul.f32 %v7986_v58, %v9520_v56  ;;  %v7988_v50 = vpop.eup %7987 }
0x2609   :  { %v5922_v18 = vadd.f32 %v5921_v12, %v5920_v6 }
0x260b   :  { %7989 = vtanh.f32 %v5922_v18 }
0x2615   :  { %v7990_v40 = vpop.eup %7989 }
0x2616   :  { %v5924_v63 = vmul.f32 %v7990_v40, %v7988_v50 }
0x2618   :  { %6010 = vmatmul.mubr.f32.vlgmr.msra.gmra.mrb[68].mxu0 %v5924_v63  ;;  %6081 = vmatmul.mubr.f32.vlgmr.msra.gmra.mrb[58].mxu1 %v5924_v63 }
0x26eb   :  { %v6011_v33 = vpop.f32.mrb[68].mxu0  ;;  %v6082_v34 = vpop.f32.mrb[58].mxu1 }
0x26ec   :  { %v6087_v37 = vadd.f32 %v6011_v33, %v9291_v59  ;;  %v6089_v38 = vadd.f32 %v6082_v34, %v9296_v55  ;;  %v6013_v23 = vpop.f32.mrb[69].mxu0  ;;  %v6084_v28 = vpop.f32.mrb[59].mxu1 }
0x26ed   :  { %v6088_v17 = vadd.f32 %v6013_v23, %v9652_v7  ;;  %v6090_v27 = vadd.f32 %v6084_v28, %v9653_v5 }
0x26ee   :  { %v6253_v14 = vmul.f32 -1.442695, %v6087_v37 }
0x26ef   :  { %v6254_v54 = vmul.f32 -1.442695, %v6088_v17  ;;  %v6255_v46 = vmul.f32 -1.442695, %v6090_v27 }
0x26f0   :  { %7991 = vpow2.f32 %v6253_v14 }
0x26f1   :  { %7993 = vpow2.f32 %v6254_v54 }
0x26f2   :  { %7995 = vpow2.f32 %v6255_v46 }
0x26f3   :  { %7997 = vtanh.f32 %v6089_v38 }
0x26fa   :  { %v7992_v42 = vpop.eup %7991 }
0x26fb   :  { %v7994_v48 = vpop.eup %7993  ;;  %v6094_v62 = vadd.f32 1.0, %v7992_v42 }
0x26fc   :  { %v6100_v20 = vadd.f32 1.0, %v7994_v48  ;;  %v7996_v59 = vpop.eup %7995 }
0x26fd   :  { %7999 = vrcp.f32 %v6094_v62  ;;  %v7998_v55 = vpop.eup %7997  ;;  %v6107_v36 = vadd.f32 1.0, %v7996_v59 }
0x26fe   :  { %8001 = vrcp.f32 %v6100_v20 }
0x26ff   :  { %8003 = vrcp.f32 %v6107_v36 }
0x2707   :  { %v8000_v25 = vpop.eup %7999 }
0x2708   :  { %v8002_v2 = vpop.eup %8001  ;;  %v6111_v24 = vmul.f32 %v8000_v25, %v7998_v55 }
0x2709   :  { %v6110_v19 = vmul.f32 %v8002_v2, %v5922_v18  ;;  %v8004_v1 = vpop.eup %8003 }
0x270b   :  { %v6112_v11 = vadd.f32 %v6111_v24, %v6110_v19 }
0x270d   :  { %8005 = vtanh.f32 %v6112_v11 }
0x2717   :  { %v8006_v57 = vpop.eup %8005 }
0x2718   :  { %v6114_v8 = vmul.f32 %v8006_v57, %v8004_v1 }
0x271a   :  { %v6122_v10 = vmul.f32 %v6256_v45, %v6114_v8 }
0x271c   :  { %v6124_v30 = vsel %vm6123_vm6, %v6122_v10, 0.0 }
0x271d   :  { %6125 = vadd.xlane.f32.xlu0 %v6124_v30 }
0x27aa   :  { %v6126_v44 = vpop.xlane.xlu0 %6125 }
0x27ab   :  { %v6134_v43 = vadd.f32 %v6257_v32, %v6126_v44 }
0x27ad   :  { %v6258_v56 = vmul.f32 -1.442695, %v6134_v43 }
0x27af   :  { %8007 = vpow2.f32 %v6258_v56 }
0x27b9   :  { %v8008_v49 = vpop.eup %8007 }
0x27ba   :  { %v6138_v51 = vadd.f32 1.0, %v8008_v49 }
0x27bc   :  { %8009 = vrcp.f32 %v6138_v51 }
0x27c6   :  { %v8010_v39 = vpop.eup %8009 }
0x27c7   :  { %6142 = vst.msk [vmem:[%s9593_s23] sm:$0x3] %vm6141_vm7, %v8010_v39 }
0x27c8   :  { %6147 = vsyncpa [#allocation4], 1 }
0x27c9   :  { %6148 = vsyncpa [#allocation6], 1 }
0x27ca   :  { %6149 = vsyncpa [#allocation9], 1 }
0x27cb   :  { %6150 = vsyncpa [#allocation12], 1 }

</bundles_post_ra>
